<compile_context>
chip_gen: v6e
topology: v6e:2x2x1
jax: 0.10.0
libtpu: 0.0.40
codegen_flags: <defaults>
</compile_context>

<pallas_src>
import jax
import jax.numpy as jnp
from jax.experimental import pallas as pl
from jax.experimental.pallas import tpu as pltpu

INPUT_SIZE = 2     # MountainCar-v0 observation space: (2,)
HIDDEN_SIZE = 64


def _round_up(n, m):
    return ((n + m - 1) // m) * m


def _autoencoder_kernel(x_ref, w1t_ref, b1_ref, w2_ref, b2_ref, o_ref):
    x = x_ref[...]                               # (TB, D_in)  batch on sublanes
    d_in = x.shape[1]

    # Encoder: h = relu(x @ W1.T + b1).  K = D_in (=2) would waste an MXU
    # push/pop round trip, so compute it as D_in rank-1 column-broadcast
    # multiply-adds on the VPU.  w1t is W1.T, shape (D_in, D_hid).
    acc = x[:, 0:1] * w1t_ref[0:1, :] + b1_ref[...]          # (TB, D_hid)
    for d in range(1, d_in):                                  # static tiny loop
        acc = acc + x[:, d:d + 1] * w1t_ref[d:d + 1, :]
    h = jnp.maximum(acc, 0.0)

    # Decoder: y = sigmoid(h @ W2.T + b2).  K = D_hid (=64) -> single MXU
    # contraction (A @ B^T form: contract last dim of h with last dim of W2).
    y = jax.lax.dot_general(
        h, w2_ref[...],
        dimension_numbers=(((1,), (1,)), ((), ())),
        preferred_element_type=jnp.float32)                   # (TB, D_in)
    o_ref[...] = jax.nn.sigmoid(y + b2_ref[...]).astype(o_ref.dtype)


def autoencoder_forward(x, w1, b1, w2, b2, *, max_block_b=4096):
    """Autoencoder forward pass.

    x : (B, D_in) float32
    w1: (D_hid, D_in), b1: (D_hid,)   -- torch nn.Linear layout
    w2: (D_in, D_hid), b2: (D_in,)
    returns (B, D_in) float32
    """
    B, D_in = x.shape
    D_hid = w1.shape[0]
    assert w1.shape == (D_hid, D_in)
    assert w2.shape == (D_in, D_hid)
    assert b1.shape == (D_hid,) and b2.shape == (D_in,)

    # Batch tile on the sublane axis, sized to the actual batch and capped for
    # scoped VMEM.  Keep an even grid when multiple steps are needed so the
    # "parallel" axis can use both v7x TensorCores.
    cap = max(128, (max_block_b // 128) * 128)
    if B <= cap:
        TB = _round_up(B, 8)
    else:
        n_steps = _round_up(pl.cdiv(B, cap), 2)          # even, >= 2
        TB = _round_up(pl.cdiv(B, n_steps), 8)
    grid_b = pl.cdiv(B, TB)

    # One-time parameter prep (a few hundred bytes; not per-batch HBM passes).
    w1t = jnp.transpose(w1)              # (D_in, D_hid)
    b1r = b1.reshape(1, D_hid)
    b2r = b2.reshape(1, D_in)

    return pl.pallas_call(
        _autoencoder_kernel,
        out_shape=jax.ShapeDtypeStruct((B, D_in), x.dtype),
        grid=(grid_b,),
        in_specs=[
            pl.BlockSpec((TB, D_in), lambda i: (i, 0)),       # x batch tile
            pl.BlockSpec((D_in, D_hid), lambda i: (0, 0)),    # W1.T (resident)
            pl.BlockSpec((1, D_hid), lambda i: (0, 0)),       # b1   (resident)
            pl.BlockSpec((D_in, D_hid), lambda i: (0, 0)),    # W2   (resident)
            pl.BlockSpec((1, D_in), lambda i: (0, 0)),        # b2   (resident)
        ],
        out_specs=pl.BlockSpec((TB, D_in), lambda i: (i, 0)),
        compiler_params=pltpu.CompilerParams(
            dimension_semantics=("parallel",),   # v7x: shard batch over 2 TCs
            vmem_limit_bytes=40 * 1024 * 1024,   # > v5e's 16 MiB default scoped
        ),
    )(x, w1t, b1r, w2, b2r)


def _reference_forward(x, w1, b1, w2, b2):
    h = jnp.maximum(
        jnp.dot(x, w1.T, precision=jax.lax.Precision.HIGHEST) + b1, 0.0)
    return jax.nn.sigmoid(
        jnp.dot(h, w2.T, precision=jax.lax.Precision.HIGHEST) + b2)


if __name__ == "__main__":
    key = jax.random.PRNGKey(0)
    k_x, k_w1, k_b1, k_w2, k_b2 = jax.random.split(key, 5)

    # torch Linear-style uniform init bounds (deterministic).
    bound1 = 1.0 / (INPUT_SIZE ** 0.5)
    bound2 = 1.0 / (HIDDEN_SIZE ** 0.5)
    w1 = jax.random.uniform(k_w1, (HIDDEN_SIZE, INPUT_SIZE),
                            minval=-bound1, maxval=bound1, dtype=jnp.float32)
    b1 = jax.random.uniform(k_b1, (HIDDEN_SIZE,),
                            minval=-bound1, maxval=bound1, dtype=jnp.float32)
    w2 = jax.random.uniform(k_w2, (INPUT_SIZE, HIDDEN_SIZE),
                            minval=-bound2, maxval=bound2, dtype=jnp.float32)
    b2 = jax.random.uniform(k_b2, (INPUT_SIZE,),
                            minval=-bound2, maxval=bound2, dtype=jnp.float32)

    # 1) Replay-buffer batch: single grid step, TB sized to the batch.
    B = 1024
    x = jax.random.normal(k_x, (B, INPUT_SIZE), dtype=jnp.float32)
    out = jax.block_until_ready(autoencoder_forward(x, w1, b1, w2, b2))
    ref = _reference_forward(x, w1, b1, w2, b2)
    assert out.shape == (B, INPUT_SIZE)
    assert jnp.allclose(out, ref, atol=1e-5, rtol=1e-5)

    # 2) Tiny inference batch: TB shrinks to the batch (no padded work).
    B2 = 8
    x2 = jax.random.normal(k_x, (B2, INPUT_SIZE), dtype=jnp.float32)
    out2 = jax.block_until_ready(autoencoder_forward(x2, w1, b1, w2, b2))
    ref2 = _reference_forward(x2, w1, b1, w2, b2)
    assert out2.shape == (B2, INPUT_SIZE)
    assert jnp.allclose(out2, ref2, atol=1e-5, rtol=1e-5)

    # 3) Multi-step grid with a partial last block (no jnp.pad anywhere;
    #    out-of-bounds rows of the final block are dropped by Pallas).
    B3 = 1000
    x3 = jax.random.normal(k_x, (B3, INPUT_SIZE), dtype=jnp.float32)
    out3 = jax.block_until_ready(
        autoencoder_forward(x3, w1, b1, w2, b2, max_block_b=256))
    ref3 = _reference_forward(x3, w1, b1, w2, b2)
    assert out3.shape == (B3, INPUT_SIZE)
    assert jnp.allclose(out3, ref3, atol=1e-5, rtol=1e-5)

    print("KERNEL_OK")
</pallas_src>

<mosaic_0001>
module attributes {stable_mosaic.version = 11 : i64} {
  func.func @_autoencoder_kernel(%arg0: i32, %arg1: memref<1024x2xf32, #tpu.memory_space<vmem>>, %arg2: memref<2x64xf32, #tpu.memory_space<vmem>>, %arg3: memref<1x64xf32, #tpu.memory_space<vmem>>, %arg4: memref<2x64xf32, #tpu.memory_space<vmem>>, %arg5: memref<1x2xf32, #tpu.memory_space<vmem>>, %arg6: memref<1024x2xf32, #tpu.memory_space<vmem>>) attributes {dimension_semantics = [#tpu.dimension_semantics<parallel>], iteration_bounds = array<i64: 1>, scalar_prefetch = 0 : i64, scratch_operands = 0 : i64, tpu.core_type = #tpu.core_type<tc>, window_params = [{transform_indices = @transform_0, window_bounds = array<i64: 1024, 2>}, {pipeline_mode = #tpu.pipeline_mode<synchronous>, transform_indices = @transform_1, window_bounds = array<i64: 2, 64>}, {pipeline_mode = #tpu.pipeline_mode<synchronous>, transform_indices = @transform_2, window_bounds = array<i64: 1, 64>}, {pipeline_mode = #tpu.pipeline_mode<synchronous>, transform_indices = @transform_3, window_bounds = array<i64: 2, 64>}, {pipeline_mode = #tpu.pipeline_mode<synchronous>, transform_indices = @transform_4, window_bounds = array<i64: 1, 2>}, {transform_indices = @transform_5, window_bounds = array<i64: 1024, 2>}]} {
    %c0 = arith.constant 0 : index
    %c0_0 = arith.constant 0 : index
    %0 = vector.load %arg1[%c0, %c0_0] : memref<1024x2xf32, #tpu.memory_space<vmem>>, vector<1024x2xf32>
    %1 = vector.extract_strided_slice %0 {offsets = [0, 0], sizes = [1024, 1], strides = [1, 1]} : vector<1024x2xf32> to vector<1024x1xf32>
    %c0_1 = arith.constant 0 : index
    %c0_2 = arith.constant 0 : index
    %2 = vector.load %arg2[%c0_1, %c0_2] : memref<2x64xf32, #tpu.memory_space<vmem>>, vector<1x64xf32>
    %3 = vector.broadcast %1 : vector<1024x1xf32> to vector<1024x64xf32>
    %4 = vector.broadcast %2 : vector<1x64xf32> to vector<1024x64xf32>
    %5 = arith.mulf %3, %4 : vector<1024x64xf32>
    %c0_3 = arith.constant 0 : index
    %c0_4 = arith.constant 0 : index
    %6 = vector.load %arg3[%c0_3, %c0_4] : memref<1x64xf32, #tpu.memory_space<vmem>>, vector<1x64xf32>
    %7 = vector.broadcast %6 : vector<1x64xf32> to vector<1024x64xf32>
    %8 = arith.addf %5, %7 : vector<1024x64xf32>
    %9 = vector.extract_strided_slice %0 {offsets = [0, 1], sizes = [1024, 1], strides = [1, 1]} : vector<1024x2xf32> to vector<1024x1xf32>
    %c1 = arith.constant 1 : index
    %c0_5 = arith.constant 0 : index
    %10 = vector.load %arg2[%c1, %c0_5] : memref<2x64xf32, #tpu.memory_space<vmem>>, vector<1x64xf32>
    %11 = vector.broadcast %9 : vector<1024x1xf32> to vector<1024x64xf32>
    %12 = vector.broadcast %10 : vector<1x64xf32> to vector<1024x64xf32>
    %13 = arith.mulf %11, %12 : vector<1024x64xf32>
    %14 = arith.addf %8, %13 : vector<1024x64xf32>
    %cst = arith.constant 0.000000e+00 : f32
    %15 = vector.broadcast %cst : f32 to vector<1024x64xf32>
    %16 = arith.maximumf %14, %15 : vector<1024x64xf32>
    %c0_6 = arith.constant 0 : index
    %c0_7 = arith.constant 0 : index
    %17 = vector.load %arg4[%c0_6, %c0_7] : memref<2x64xf32, #tpu.memory_space<vmem>>, vector<2x64xf32>
    %cst_8 = arith.constant dense<0.000000e+00> : vector<1024x2xf32>
    %18 = tpu.matmul %16, %17, %cst_8 {dimension_numbers = #tpu.dot_dimension_numbers<[1], [1], [0], [0], [0, 0, 1, 0], [], []>} : vector<1024x64xf32>, vector<2x64xf32>, vector<1024x2xf32> -> vector<1024x2xf32>
    %c0_9 = arith.constant 0 : index
    %c0_10 = arith.constant 0 : index
    %19 = vector.load %arg5[%c0_9, %c0_10] : memref<1x2xf32, #tpu.memory_space<vmem>>, vector<1x2xf32>
    %20 = vector.broadcast %19 : vector<1x2xf32> to vector<1024x2xf32>
    %21 = arith.addf %18, %20 : vector<1024x2xf32>
    %22 = arith.negf %21 : vector<1024x2xf32>
    %23 = math.exp %22 : vector<1024x2xf32>
    %cst_11 = arith.constant 1.000000e+00 : f32
    %24 = vector.broadcast %cst_11 : f32 to vector<1024x2xf32>
    %25 = arith.addf %24, %23 : vector<1024x2xf32>
    %26 = arith.divf %24, %25 : vector<1024x2xf32>
    %c0_12 = arith.constant 0 : index
    %c0_13 = arith.constant 0 : index
    %27 = vector.load %arg6[%c0_12, %c0_13] : memref<1024x2xf32, #tpu.memory_space<vmem>>, vector<1024x2xf32>
    tpu.vector_store %arg6[%c0_12, %c0_13], %26 {strides = array<i32>} : memref<1024x2xf32, #tpu.memory_space<vmem>>, vector<1024x2xf32>,
    return
  }
  func.func @transform_0(%arg0: i32) -> (i32, i32) {
    %c0_i32 = arith.constant 0 : i32
    %c0_i32_0 = arith.constant 0 : i32
    return %arg0, %c0_i32 : i32, i32
  }
  func.func @transform_1(%arg0: i32) -> (i32, i32) {
    %c0_i32 = arith.constant 0 : i32
    %c0_i32_0 = arith.constant 0 : i32
    %c0_i32_1 = arith.constant 0 : i32
    return %c0_i32, %c0_i32_0 : i32, i32
  }
  func.func @transform_2(%arg0: i32) -> (i32, i32) {
    %c0_i32 = arith.constant 0 : i32
    %c0_i32_0 = arith.constant 0 : i32
    %c0_i32_1 = arith.constant 0 : i32
    return %c0_i32, %c0_i32_0 : i32, i32
  }
  func.func @transform_3(%arg0: i32) -> (i32, i32) {
    %c0_i32 = arith.constant 0 : i32
    %c0_i32_0 = arith.constant 0 : i32
    %c0_i32_1 = arith.constant 0 : i32
    return %c0_i32, %c0_i32_0 : i32, i32
  }
  func.func @transform_4(%arg0: i32) -> (i32, i32) {
    %c0_i32 = arith.constant 0 : i32
    %c0_i32_0 = arith.constant 0 : i32
    %c0_i32_1 = arith.constant 0 : i32
    return %c0_i32, %c0_i32_0 : i32, i32
  }
  func.func @transform_5(%arg0: i32) -> (i32, i32) {
    %c0_i32 = arith.constant 0 : i32
    %c0_i32_0 = arith.constant 0 : i32
    return %arg0, %c0_i32 : i32, i32
  }
}

</mosaic_0001>

<bundles_post_ra>
// kernel: tpu_custom_call.1
= control target key start
LH: loop header
LB: loop body
LE: loop exit
PB: predicated region body
PF: predicated region fallthrough
CT: control target
= control target key end

     0   :  { %v5108_v0 = vmov 0   ;;  %vm1965_vm0 = vcmask 523264   ;;  %vm3826_vm1 = vcmask 15360   ;;  %s7656_s0 = inlined_call_operand.vmem [shape: f32[1024,2], index: 0, kind: input, shape index: {}]   ;;  %s7657_s3 = inlined_call_operand.vmem [shape: f32[2,64], index: 3, kind: input, shape index: {}]   ;;  %s7658_s1 = inlined_call_operand.vmem [shape: f32[2,64], index: 1, kind: input, shape index: {}]   ;;  %s7659_s2 = inlined_call_operand.vmem [shape: f32[1,64], index: 2, kind: input, shape index: {}]   ;;  %s7660_s4 = inlined_call_operand.vmem [shape: f32[1,2], index: 4, kind: input, shape index: {}]   ;;  %s7661_s5 = inlined_call_operand.vmem [shape: f32[1024,2], index: 5, kind: output, shape index: {}]  }
   0x1   :  { %4548 = vset.pattern.permute.xlu1 %v5108_v0  ;;  %4547 = vset.pattern.permute.xlu0 %v5108_v0  ;;  %v5143_v1 = vld [vmem:[%s7656_s0 + $0x10] sm:$0xff]  ;;  %v5148_v2 = vld [vmem:[%s7656_s0] sm:$0xff]  ;;  %v5155_v3 = vld [vmem:[%s7656_s0 + $0x18] sm:$0xff] }
   0x2   :  { %161 = vperm.xlu1 %4548, %v5143_v1   ;;  %151 = vperm.xlu0 %4547, %v5148_v2   ;;  %v5160_v4 = vld [vmem:[%s7656_s0 + $0x8] sm:$0xff]  ;;  %v5172_v6 = vld [vmem:[%s7656_s0 + $0x20] sm:$0xff]  ;;  %v5179_v7 = vld [vmem:[%s7656_s0 + $0x38] sm:$0xff] }
   0x3   :  { %v5167_v5 = vld [vmem:[%s7656_s0 + $0x28] sm:$0xff]  ;;  %v5184_v8 = vld [vmem:[%s7656_s0 + $0x30] sm:$0xff]  ;;  %v5196_v10 = vld [vmem:[%s7656_s0 + $0x40] sm:$0xff] }
   0x4   :  { %v5191_v9 = vld [vmem:[%s7656_s0 + $0x48] sm:$0xff]  ;;  %v5203_v11 = vld [vmem:[%s7656_s0 + $0x58] sm:$0xff]  ;;  %v5208_v12 = vld [vmem:[%s7656_s0 + $0x50] sm:$0xff] }
   0x5   :  { %v5215_v13 = vld [vmem:[%s7656_s0 + $0x68] sm:$0xff]  ;;  %v5220_v14 = vld [vmem:[%s7656_s0 + $0x60] sm:$0xff]  ;;  %v5227_v15 = vld [vmem:[%s7656_s0 + $0x78] sm:$0xff] }
   0x6   :  { %166 = vperm.xlu1 %4548, %v5155_v3   ;;  %156 = vperm.xlu0 %4547, %v5160_v4   ;;  %v5232_v16 = vld [vmem:[%s7656_s0 + $0x70] sm:$0xff]  ;;  %v5239_v17 = vld [vmem:[%s7656_s0 + $0x88] sm:$0xff]  ;;  %v5244_v18 = vld [vmem:[%s7656_s0 + $0x80] sm:$0xff] }
   0x7   :  { %v5251_v19 = vld [vmem:[%s7656_s0 + $0x98] sm:$0xff]  ;;  %v5256_v20 = vld [vmem:[%s7656_s0 + $0x90] sm:$0xff]  ;;  %v5263_v21 = vld [vmem:[%s7656_s0 + $0xa8] sm:$0xff] }
   0x8   :  { %v5268_v22 = vld [vmem:[%s7656_s0 + $0xa0] sm:$0xff]  ;;  %v5275_v23 = vld [vmem:[%s7656_s0 + $0xb8] sm:$0xff]  ;;  %v5280_v24 = vld [vmem:[%s7656_s0 + $0xb0] sm:$0xff] }
   0x9   :  { %v5287_v25 = vld [vmem:[%s7656_s0 + $0xc8] sm:$0xff]  ;;  %v5292_v26 = vld [vmem:[%s7656_s0 + $0xc0] sm:$0xff]  ;;  %v5299_v27 = vld [vmem:[%s7656_s0 + $0xd8] sm:$0xff] }
   0xa   :  { %176 = vperm.xlu1 %4548, %v5167_v5   ;;  %171 = vperm.xlu0 %4547, %v5172_v6   ;;  %v5304_v28 = vld [vmem:[%s7656_s0 + $0xd0] sm:$0xff]  ;;  %v5311_v29 = vld [vmem:[%s7656_s0 + $0xe8] sm:$0xff]  ;;  %v5316_v30 = vld [vmem:[%s7656_s0 + $0xe0] sm:$0xff] }
   0xb   :  { %7698 = vst [vmem:[#allocation2_spill] sm:$0xff] %v5311_v29  ;;  %7699 = vst [vmem:[#allocation3_spill] sm:$0xff] %v5316_v30  ;;  %v5323_v31 = vld [vmem:[%s7656_s0 + $0xf8] sm:$0xff]  ;;  %v5328_v32 = vld [vmem:[%s7656_s0 + $0xf0] sm:$0xff] }
   0xc   :  { %7700 = vst [vmem:[#allocation4_spill] sm:$0xff] %v5323_v31  ;;  %7701 = vst [vmem:[#allocation5_spill] sm:$0xff] %v5328_v32  ;;  %v5335_v33 = vld [vmem:[%s7656_s0 + $0x108] sm:$0xff]  ;;  %v5340_v34 = vld [vmem:[%s7656_s0 + $0x100] sm:$0xff] }
   0xd   :  { %7702 = vst [vmem:[#allocation6_spill] sm:$0xff] %v5335_v33  ;;  %7703 = vst [vmem:[#allocation7_spill] sm:$0xff] %v5340_v34  ;;  %v5347_v35 = vld [vmem:[%s7656_s0 + $0x118] sm:$0xff]  ;;  %v5352_v36 = vld [vmem:[%s7656_s0 + $0x110] sm:$0xff] }
   0xe   :  { %186 = vperm.xlu1 %4548, %v5179_v7   ;;  %181 = vperm.xlu0 %4547, %v5184_v8   ;;  %7704 = vst [vmem:[#allocation8_spill] sm:$0xff] %v5347_v35  ;;  %7705 = vst [vmem:[#allocation9_spill] sm:$0xff] %v5352_v36  ;;  %v5359_v37 = vld [vmem:[%s7656_s0 + $0x128] sm:$0xff]  ;;  %v5364_v38 = vld [vmem:[%s7656_s0 + $0x120] sm:$0xff] }
   0xf   :  { %7706 = vst [vmem:[#allocation10_spill] sm:$0xff] %v5359_v37  ;;  %7707 = vst [vmem:[#allocation11_spill] sm:$0xff] %v5364_v38  ;;  %v59_v39 = vld [vmem:[%s7656_s0 + $0x138] sm:$0xff]  ;;  %v5374_v40 = vld [vmem:[%s7656_s0 + $0x130] sm:$0xff] }
  0x10   :  { %7708 = vst [vmem:[#allocation12_spill] sm:$0xff] %v5374_v40  ;;  %v61_v41 = vld [vmem:[%s7656_s0 + $0x148] sm:$0xff]  ;;  %v60_v42 = vld [vmem:[%s7656_s0 + $0x140] sm:$0xff]  ;;  %v63_v43 = vld [vmem:[%s7656_s0 + $0x158] sm:$0xff] }
  0x11   :  { %v62_v44 = vld [vmem:[%s7656_s0 + $0x150] sm:$0xff]  ;;  %v65_v45 = vld [vmem:[%s7656_s0 + $0x168] sm:$0xff]  ;;  %v64_v46 = vld [vmem:[%s7656_s0 + $0x160] sm:$0xff] }
  0x12   :  { %196 = vperm.xlu1 %4548, %v5191_v9   ;;  %191 = vperm.xlu0 %4547, %v5196_v10   ;;  %v67_v47 = vld [vmem:[%s7656_s0 + $0x178] sm:$0xff]  ;;  %v66_v48 = vld [vmem:[%s7656_s0 + $0x170] sm:$0xff]  ;;  %v69_v49 = vld [vmem:[%s7656_s0 + $0x188] sm:$0xff] }
  0x13   :  { %v68_v50 = vld [vmem:[%s7656_s0 + $0x180] sm:$0xff]  ;;  %v71_v51 = vld [vmem:[%s7656_s0 + $0x198] sm:$0xff]  ;;  %v70_v52 = vld [vmem:[%s7656_s0 + $0x190] sm:$0xff] }
  0x14   :  { %v73_v53 = vld [vmem:[%s7656_s0 + $0x1a8] sm:$0xff]  ;;  %v72_v54 = vld [vmem:[%s7656_s0 + $0x1a0] sm:$0xff]  ;;  %v75_v55 = vld [vmem:[%s7656_s0 + $0x1b8] sm:$0xff] }
  0x15   :  { %v74_v56 = vld [vmem:[%s7656_s0 + $0x1b0] sm:$0xff]  ;;  %v77_v57 = vld [vmem:[%s7656_s0 + $0x1c8] sm:$0xff]  ;;  %v76_v58 = vld [vmem:[%s7656_s0 + $0x1c0] sm:$0xff] }
  0x16   :  { %206 = vperm.xlu1 %4548, %v5203_v11   ;;  %201 = vperm.xlu0 %4547, %v5208_v12   ;;  %v79_v59 = vld [vmem:[%s7656_s0 + $0x1d8] sm:$0xff]  ;;  %v78_v60 = vld [vmem:[%s7656_s0 + $0x1d0] sm:$0xff]  ;;  %v81_v61 = vld [vmem:[%s7656_s0 + $0x1e8] sm:$0xff] }
  0x17   :  { %v80_v62 = vld [vmem:[%s7656_s0 + $0x1e0] sm:$0xff]  ;;  %v83_v63 = vld [vmem:[%s7656_s0 + $0x1f8] sm:$0xff]  ;;  %v82_v0 = vld [vmem:[%s7656_s0 + $0x1f0] sm:$0xff] }
  0x1a   :  { %216 = vperm.xlu1 %4548, %v5215_v13   ;;  %211 = vperm.xlu0 %4547, %v5220_v14  }
  0x1e   :  { %226 = vperm.xlu1 %4548, %v5227_v15   ;;  %221 = vperm.xlu0 %4547, %v5232_v16  }
  0x22   :  { %236 = vperm.xlu1 %4548, %v5239_v17   ;;  %231 = vperm.xlu0 %4547, %v5244_v18  }
  0x26   :  { %246 = vperm.xlu1 %4548, %v5251_v19   ;;  %241 = vperm.xlu0 %4547, %v5256_v20  }
  0x2a   :  { %256 = vperm.xlu1 %4548, %v5263_v21   ;;  %251 = vperm.xlu0 %4547, %v5268_v22  }
  0x2e   :  { %266 = vperm.xlu1 %4548, %v5275_v23   ;;  %261 = vperm.xlu0 %4547, %v5280_v24  }
  0x32   :  { %276 = vperm.xlu1 %4548, %v5287_v25   ;;  %271 = vperm.xlu0 %4547, %v5292_v26  }
  0x36   :  { %286 = vperm.xlu1 %4548, %v5299_v27   ;;  %281 = vperm.xlu0 %4547, %v5304_v28  }
  0x3a   :  { %296 = vperm.xlu1 %4548, %v5311_v29   ;;  %291 = vperm.xlu0 %4547, %v5316_v30  }
  0x3e   :  { %306 = vperm.xlu1 %4548, %v5323_v31   ;;  %301 = vperm.xlu0 %4547, %v5328_v32  }
  0x42   :  { %316 = vperm.xlu1 %4548, %v5335_v33   ;;  %311 = vperm.xlu0 %4547, %v5340_v34  }
  0x46   :  { %326 = vperm.xlu1 %4548, %v5347_v35   ;;  %321 = vperm.xlu0 %4547, %v5352_v36  }
  0x4a   :  { %336 = vperm.xlu1 %4548, %v5359_v37   ;;  %331 = vperm.xlu0 %4547, %v5364_v38   ;;  %v5552_v37 = vld [vmem:[%s7656_s0 + $0x268] sm:$0xff]  ;;  %v5557_v38 = vld [vmem:[%s7656_s0 + $0x260] sm:$0xff] }
  0x4e   :  { %346 = vperm.xlu1 %4548, %v59_v39   ;;  %341 = vperm.xlu0 %4547, %v5374_v40  }
  0x52   :  { %356 = vperm.xlu1 %4548, %v61_v41   ;;  %351 = vperm.xlu0 %4547, %v60_v42   ;;  %v5456_v42 = vld [vmem:[%s7656_s0 + $0x208] sm:$0xff] }
  0x56   :  { %366 = vperm.xlu1 %4548, %v63_v43   ;;  %361 = vperm.xlu0 %4547, %v62_v44   ;;  %v5461_v43 = vld [vmem:[%s7656_s0 + $0x200] sm:$0xff] }
  0x5a   :  { %376 = vperm.xlu1 %4548, %v65_v45   ;;  %371 = vperm.xlu0 %4547, %v64_v46   ;;  %v5472_v46 = vld [vmem:[%s7656_s0 + $0x218] sm:$0xff] }
  0x5e   :  { %386 = vperm.xlu1 %4548, %v67_v47   ;;  %381 = vperm.xlu0 %4547, %v66_v48   ;;  %v5477_v47 = vld [vmem:[%s7656_s0 + $0x210] sm:$0xff] }
  0x62   :  { %396 = vperm.xlu1 %4548, %v69_v49   ;;  %391 = vperm.xlu0 %4547, %v68_v50   ;;  %v5488_v50 = vld [vmem:[%s7656_s0 + $0x228] sm:$0xff] }
  0x66   :  { %406 = vperm.xlu1 %4548, %v71_v51   ;;  %401 = vperm.xlu0 %4547, %v70_v52   ;;  %v5493_v51 = vld [vmem:[%s7656_s0 + $0x220] sm:$0xff] }
  0x6a   :  { %416 = vperm.xlu1 %4548, %v73_v53   ;;  %411 = vperm.xlu0 %4547, %v72_v54   ;;  %v5504_v54 = vld [vmem:[%s7656_s0 + $0x238] sm:$0xff] }
  0x6e   :  { %426 = vperm.xlu1 %4548, %v75_v55   ;;  %421 = vperm.xlu0 %4547, %v74_v56   ;;  %v5509_v55 = vld [vmem:[%s7656_s0 + $0x230] sm:$0xff] }
  0x72   :  { %436 = vperm.xlu1 %4548, %v77_v57   ;;  %431 = vperm.xlu0 %4547, %v76_v58   ;;  %v5520_v58 = vld [vmem:[%s7656_s0 + $0x248] sm:$0xff] }
  0x76   :  { %446 = vperm.xlu1 %4548, %v79_v59   ;;  %441 = vperm.xlu0 %4547, %v78_v60   ;;  %v5525_v59 = vld [vmem:[%s7656_s0 + $0x240] sm:$0xff] }
  0x7a   :  { %456 = vperm.xlu1 %4548, %v81_v61   ;;  %451 = vperm.xlu0 %4547, %v80_v62   ;;  %v5536_v62 = vld [vmem:[%s7656_s0 + $0x258] sm:$0xff] }
  0x7d   :  { %v5449_v39 = vpop.permute.xlu1 %161  ;;  %v5451_v41 = vpop.permute.xlu0 %151 }
  0x7e   :  { %7709 = vst [vmem:[#allocation13_spill] sm:$0xff] %v5449_v39  ;;  %7710 = vst [vmem:[#allocation14_spill] sm:$0xff] %v5451_v41  ;;  %466 = vperm.xlu1 %4548, %v83_v63   ;;  %461 = vperm.xlu0 %4547, %v82_v0   ;;  %v5541_v63 = vld [vmem:[%s7656_s0 + $0x250] sm:$0xff] }
  0x81   :  { %v5463_v44 = vpop.permute.xlu1 %166  ;;  %v5465_v45 = vpop.permute.xlu0 %156 }
  0x82   :  { %7711 = vst [vmem:[#allocation15_spill] sm:$0xff] %v5463_v44  ;;  %7712 = vst [vmem:[#allocation16_spill] sm:$0xff] %v5465_v45  ;;  %476 = vperm.xlu1 %4548, %v5456_v42   ;;  %471 = vperm.xlu0 %4547, %v5461_v43  }
  0x85   :  { %v5479_v48 = vpop.permute.xlu1 %176  ;;  %v5481_v49 = vpop.permute.xlu0 %171 }
  0x86   :  { %7713 = vst [vmem:[#allocation17_spill] sm:$0xff] %v5479_v48  ;;  %7714 = vst [vmem:[#allocation18_spill] sm:$0xff] %v5481_v49  ;;  %486 = vperm.xlu1 %4548, %v5472_v46   ;;  %481 = vperm.xlu0 %4547, %v5477_v47  }
  0x89   :  { %v5495_v52 = vpop.permute.xlu1 %186  ;;  %v5497_v53 = vpop.permute.xlu0 %181 }
  0x8a   :  { %7715 = vst [vmem:[#allocation19_spill] sm:$0xff] %v5495_v52  ;;  %7716 = vst [vmem:[#allocation20_spill] sm:$0xff] %v5497_v53  ;;  %496 = vperm.xlu1 %4548, %v5488_v50   ;;  %491 = vperm.xlu0 %4547, %v5493_v51  }
  0x8d   :  { %v5511_v56 = vpop.permute.xlu1 %196  ;;  %v5513_v57 = vpop.permute.xlu0 %191 }
  0x8e   :  { %7717 = vst [vmem:[#allocation21_spill] sm:$0xff] %v5511_v56  ;;  %7718 = vst [vmem:[#allocation22_spill] sm:$0xff] %v5513_v57  ;;  %506 = vperm.xlu1 %4548, %v5504_v54   ;;  %501 = vperm.xlu0 %4547, %v5509_v55  }
  0x91   :  { %v5527_v60 = vpop.permute.xlu1 %206  ;;  %v5529_v61 = vpop.permute.xlu0 %201 }
  0x92   :  { %7719 = vst [vmem:[#allocation23_spill] sm:$0xff] %v5527_v60  ;;  %7720 = vst [vmem:[#allocation24_spill] sm:$0xff] %v5529_v61  ;;  %516 = vperm.xlu1 %4548, %v5520_v58   ;;  %511 = vperm.xlu0 %4547, %v5525_v59  }
  0x95   :  { %v5543_v0 = vpop.permute.xlu1 %216  ;;  %v5545_v40 = vpop.permute.xlu0 %211 }
  0x96   :  { %7721 = vst [vmem:[#allocation25_spill] sm:$0xff] %v5543_v0  ;;  %7722 = vst [vmem:[#allocation26_spill] sm:$0xff] %v5545_v40  ;;  %526 = vperm.xlu1 %4548, %v5536_v62   ;;  %521 = vperm.xlu0 %4547, %v5541_v63   ;;  %v5568_v40 = vld [vmem:[%s7656_s0 + $0x278] sm:$0xff]  ;;  %v5573_v0 = vld [vmem:[%s7656_s0 + $0x270] sm:$0xff] }
  0x99   :  { %v5559_v35 = vpop.permute.xlu1 %226  ;;  %v5561_v61 = vpop.permute.xlu0 %221 }
  0x9a   :  { %7723 = vst [vmem:[#allocation27_spill] sm:$0xff] %v5559_v35  ;;  %7724 = vst [vmem:[#allocation28_spill] sm:$0xff] %v5561_v61  ;;  %536 = vperm.xlu1 %4548, %v5552_v37   ;;  %531 = vperm.xlu0 %4547, %v5557_v38   ;;  %v5584_v61 = vld [vmem:[%s7656_s0 + $0x288] sm:$0xff]  ;;  %v5589_v35 = vld [vmem:[%s7656_s0 + $0x280] sm:$0xff] }
  0x9d   :  { %v5575_v60 = vpop.permute.xlu1 %236  ;;  %v5577_v36 = vpop.permute.xlu0 %231 }
  0x9e   :  { %7725 = vst [vmem:[#allocation29_spill] sm:$0xff] %v5575_v60  ;;  %7726 = vst [vmem:[#allocation30_spill] sm:$0xff] %v5577_v36  ;;  %546 = vperm.xlu1 %4548, %v5568_v40   ;;  %541 = vperm.xlu0 %4547, %v5573_v0   ;;  %v5600_v36 = vld [vmem:[%s7656_s0 + $0x298] sm:$0xff]  ;;  %v5605_v60 = vld [vmem:[%s7656_s0 + $0x290] sm:$0xff] }
  0xa1   :  { %v5591_v57 = vpop.permute.xlu1 %246  ;;  %v5593_v56 = vpop.permute.xlu0 %241 }
  0xa2   :  { %7727 = vst [vmem:[#allocation31_spill] sm:$0xff] %v5591_v57  ;;  %7728 = vst [vmem:[#allocation32_spill] sm:$0xff] %v5593_v56  ;;  %556 = vperm.xlu1 %4548, %v5584_v61   ;;  %551 = vperm.xlu0 %4547, %v5589_v35   ;;  %v5616_v56 = vld [vmem:[%s7656_s0 + $0x2a8] sm:$0xff]  ;;  %v5621_v57 = vld [vmem:[%s7656_s0 + $0x2a0] sm:$0xff] }
  0xa5   :  { %v5607_v33 = vpop.permute.xlu1 %256  ;;  %v5609_v53 = vpop.permute.xlu0 %251 }
  0xa6   :  { %7729 = vst [vmem:[#allocation33_spill] sm:$0xff] %v5607_v33  ;;  %7730 = vst [vmem:[#allocation34_spill] sm:$0xff] %v5609_v53  ;;  %566 = vperm.xlu1 %4548, %v5600_v36   ;;  %561 = vperm.xlu0 %4547, %v5605_v60   ;;  %v5632_v53 = vld [vmem:[%s7656_s0 + $0x2b8] sm:$0xff]  ;;  %v5637_v33 = vld [vmem:[%s7656_s0 + $0x2b0] sm:$0xff] }
  0xa9   :  { %v5623_v52 = vpop.permute.xlu1 %266  ;;  %v5625_v34 = vpop.permute.xlu0 %261 }
  0xaa   :  { %7731 = vst [vmem:[#allocation35_spill] sm:$0xff] %v5623_v52  ;;  %7732 = vst [vmem:[#allocation36_spill] sm:$0xff] %v5625_v34  ;;  %576 = vperm.xlu1 %4548, %v5616_v56   ;;  %571 = vperm.xlu0 %4547, %v5621_v57   ;;  %v5648_v52 = vld [vmem:[%s7656_s0 + $0x2c8] sm:$0xff]  ;;  %v5653_v34 = vld [vmem:[%s7656_s0 + $0x2c0] sm:$0xff] }
  0xad   :  { %v5639_v49 = vpop.permute.xlu1 %276  ;;  %v5641_v48 = vpop.permute.xlu0 %271 }
  0xae   :  { %7733 = vst [vmem:[#allocation37_spill] sm:$0xff] %v5639_v49  ;;  %7734 = vst [vmem:[#allocation38_spill] sm:$0xff] %v5641_v48  ;;  %586 = vperm.xlu1 %4548, %v5632_v53   ;;  %581 = vperm.xlu0 %4547, %v5637_v33   ;;  %v5664_v49 = vld [vmem:[%s7656_s0 + $0x2d8] sm:$0xff]  ;;  %v5669_v48 = vld [vmem:[%s7656_s0 + $0x2d0] sm:$0xff] }
  0xaf   :  { %7737 = vst [vmem:[#allocation41_spill] sm:$0xff] %v5664_v49 }
  0xb1   :  { %v5655_v31 = vpop.permute.xlu1 %286  ;;  %v5657_v44 = vpop.permute.xlu0 %281 }
  0xb2   :  { %7735 = vst [vmem:[#allocation39_spill] sm:$0xff] %v5655_v31  ;;  %7736 = vst [vmem:[#allocation40_spill] sm:$0xff] %v5657_v44  ;;  %596 = vperm.xlu1 %4548, %v5648_v52   ;;  %591 = vperm.xlu0 %4547, %v5653_v34   ;;  %v5680_v31 = vld [vmem:[%s7656_s0 + $0x2e8] sm:$0xff]  ;;  %v5685_v44 = vld [vmem:[%s7656_s0 + $0x2e0] sm:$0xff] }
  0xb3   :  { %7740 = vst [vmem:[#allocation44_spill] sm:$0xff] %v5680_v31  ;;  %7741 = vst [vmem:[#allocation45_spill] sm:$0xff] %v5685_v44 }
  0xb5   :  { %v5671_v39 = vpop.permute.xlu1 %296  ;;  %v5673_v32 = vpop.permute.xlu0 %291 }
  0xb6   :  { %7738 = vst [vmem:[#allocation42_spill] sm:$0xff] %v5671_v39  ;;  %7739 = vst [vmem:[#allocation43_spill] sm:$0xff] %v5673_v32  ;;  %606 = vperm.xlu1 %4548, %v5664_v49   ;;  %601 = vperm.xlu0 %4547, %v5669_v48   ;;  %v5696_v39 = vld [vmem:[%s7656_s0 + $0x2f8] sm:$0xff]  ;;  %v5701_v32 = vld [vmem:[%s7656_s0 + $0x2f0] sm:$0xff] }
  0xb7   :  { %7744 = vst [vmem:[#allocation48_spill] sm:$0xff] %v5696_v39  ;;  %7745 = vst [vmem:[#allocation49_spill] sm:$0xff] %v5701_v32 }
  0xb9   :  { %v5687_v45 = vpop.permute.xlu1 %306  ;;  %v5689_v41 = vpop.permute.xlu0 %301 }
  0xba   :  { %7742 = vst [vmem:[#allocation46_spill] sm:$0xff] %v5687_v45  ;;  %7743 = vst [vmem:[#allocation47_spill] sm:$0xff] %v5689_v41  ;;  %616 = vperm.xlu1 %4548, %v5680_v31   ;;  %611 = vperm.xlu0 %4547, %v5685_v44   ;;  %v5712_v45 = vld [vmem:[%s7656_s0 + $0x308] sm:$0xff]  ;;  %v5717_v41 = vld [vmem:[%s7656_s0 + $0x300] sm:$0xff] }
  0xbb   :  { %7748 = vst [vmem:[#allocation52_spill] sm:$0xff] %v5712_v45  ;;  %7749 = vst [vmem:[#allocation53_spill] sm:$0xff] %v5717_v41 }
  0xbd   :  { %v5703_v29 = vpop.permute.xlu1 %316  ;;  %v5705_v30 = vpop.permute.xlu0 %311 }
  0xbe   :  { %7746 = vst [vmem:[#allocation50_spill] sm:$0xff] %v5703_v29  ;;  %7747 = vst [vmem:[#allocation51_spill] sm:$0xff] %v5705_v30  ;;  %626 = vperm.xlu1 %4548, %v5696_v39   ;;  %621 = vperm.xlu0 %4547, %v5701_v32   ;;  %v5728_v29 = vld [vmem:[%s7656_s0 + $0x318] sm:$0xff]  ;;  %v5733_v30 = vld [vmem:[%s7656_s0 + $0x310] sm:$0xff] }
  0xbf   :  { %7752 = vst [vmem:[#allocation56_spill] sm:$0xff] %v5728_v29  ;;  %7753 = vst [vmem:[#allocation57_spill] sm:$0xff] %v5733_v30 }
  0xc1   :  { %v5719_v31 = vpop.permute.xlu1 %326  ;;  %v5721_v44 = vpop.permute.xlu0 %321 }
  0xc2   :  { %7750 = vst [vmem:[#allocation54_spill] sm:$0xff] %v5719_v31  ;;  %7751 = vst [vmem:[#allocation55_spill] sm:$0xff] %v5721_v44  ;;  %636 = vperm.xlu1 %4548, %v5712_v45   ;;  %631 = vperm.xlu0 %4547, %v5717_v41   ;;  %v5744_v31 = vld [vmem:[%s7656_s0 + $0x328] sm:$0xff]  ;;  %v5749_v44 = vld [vmem:[%s7656_s0 + $0x320] sm:$0xff] }
  0xc3   :  { %7756 = vst [vmem:[#allocation60_spill] sm:$0xff] %v5744_v31  ;;  %7757 = vst [vmem:[#allocation61_spill] sm:$0xff] %v5749_v44 }
  0xc5   :  { %v5735_v39 = vpop.permute.xlu1 %336  ;;  %v5737_v32 = vpop.permute.xlu0 %331 }
  0xc6   :  { %7754 = vst [vmem:[#allocation58_spill] sm:$0xff] %v5735_v39  ;;  %7755 = vst [vmem:[#allocation59_spill] sm:$0xff] %v5737_v32  ;;  %646 = vperm.xlu1 %4548, %v5728_v29   ;;  %641 = vperm.xlu0 %4547, %v5733_v30   ;;  %v5760_v39 = vld [vmem:[%s7656_s0 + $0x338] sm:$0xff]  ;;  %v5765_v32 = vld [vmem:[%s7656_s0 + $0x330] sm:$0xff] }
  0xc7   :  { %7760 = vst [vmem:[#allocation64_spill] sm:$0xff] %v5760_v39  ;;  %7761 = vst [vmem:[#allocation65_spill] sm:$0xff] %v5765_v32 }
  0xc9   :  { %v5751_v45 = vpop.permute.xlu1 %346  ;;  %v5753_v41 = vpop.permute.xlu0 %341 }
  0xca   :  { %7758 = vst [vmem:[#allocation62_spill] sm:$0xff] %v5751_v45  ;;  %7759 = vst [vmem:[#allocation63_spill] sm:$0xff] %v5753_v41  ;;  %656 = vperm.xlu1 %4548, %v5744_v31   ;;  %651 = vperm.xlu0 %4547, %v5749_v44   ;;  %v5776_v45 = vld [vmem:[%s7656_s0 + $0x348] sm:$0xff]  ;;  %v5781_v41 = vld [vmem:[%s7656_s0 + $0x340] sm:$0xff] }
  0xcb   :  { %7764 = vst [vmem:[#allocation68_spill] sm:$0xff] %v5776_v45  ;;  %7765 = vst [vmem:[#allocation69_spill] sm:$0xff] %v5781_v41 }
  0xcd   :  { %v5767_v29 = vpop.permute.xlu1 %356  ;;  %v5769_v30 = vpop.permute.xlu0 %351 }
  0xce   :  { %7762 = vst [vmem:[#allocation66_spill] sm:$0xff] %v5767_v29  ;;  %7763 = vst [vmem:[#allocation67_spill] sm:$0xff] %v5769_v30  ;;  %666 = vperm.xlu1 %4548, %v5760_v39   ;;  %661 = vperm.xlu0 %4547, %v5765_v32   ;;  %v5792_v29 = vld [vmem:[%s7656_s0 + $0x358] sm:$0xff]  ;;  %v5797_v30 = vld [vmem:[%s7656_s0 + $0x350] sm:$0xff] }
  0xcf   :  { %7768 = vst [vmem:[#allocation72_spill] sm:$0xff] %v5792_v29  ;;  %7769 = vst [vmem:[#allocation73_spill] sm:$0xff] %v5797_v30 }
  0xd1   :  { %v5783_v31 = vpop.permute.xlu1 %366  ;;  %v5785_v44 = vpop.permute.xlu0 %361 }
  0xd2   :  { %7766 = vst [vmem:[#allocation70_spill] sm:$0xff] %v5783_v31  ;;  %7767 = vst [vmem:[#allocation71_spill] sm:$0xff] %v5785_v44  ;;  %676 = vperm.xlu1 %4548, %v5776_v45   ;;  %671 = vperm.xlu0 %4547, %v5781_v41   ;;  %v5808_v31 = vld [vmem:[%s7656_s0 + $0x368] sm:$0xff]  ;;  %v5813_v44 = vld [vmem:[%s7656_s0 + $0x360] sm:$0xff] }
  0xd3   :  { %7772 = vst [vmem:[#allocation76_spill] sm:$0xff] %v5808_v31  ;;  %7773 = vst [vmem:[#allocation77_spill] sm:$0xff] %v5813_v44 }
  0xd5   :  { %v5799_v39 = vpop.permute.xlu1 %376  ;;  %v5801_v32 = vpop.permute.xlu0 %371 }
  0xd6   :  { %7770 = vst [vmem:[#allocation74_spill] sm:$0xff] %v5799_v39  ;;  %7771 = vst [vmem:[#allocation75_spill] sm:$0xff] %v5801_v32  ;;  %686 = vperm.xlu1 %4548, %v5792_v29   ;;  %681 = vperm.xlu0 %4547, %v5797_v30   ;;  %v5824_v39 = vld [vmem:[%s7656_s0 + $0x378] sm:$0xff]  ;;  %v5829_v32 = vld [vmem:[%s7656_s0 + $0x370] sm:$0xff] }
  0xd7   :  { %7776 = vst [vmem:[#allocation80_spill] sm:$0xff] %v5824_v39  ;;  %7777 = vst [vmem:[#allocation81_spill] sm:$0xff] %v5829_v32 }
  0xd9   :  { %v5815_v45 = vpop.permute.xlu1 %386  ;;  %v5817_v41 = vpop.permute.xlu0 %381 }
  0xda   :  { %7774 = vst [vmem:[#allocation78_spill] sm:$0xff] %v5815_v45  ;;  %7775 = vst [vmem:[#allocation79_spill] sm:$0xff] %v5817_v41  ;;  %696 = vperm.xlu1 %4548, %v5808_v31   ;;  %691 = vperm.xlu0 %4547, %v5813_v44   ;;  %v5840_v45 = vld [vmem:[%s7656_s0 + $0x388] sm:$0xff]  ;;  %v5845_v41 = vld [vmem:[%s7656_s0 + $0x380] sm:$0xff] }
  0xdb   :  { %7780 = vst [vmem:[#allocation84_spill] sm:$0xff] %v5840_v45  ;;  %7781 = vst [vmem:[#allocation85_spill] sm:$0xff] %v5845_v41 }
  0xdd   :  { %v5831_v29 = vpop.permute.xlu1 %396  ;;  %v5833_v30 = vpop.permute.xlu0 %391 }
  0xde   :  { %7778 = vst [vmem:[#allocation82_spill] sm:$0xff] %v5831_v29  ;;  %7779 = vst [vmem:[#allocation83_spill] sm:$0xff] %v5833_v30  ;;  %706 = vperm.xlu1 %4548, %v5824_v39   ;;  %701 = vperm.xlu0 %4547, %v5829_v32   ;;  %v5856_v30 = vld [vmem:[%s7656_s0 + $0x398] sm:$0xff]  ;;  %v5861_v29 = vld [vmem:[%s7656_s0 + $0x390] sm:$0xff] }
  0xdf   :  { %7784 = vst [vmem:[#allocation88_spill] sm:$0xff] %v5856_v30  ;;  %7785 = vst [vmem:[#allocation89_spill] sm:$0xff] %v5861_v29 }
  0xe1   :  { %v5847_v31 = vpop.permute.xlu1 %406  ;;  %v5849_v44 = vpop.permute.xlu0 %401 }
  0xe2   :  { %7782 = vst [vmem:[#allocation86_spill] sm:$0xff] %v5847_v31  ;;  %7783 = vst [vmem:[#allocation87_spill] sm:$0xff] %v5849_v44  ;;  %716 = vperm.xlu1 %4548, %v5840_v45   ;;  %711 = vperm.xlu0 %4547, %v5845_v41   ;;  %v137_v44 = vld [vmem:[%s7656_s0 + $0x3a8] sm:$0xff]  ;;  %v136_v31 = vld [vmem:[%s7656_s0 + $0x3a0] sm:$0xff] }
  0xe5   :  { %v5863_v39 = vpop.permute.xlu1 %416  ;;  %v5865_v32 = vpop.permute.xlu0 %411 }
  0xe6   :  { %7786 = vst [vmem:[#allocation90_spill] sm:$0xff] %v5863_v39  ;;  %7787 = vst [vmem:[#allocation91_spill] sm:$0xff] %v5865_v32  ;;  %726 = vperm.xlu1 %4548, %v5856_v30   ;;  %721 = vperm.xlu0 %4547, %v5861_v29   ;;  %v139_v32 = vld [vmem:[%s7656_s0 + $0x3b8] sm:$0xff]  ;;  %v138_v39 = vld [vmem:[%s7656_s0 + $0x3b0] sm:$0xff] }
  0xe9   :  { %v5875_v45 = vpop.permute.xlu1 %426  ;;  %v5877_v41 = vpop.permute.xlu0 %421 }
  0xea   :  { %7788 = vst [vmem:[#allocation92_spill] sm:$0xff] %v5875_v45  ;;  %7789 = vst [vmem:[#allocation93_spill] sm:$0xff] %v5877_v41  ;;  %736 = vperm.xlu1 %4548, %v137_v44   ;;  %731 = vperm.xlu0 %4547, %v136_v31   ;;  %v141_v41 = vld [vmem:[%s7656_s0 + $0x3c8] sm:$0xff]  ;;  %v140_v31 = vld [vmem:[%s7656_s0 + $0x3c0] sm:$0xff] }
  0xed   :  { %v5885_v30 = vpop.permute.xlu1 %436  ;;  %v5887_v29 = vpop.permute.xlu0 %431 }
  0xee   :  { %7790 = vst [vmem:[#allocation94_spill] sm:$0xff] %v5885_v30  ;;  %7791 = vst [vmem:[#allocation95_spill] sm:$0xff] %v5887_v29  ;;  %746 = vperm.xlu1 %4548, %v139_v32   ;;  %741 = vperm.xlu0 %4547, %v138_v39   ;;  %v143_v29 = vld [vmem:[%s7656_s0 + $0x3d8] sm:$0xff]  ;;  %v142_v32 = vld [vmem:[%s7656_s0 + $0x3d0] sm:$0xff] }
  0xf1   :  { %v5895_v44 = vpop.permute.xlu1 %446  ;;  %v5897_v45 = vpop.permute.xlu0 %441 }
  0xf2   :  { %7792 = vst [vmem:[#allocation96_spill] sm:$0xff] %v5895_v44  ;;  %7793 = vst [vmem:[#allocation97_spill] sm:$0xff] %v5897_v45  ;;  %756 = vperm.xlu1 %4548, %v141_v41   ;;  %751 = vperm.xlu0 %4547, %v140_v31   ;;  %v145_v45 = vld [vmem:[%s7656_s0 + $0x3e8] sm:$0xff]  ;;  %v144_v41 = vld [vmem:[%s7656_s0 + $0x3e0] sm:$0xff] }
  0xf5   :  { %v5905_v39 = vpop.permute.xlu1 %456  ;;  %v5907_v30 = vpop.permute.xlu0 %451 }
  0xf6   :  { %7794 = vst [vmem:[#allocation98_spill] sm:$0xff] %v5905_v39  ;;  %7795 = vst [vmem:[#allocation99_spill] sm:$0xff] %v5907_v30  ;;  %766 = vperm.xlu1 %4548, %v143_v29   ;;  %761 = vperm.xlu0 %4547, %v142_v32   ;;  %v147_v30 = vld [vmem:[%s7656_s0 + $0x3f8] sm:$0xff]  ;;  %v146_v29 = vld [vmem:[%s7656_s0 + $0x3f0] sm:$0xff] }
  0xf9   :  { %v5915_v31 = vpop.permute.xlu1 %466  ;;  %v5917_v44 = vpop.permute.xlu0 %461 }
  0xfa   :  { %7796 = vst [vmem:[#allocation100_spill] sm:$0xff] %v5915_v31  ;;  %7797 = vst [vmem:[#allocation101_spill] sm:$0xff] %v5917_v44  ;;  %776 = vperm.xlu1 %4548, %v145_v45   ;;  %771 = vperm.xlu0 %4547, %v144_v41   ;;  %v1957_v45 = vld [vmem:[%s7657_s3] sm:$0x3]  ;;  %v5109_v41 = vmov 1  }
  0xfb   :  { %4349 = vmatprep.subr.msk.mxu0 %vm1965_vm0, %v1957_v45  ;;  %4543 = vmatprep.subr.msk.mxu1 %vm1965_vm0, %v1957_v45 }
  0xfc   :  { %4350 = vmatpush3.xpose.msk.msra.mxu0 %vm1965_vm0, %v1957_v45  ;;  %4544 = vmatpush3.xpose.msk.msra.mxu1 %vm1965_vm0, %v1957_v45 }
  0xfd   :  { %v5925_v32 = vpop.permute.xlu1 %476  ;;  %v5927_v39 = vpop.permute.xlu0 %471 }
  0xfe   :  { %786 = vperm.xlu1 %4548, %v147_v30   ;;  %781 = vperm.xlu0 %4547, %v146_v29  }
 0x101   :  { %v5929_v49 = vpop.permute.xlu1 %486  ;;  %v5931_v31 = vpop.permute.xlu0 %481 }
 0x102   :  { %4550 = vset.pattern.permute.xlu1 %v5109_v41  ;;  %4549 = vset.pattern.permute.xlu0 %v5109_v41 }
 0x103   :  { %1062 = vperm.xlu1 %4550, %v5160_v4   ;;  %1058 = vperm.xlu0 %4549, %v5148_v2  }
 0x105   :  { %v5940_v30 = vpop.permute.xlu1 %496  ;;  %v5942_v29 = vpop.permute.xlu0 %491 }
 0x107   :  { %1066 = vperm.xlu1 %4550, %v5143_v1   ;;  %1070 = vperm.xlu0 %4549, %v5155_v3  }
 0x109   :  { %v5948_v41 = vpop.permute.xlu1 %506  ;;  %v5950_v4 = vpop.permute.xlu0 %501 }
 0x10b   :  { %1074 = vperm.xlu1 %4550, %v5172_v6   ;;  %1078 = vperm.xlu0 %4549, %v5167_v5  }
 0x10d   :  { %v5954_v2 = vpop.permute.xlu1 %516  ;;  %v5956_v44 = vpop.permute.xlu0 %511 }
 0x10f   :  { %1082 = vperm.xlu1 %4550, %v5184_v8   ;;  %1086 = vperm.xlu0 %4549, %v5179_v7  }
 0x111   :  { %v5960_v45 = vpop.permute.xlu1 %526  ;;  %v5962_v1 = vpop.permute.xlu0 %521 }
 0x113   :  { %1090 = vperm.xlu1 %4550, %v5196_v10   ;;  %1094 = vperm.xlu0 %4549, %v5191_v9  }
 0x115   :  { %v5966_v3 = vpop.permute.xlu1 %536  ;;  %v5968_v6 = vpop.permute.xlu0 %531 }
 0x117   :  { %1098 = vperm.xlu1 %4550, %v5208_v12   ;;  %1102 = vperm.xlu0 %4549, %v5203_v11  }
 0x119   :  { %v5972_v5 = vpop.permute.xlu1 %546  ;;  %v5974_v8 = vpop.permute.xlu0 %541 }
 0x11b   :  { %1106 = vperm.xlu1 %4550, %v5220_v14   ;;  %1110 = vperm.xlu0 %4549, %v5215_v13  }
 0x11d   :  { %v5978_v7 = vpop.permute.xlu1 %556  ;;  %v5980_v10 = vpop.permute.xlu0 %551 }
 0x11f   :  { %1114 = vperm.xlu1 %4550, %v5232_v16   ;;  %1118 = vperm.xlu0 %4549, %v5227_v15  }
 0x121   :  { %v5984_v9 = vpop.permute.xlu1 %566  ;;  %v5986_v12 = vpop.permute.xlu0 %561 }
 0x123   :  { %1122 = vperm.xlu1 %4550, %v5244_v18   ;;  %1126 = vperm.xlu0 %4549, %v5239_v17  }
 0x125   :  { %v5990_v11 = vpop.permute.xlu1 %576  ;;  %v5992_v14 = vpop.permute.xlu0 %571 }
 0x127   :  { %1130 = vperm.xlu1 %4550, %v5256_v20   ;;  %1134 = vperm.xlu0 %4549, %v5251_v19  }
 0x129   :  { %v5996_v13 = vpop.permute.xlu1 %586  ;;  %v5998_v16 = vpop.permute.xlu0 %581 }
 0x12b   :  { %1138 = vperm.xlu1 %4550, %v5268_v22   ;;  %1142 = vperm.xlu0 %4549, %v5263_v21  }
 0x12d   :  { %v6002_v15 = vpop.permute.xlu1 %596  ;;  %v6004_v18 = vpop.permute.xlu0 %591 }
 0x12f   :  { %1146 = vperm.xlu1 %4550, %v5280_v24   ;;  %1314 = vperm.xlu0 %4549, %v5461_v43  }
 0x131   :  { %v6008_v17 = vpop.permute.xlu1 %606  ;;  %v6010_v20 = vpop.permute.xlu0 %601 }
 0x133   :  { %1318 = vperm.xlu1 %4550, %v5456_v42   ;;  %1322 = vperm.xlu0 %4549, %v5477_v47  }
 0x135   :  { %v6014_v19 = vpop.permute.xlu1 %616  ;;  %v6016_v22 = vpop.permute.xlu0 %611 }
 0x137   :  { %1326 = vperm.xlu1 %4550, %v5472_v46   ;;  %1330 = vperm.xlu0 %4549, %v5493_v51  }
 0x139   :  { %v6020_v21 = vpop.permute.xlu1 %626  ;;  %v6022_v24 = vpop.permute.xlu0 %621 }
 0x13b   :  { %1334 = vperm.xlu1 %4550, %v5488_v50   ;;  %1338 = vperm.xlu0 %4549, %v5509_v55  }
 0x13d   :  { %v6026_v43 = vpop.permute.xlu1 %636  ;;  %v6028_v42 = vpop.permute.xlu0 %631 }
 0x13f   :  { %1342 = vperm.xlu1 %4550, %v5504_v54   ;;  %1346 = vperm.xlu0 %4549, %v5525_v59  }
 0x141   :  { %v6032_v47 = vpop.permute.xlu1 %646  ;;  %v6034_v46 = vpop.permute.xlu0 %641 }
 0x143   :  { %1350 = vperm.xlu1 %4550, %v5520_v58   ;;  %1354 = vperm.xlu0 %4549, %v5541_v63  }
 0x145   :  { %v6038_v51 = vpop.permute.xlu1 %656  ;;  %v6040_v50 = vpop.permute.xlu0 %651 }
 0x147   :  { %1358 = vperm.xlu1 %4550, %v5536_v62   ;;  %1362 = vperm.xlu0 %4549, %v5557_v38  }
 0x149   :  { %v6044_v55 = vpop.permute.xlu1 %666  ;;  %v6046_v54 = vpop.permute.xlu0 %661 }
 0x14b   :  { %1366 = vperm.xlu1 %4550, %v5552_v37   ;;  %1370 = vperm.xlu0 %4549, %v5573_v0  }
 0x14d   :  { %v6050_v59 = vpop.permute.xlu1 %676  ;;  %v6052_v58 = vpop.permute.xlu0 %671 }
 0x14e   :  { %7798 = vst [vmem:[#allocation102_spill] sm:$0xff] %v6050_v59 }
 0x14f   :  { %1374 = vperm.xlu1 %4550, %v5568_v40   ;;  %1378 = vperm.xlu0 %4549, %v5589_v35  }
 0x151   :  { %v6056_v63 = vpop.permute.xlu1 %686  ;;  %v6058_v62 = vpop.permute.xlu0 %681 }
 0x152   :  { %7799 = vst [vmem:[#allocation103_spill] sm:$0xff] %v6056_v63  ;;  %7800 = vst [vmem:[#allocation104_spill] sm:$0xff] %v6058_v62  ;;  %v7835_v63 = vld [vmem:[#allocation18_spill] sm:$0xff] }
 0x153   :  { %1382 = vperm.xlu1 %4550, %v5584_v61   ;;  %1386 = vperm.xlu0 %4549, %v5605_v60  }
 0x155   :  { %v6062_v38 = vpop.permute.xlu1 %696  ;;  %v6064_v37 = vpop.permute.xlu0 %691 }
 0x156   :  { %7801 = vst [vmem:[#allocation105_spill] sm:$0xff] %v6062_v38  ;;  %7802 = vst [vmem:[#allocation106_spill] sm:$0xff] %v6064_v37  ;;  %v7834_v37 = vld [vmem:[#allocation17_spill] sm:$0xff] }
 0x157   :  { %1390 = vperm.xlu1 %4550, %v5600_v36   ;;  %1394 = vperm.xlu0 %4549, %v5621_v57  }
 0x159   :  { %v6068_v0 = vpop.permute.xlu1 %706  ;;  %v6070_v40 = vpop.permute.xlu0 %701 }
 0x15a   :  { %7803 = vst [vmem:[#allocation107_spill] sm:$0xff] %v6068_v0  ;;  %7804 = vst [vmem:[#allocation108_spill] sm:$0xff] %v6070_v40  ;;  %v7833_v0 = vld [vmem:[#allocation48_spill] sm:$0xff] }
 0x15b   :  { %1398 = vperm.xlu1 %4550, %v5616_v56   ;;  %1402 = vperm.xlu0 %4549, %v5637_v33  }
 0x15d   :  { %v6074_v35 = vpop.permute.xlu1 %716  ;;  %v6076_v61 = vpop.permute.xlu0 %711 }
 0x15e   :  { %7805 = vst [vmem:[#allocation109_spill] sm:$0xff] %v6074_v35  ;;  %7806 = vst [vmem:[#allocation110_spill] sm:$0xff] %v6076_v61  ;;  %v7832_v61 = vld [vmem:[#allocation4_spill] sm:$0xff] }
 0x15f   :  { %1150 = vperm.xlu1 %4550, %v5275_v23   ;;  %1406 = vperm.xlu0 %4549, %v5632_v53  }
 0x161   :  { %v6080_v60 = vpop.permute.xlu1 %726  ;;  %v6082_v36 = vpop.permute.xlu0 %721 }
 0x162   :  { %7807 = vst [vmem:[#allocation111_spill] sm:$0xff] %v6080_v60  ;;  %7808 = vst [vmem:[#allocation112_spill] sm:$0xff] %v6082_v36 }
 0x163   :  { %1154 = vperm.xlu1 %4550, %v5292_v26   ;;  %1410 = vperm.xlu0 %4549, %v5653_v34   ;;  %v7815_v34 = vld [vmem:[#allocation41_spill] sm:$0xff] }
 0x165   :  { %v6086_v57 = vpop.permute.xlu1 %736  ;;  %v6088_v56 = vpop.permute.xlu0 %731 }
 0x166   :  { %7809 = vst [vmem:[#allocation113_spill] sm:$0xff] %v6086_v57  ;;  %7810 = vst [vmem:[#allocation114_spill] sm:$0xff] %v6088_v56  ;;  %v7831_v57 = vld [vmem:[#allocation15_spill] sm:$0xff] }
 0x167   :  { %1158 = vperm.xlu1 %4550, %v5287_v25   ;;  %1414 = vperm.xlu0 %4549, %v5648_v52   ;;  %v7818_v52 = vld [vmem:[#allocation3_spill] sm:$0xff] }
 0x169   :  { %v6092_v33 = vpop.permute.xlu1 %746  ;;  %v6094_v23 = vpop.permute.xlu0 %741 }
 0x16a   :  { %7811 = vst [vmem:[#allocation115_spill] sm:$0xff] %v6092_v33  ;;  %7812 = vst [vmem:[#allocation116_spill] sm:$0xff] %v6094_v23  ;;  %v7819_v33 = vld [vmem:[#allocation45_spill] sm:$0xff] }
 0x16b   :  { %1162 = vperm.xlu1 %4550, %v5304_v28   ;;  %1418 = vperm.xlu0 %4549, %v5669_v48   ;;  %v6117_v48 = vld [vmem:[%s7658_s1] ss:$0 sm:$0xff] }
 0x16c   :  { %v796_v60 = vmul.f32 %v6117_v48, %v7831_v57  ;;  %v798_v57 = vmul.f32 %v6117_v48, %v7834_v37 }
 0x16d   :  { %v6098_v53 = vpop.permute.xlu1 %756  ;;  %v6100_v26 = vpop.permute.xlu0 %751 }
 0x16e   :  { %7813 = vst [vmem:[#allocation117_spill] sm:$0xff] %v6098_v53  ;;  %7814 = vst [vmem:[#allocation118_spill] sm:$0xff] %v6100_v26  ;;  %v7828_v53 = vld [vmem:[#allocation5_spill] sm:$0xff] }
 0x16f   :  { %1166 = vperm.xlu1 %4550, %v5299_v27   ;;  %1422 = vperm.xlu0 %4549, %v7815_v34   ;;  %v7822_v27 = vld [vmem:[#allocation2_spill] sm:$0xff]  ;;  %v7823_v34 = vld [vmem:[#allocation44_spill] sm:$0xff] }
 0x171   :  { %v6104_v56 = vpop.permute.xlu1 %766  ;;  %v6106_v25 = vpop.permute.xlu0 %761 }
 0x172   :  { %7816 = vst [vmem:[#allocation41_spill] sm:$0xff] %v6104_v56  ;;  %7817 = vst [vmem:[#allocation119_spill] sm:$0xff] %v6106_v25 }
 0x173   :  { %1170 = vperm.xlu1 %4550, %v7818_v52   ;;  %1426 = vperm.xlu0 %4549, %v7819_v33   ;;  %v7826_v52 = vld [vmem:[#allocation14_spill] sm:$0xff] }
 0x174   :  { %v793_v33 = vmul.f32 %v6117_v48, %v7826_v52 }
 0x175   :  { %v6110_v23 = vpop.permute.xlu1 %776  ;;  %v6112_v28 = vpop.permute.xlu0 %771 }
 0x176   :  { %7820 = vst [vmem:[#allocation3_spill] sm:$0xff] %v6110_v23  ;;  %7821 = vst [vmem:[#allocation45_spill] sm:$0xff] %v6112_v28  ;;  %v6130_v28 = vld [vmem:[%s7659_s2] ss:$0 sm:$0xff]  ;;  %v7827_v23 = vld [vmem:[#allocation16_spill] sm:$0xff] }
 0x177   :  { %1174 = vperm.xlu1 %4550, %v7822_v27   ;;  %1430 = vperm.xlu0 %4549, %v7823_v34   ;;  %v794_v26 = vmul.f32 %v6117_v48, %v7827_v23  ;;  %v7829_v27 = vld [vmem:[#allocation49_spill] sm:$0xff]  ;;  %v6139_v34 = vld [vmem:[%s7658_s1 + $0x1] ss:$0 sm:$0xff]  ;;  %v933_v37 = vadd.f32 %v6130_v28, %v798_v57  ;;  %v7841_v57 = vld [vmem:[#allocation52_spill] sm:$0xff] }
 0x179   :  { %v6121_v56 = vpop.permute.xlu1 %786  ;;  %v6123_v25 = vpop.permute.xlu0 %781  ;;  %v929_v23 = vadd.f32 %v6130_v28, %v794_v26  ;;  %v797_v26 = vmul.f32 %v6117_v48, %v7835_v63 }
 0x17a   :  { %7824 = vst [vmem:[#allocation2_spill] sm:$0xff] %v6121_v56  ;;  %7825 = vst [vmem:[#allocation44_spill] sm:$0xff] %v6123_v25  ;;  %v7830_v56 = vld [vmem:[#allocation13_spill] sm:$0xff]  ;;  %v928_v25 = vadd.f32 %v6130_v28, %v793_v33  ;;  %v931_v33 = vadd.f32 %v6130_v28, %v796_v60 }
 0x17b   :  { %1178 = vperm.xlu1 %4550, %v7828_v53   ;;  %1434 = vperm.xlu0 %4549, %v7829_v27   ;;  %v795_v52 = vmul.f32 %v6117_v48, %v7830_v56  ;;  %v932_v63 = vadd.f32 %v6130_v28, %v797_v26 }
 0x17d   :  { %v930_v56 = vadd.f32 %v6130_v28, %v795_v52 }
 0x17e   :  { %v1063_v36 = vpop.permute.xlu1 %1062  ;;  %v1059_v35 = vpop.permute.xlu0 %1058 }
 0x17f   :  { %v1574_v53 = vmul.f32 %v6139_v34, %v1063_v36  ;;  %v1573_v27 = vmul.f32 %v6139_v34, %v1059_v35  ;;  %1182 = vperm.xlu1 %4550, %v7832_v61   ;;  %1438 = vperm.xlu0 %4549, %v7833_v0   ;;  %v7836_v0 = vld [vmem:[#allocation7_spill] sm:$0xff] }
 0x181   :  { %v1702_v40 = vadd.f32 %v1574_v53, %v929_v23  ;;  %v1701_v38 = vadd.f32 %v1573_v27, %v928_v25  ;;  %v7837_v25 = vld [vmem:[#allocation53_spill] sm:$0xff]  ;;  %v7838_v53 = vld [vmem:[#allocation19_spill] sm:$0xff]  ;;  %v7839_v27 = vld [vmem:[#allocation20_spill] sm:$0xff] }
 0x182   :  { %v1067_v62 = vpop.permute.xlu1 %1066  ;;  %v1071_v36 = vpop.permute.xlu0 %1070 }
 0x183   :  { %v1830_v59 = vmax.f32 %v1702_v40, 0.0  ;;  %v1575_v35 = vmul.f32 %v6139_v34, %v1067_v62  ;;  %v1576_v61 = vmul.f32 %v6139_v34, %v1071_v36  ;;  %1186 = vperm.xlu1 %4550, %v7836_v0   ;;  %1442 = vperm.xlu0 %4549, %v7837_v25   ;;  %v1829_v52 = vmax.f32 %v1701_v38, 0.0 }
 0x184   :  { %v800_v40 = vmul.f32 %v6117_v48, %v7838_v53  ;;  %v799_v62 = vmul.f32 %v6117_v48, %v7839_v27 }
 0x185   :  { %v1703_v23 = vadd.f32 %v1575_v35, %v930_v56  ;;  %v1704_v60 = vadd.f32 %v1576_v61, %v931_v33  ;;  %4351 = vmatprep.mubr.msk.f32.mxu0 %vm1965_vm0, %v1829_v52  ;;  %v7840_v35 = vld [vmem:[#allocation6_spill] sm:$0xff] }
 0x186   :  { %v1075_v36 = vpop.permute.xlu1 %1074  ;;  %4352 = vmatmul.mubr.msk.f32.vlgmr.msra.gmra.mxu0 %vm1965_vm0, %v1830_v59  ;;  %v1079_v0 = vpop.permute.xlu0 %1078  ;;  %v935_v52 = vadd.f32 %v6130_v28, %v800_v40  ;;  %v934_v53 = vadd.f32 %v6130_v28, %v799_v62  ;;  %v7842_v59 = vld [vmem:[#allocation21_spill] sm:$0xff] }
 0x187   :  { %v1831_v25 = vmax.f32 %v1703_v23, 0.0  ;;  %v1832_v38 = vmax.f32 %v1704_v60, 0.0  ;;  %v1577_v56 = vmul.f32 %v6139_v34, %v1075_v36  ;;  %v1578_v33 = vmul.f32 %v6139_v34, %v1079_v0  ;;  %1190 = vperm.xlu1 %4550, %v7840_v35   ;;  %1446 = vperm.xlu0 %4549, %v7841_v57   ;;  %v7843_v60 = vld [vmem:[#allocation22_spill] sm:$0xff]  ;;  %v7845_v40 = vld [vmem:[#allocation57_spill] sm:$0xff] }
 0x188   :  { %v802_v23 = vmul.f32 %v6117_v48, %v7842_v59  ;;  %v801_v27 = vmul.f32 %v6117_v48, %v7843_v60 }
 0x189   :  { %v1705_v26 = vadd.f32 %v1577_v56, %v932_v63  ;;  %v1706_v61 = vadd.f32 %v1578_v33, %v933_v37  ;;  %4354 = vmatprep.mubr.msk.f32.mxu0 %vm1965_vm0, %v1831_v25  ;;  %v7844_v25 = vld [vmem:[#allocation9_spill] sm:$0xff] }
 0x18a   :  { %v1083_v36 = vpop.permute.xlu1 %1082  ;;  %4355 = vmatmul.mubr.msk.f32.gmra.mxu0 %vm1965_vm0, %v1832_v38  ;;  %v1087_v0 = vpop.permute.xlu0 %1086  ;;  %v937_v33 = vadd.f32 %v6130_v28, %v802_v23  ;;  %v936_v59 = vadd.f32 %v6130_v28, %v801_v27  ;;  %v7846_v38 = vld [vmem:[#allocation23_spill] sm:$0xff]  ;;  %v7849_v23 = vld [vmem:[#allocation56_spill] sm:$0xff] }
 0x18b   :  { %v1833_v35 = vmax.f32 %v1705_v26, 0.0  ;;  %v1834_v57 = vmax.f32 %v1706_v61, 0.0  ;;  %v1579_v37 = vmul.f32 %v6139_v34, %v1083_v36  ;;  %v1580_v63 = vmul.f32 %v6139_v34, %v1087_v0  ;;  %1194 = vperm.xlu1 %4550, %v7844_v25   ;;  %1450 = vperm.xlu0 %4549, %v7845_v40   ;;  %v7847_v61 = vld [vmem:[#allocation24_spill] sm:$0xff] }
 0x18c   :  { %v804_v26 = vmul.f32 %v6117_v48, %v7846_v38  ;;  %v803_v60 = vmul.f32 %v6117_v48, %v7847_v61 }
 0x18d   :  { %v1707_v62 = vadd.f32 %v1579_v37, %v934_v53  ;;  %v1708_v56 = vadd.f32 %v1580_v63, %v935_v52  ;;  %4357 = vmatprep.mubr.msk.f32.mxu0 %vm1965_vm0, %v1833_v35  ;;  %v7848_v35 = vld [vmem:[#allocation8_spill] sm:$0xff] }
 0x18e   :  { %v1091_v36 = vpop.permute.xlu1 %1090  ;;  %4358 = vmatmul.mubr.msk.f32.gmra.mxu0 %vm1965_vm0, %v1834_v57  ;;  %v1095_v0 = vpop.permute.xlu0 %1094  ;;  %v939_v63 = vadd.f32 %v6130_v28, %v804_v26  ;;  %v938_v38 = vadd.f32 %v6130_v28, %v803_v60  ;;  %v7850_v57 = vld [vmem:[#allocation25_spill] sm:$0xff] }
 0x18f   :  { %v1835_v25 = vmax.f32 %v1707_v62, 0.0  ;;  %v1836_v40 = vmax.f32 %v1708_v56, 0.0  ;;  %v1581_v52 = vmul.f32 %v6139_v34, %v1091_v36  ;;  %v1582_v53 = vmul.f32 %v6139_v34, %v1095_v0  ;;  %1198 = vperm.xlu1 %4550, %v7848_v35   ;;  %1454 = vperm.xlu0 %4549, %v7849_v23   ;;  %v7851_v56 = vld [vmem:[#allocation26_spill] sm:$0xff]  ;;  %v7853_v26 = vld [vmem:[#allocation61_spill] sm:$0xff] }
 0x190   :  { %v806_v62 = vmul.f32 %v6117_v48, %v7850_v57  ;;  %v805_v61 = vmul.f32 %v6117_v48, %v7851_v56 }
 0x191   :  { %v1709_v27 = vadd.f32 %v1581_v52, %v936_v59  ;;  %v1710_v37 = vadd.f32 %v1582_v53, %v937_v33  ;;  %4360 = vmatprep.mubr.msk.f32.mxu0 %vm1965_vm0, %v1835_v25  ;;  %v7852_v25 = vld [vmem:[#allocation11_spill] sm:$0xff] }
 0x192   :  { %v1099_v36 = vpop.permute.xlu1 %1098  ;;  %4361 = vmatmul.mubr.msk.f32.gmra.mxu0 %vm1965_vm0, %v1836_v40  ;;  %v1103_v0 = vpop.permute.xlu0 %1102  ;;  %v941_v53 = vadd.f32 %v6130_v28, %v806_v62  ;;  %v940_v57 = vadd.f32 %v6130_v28, %v805_v61  ;;  %v7854_v40 = vld [vmem:[#allocation27_spill] sm:$0xff]  ;;  %v7857_v62 = vld [vmem:[#allocation60_spill] sm:$0xff] }
 0x193   :  { %v1837_v35 = vmax.f32 %v1709_v27, 0.0  ;;  %v1838_v23 = vmax.f32 %v1710_v37, 0.0  ;;  %v1583_v33 = vmul.f32 %v6139_v34, %v1099_v36  ;;  %v1584_v59 = vmul.f32 %v6139_v34, %v1103_v0  ;;  %1202 = vperm.xlu1 %4550, %v7852_v25   ;;  %1458 = vperm.xlu0 %4549, %v7853_v26   ;;  %v7855_v37 = vld [vmem:[#allocation28_spill] sm:$0xff] }
 0x194   :  { %v808_v27 = vmul.f32 %v6117_v48, %v7854_v40  ;;  %v807_v56 = vmul.f32 %v6117_v48, %v7855_v37 }
 0x195   :  { %v1711_v60 = vadd.f32 %v1583_v33, %v938_v38  ;;  %v1712_v52 = vadd.f32 %v1584_v59, %v939_v63  ;;  %4363 = vmatprep.mubr.msk.f32.mxu0 %vm1965_vm0, %v1837_v35  ;;  %v7856_v35 = vld [vmem:[#allocation10_spill] sm:$0xff] }
 0x196   :  { %v1107_v36 = vpop.permute.xlu1 %1106  ;;  %4364 = vmatmul.mubr.msk.f32.gmra.mxu0 %vm1965_vm0, %v1838_v23  ;;  %v1111_v0 = vpop.permute.xlu0 %1110  ;;  %v943_v59 = vadd.f32 %v6130_v28, %v808_v27  ;;  %v942_v40 = vadd.f32 %v6130_v28, %v807_v56  ;;  %v7858_v23 = vld [vmem:[#allocation29_spill] sm:$0xff] }
 0x197   :  { %v1839_v25 = vmax.f32 %v1711_v60, 0.0  ;;  %v1840_v26 = vmax.f32 %v1712_v52, 0.0  ;;  %v1585_v63 = vmul.f32 %v6139_v34, %v1107_v36  ;;  %v1586_v38 = vmul.f32 %v6139_v34, %v1111_v0  ;;  %1206 = vperm.xlu1 %4550, %v7856_v35   ;;  %1462 = vperm.xlu0 %4549, %v7857_v62   ;;  %v7859_v52 = vld [vmem:[#allocation30_spill] sm:$0xff]  ;;  %v7861_v27 = vld [vmem:[#allocation65_spill] sm:$0xff] }
 0x198   :  { %v810_v60 = vmul.f32 %v6117_v48, %v7858_v23  ;;  %v809_v37 = vmul.f32 %v6117_v48, %v7859_v52 }
 0x199   :  { %v1713_v61 = vadd.f32 %v1585_v63, %v940_v57  ;;  %v1714_v33 = vadd.f32 %v1586_v38, %v941_v53  ;;  %4366 = vmatprep.mubr.msk.f32.mxu0 %vm1965_vm0, %v1839_v25  ;;  %v7860_v25 = vld [vmem:[#allocation12_spill] sm:$0xff] }
 0x19a   :  { %v1115_v36 = vpop.permute.xlu1 %1114  ;;  %4367 = vmatmul.mubr.msk.f32.gmra.mxu0 %vm1965_vm0, %v1840_v26  ;;  %v1119_v0 = vpop.permute.xlu0 %1118  ;;  %v945_v38 = vadd.f32 %v6130_v28, %v810_v60  ;;  %v944_v23 = vadd.f32 %v6130_v28, %v809_v37  ;;  %v7862_v26 = vld [vmem:[#allocation31_spill] sm:$0xff]  ;;  %v5063_v60 = vld [vmem:[%s7656_s0 + $0x138] sm:$0xff]  ;;  %v7864_v37 = vld [vmem:[#allocation64_spill] sm:$0xff] }
 0x19b   :  { %v1841_v35 = vmax.f32 %v1713_v61, 0.0  ;;  %v1842_v62 = vmax.f32 %v1714_v33, 0.0  ;;  %v1587_v53 = vmul.f32 %v6139_v34, %v1115_v36  ;;  %v1588_v57 = vmul.f32 %v6139_v34, %v1119_v0  ;;  %1210 = vperm.xlu1 %4550, %v7860_v25   ;;  %1466 = vperm.xlu0 %4549, %v7861_v27   ;;  %v7863_v33 = vld [vmem:[#allocation32_spill] sm:$0xff] }
 0x19c   :  { %v812_v61 = vmul.f32 %v6117_v48, %v7862_v26  ;;  %v811_v52 = vmul.f32 %v6117_v48, %v7863_v33  ;;  %v7866_v26 = vld [vmem:[#allocation34_spill] sm:$0xff] }
 0x19d   :  { %v1715_v56 = vadd.f32 %v1587_v53, %v942_v40  ;;  %v1716_v63 = vadd.f32 %v1588_v57, %v943_v59  ;;  %4369 = vmatprep.mubr.msk.f32.mxu0 %vm1965_vm0, %v1841_v35  ;;  %v813_v33 = vmul.f32 %v6117_v48, %v7866_v26 }
 0x19e   :  { %v1123_v36 = vpop.permute.xlu1 %1122  ;;  %4370 = vmatmul.mubr.msk.f32.gmra.mxu0 %vm1965_vm0, %v1842_v62  ;;  %v1127_v0 = vpop.permute.xlu0 %1126  ;;  %v947_v62 = vadd.f32 %v6130_v28, %v812_v61  ;;  %v946_v57 = vadd.f32 %v6130_v28, %v811_v52  ;;  %v5064_v61 = vld [vmem:[%s7656_s0 + $0x140] sm:$0xff]  ;;  %v7867_v52 = vld [vmem:[#allocation69_spill] sm:$0xff] }
 0x19f   :  { %v1843_v25 = vmax.f32 %v1715_v56, 0.0  ;;  %v1844_v27 = vmax.f32 %v1716_v63, 0.0  ;;  %v1589_v59 = vmul.f32 %v6139_v34, %v1123_v36  ;;  %v1590_v40 = vmul.f32 %v6139_v34, %v1127_v0  ;;  %1214 = vperm.xlu1 %4550, %v5063_v60   ;;  %1470 = vperm.xlu0 %4549, %v7864_v37   ;;  %v7865_v56 = vld [vmem:[#allocation33_spill] sm:$0xff] }
 0x1a0   :  { %v814_v63 = vmul.f32 %v6117_v48, %v7865_v56  ;;  %v857_v56 = vmul.f32 %v6117_v48, %v5927_v39 }
 0x1a1   :  { %v1717_v35 = vadd.f32 %v1589_v59, %v944_v23  ;;  %v1718_v53 = vadd.f32 %v1590_v40, %v945_v38  ;;  %4372 = vmatprep.mubr.msk.f32.mxu0 %vm1965_vm0, %v1843_v25  ;;  %v948_v40 = vadd.f32 %v6130_v28, %v813_v33  ;;  %v7869_v33 = vld [vmem:[#allocation68_spill] sm:$0xff] }
 0x1a2   :  { %v1131_v36 = vpop.permute.xlu1 %1130  ;;  %4373 = vmatmul.mubr.msk.f32.gmra.mxu0 %vm1965_vm0, %v1844_v27  ;;  %v1135_v0 = vpop.permute.xlu0 %1134  ;;  %v949_v27 = vadd.f32 %v6130_v28, %v814_v63  ;;  %v5065_v63 = vld [vmem:[%s7656_s0 + $0x148] sm:$0xff] }
 0x1a3   :  { %v1845_v60 = vmax.f32 %v1717_v35, 0.0  ;;  %v1846_v37 = vmax.f32 %v1718_v53, 0.0  ;;  %v1591_v38 = vmul.f32 %v6139_v34, %v1131_v36  ;;  %v1592_v23 = vmul.f32 %v6139_v34, %v1135_v0  ;;  %1218 = vperm.xlu1 %4550, %v5064_v61   ;;  %1474 = vperm.xlu0 %4549, %v7867_v52   ;;  %v7868_v35 = vld [vmem:[#allocation36_spill] sm:$0xff] }
 0x1a4   :  { %v815_v53 = vmul.f32 %v6117_v48, %v7868_v35  ;;  %v859_v52 = vmul.f32 %v6117_v48, %v5931_v31 }
 0x1a5   :  { %v1719_v25 = vadd.f32 %v1591_v38, %v946_v57  ;;  %v1720_v59 = vadd.f32 %v1592_v23, %v947_v62  ;;  %4375 = vmatprep.mubr.msk.f32.mxu0 %vm1965_vm0, %v1845_v60  ;;  %v992_v23 = vadd.f32 %v6130_v28, %v857_v56 }
 0x1a6   :  { %v1139_v26 = vpop.permute.xlu1 %1138  ;;  %4376 = vmatmul.mubr.msk.f32.gmra.mxu0 %vm1965_vm0, %v1846_v37  ;;  %v1143_v36 = vpop.permute.xlu0 %1142  ;;  %v950_v39 = vadd.f32 %v6130_v28, %v815_v53  ;;  %v858_v37 = vmul.f32 %v6117_v48, %v5925_v32  ;;  %v5066_v53 = vld [vmem:[%s7656_s0 + $0x150] sm:$0xff]  ;;  %v7870_v32 = vld [vmem:[#allocation73_spill] sm:$0xff] }
 0x1a7   :  { %v1847_v0 = vmax.f32 %v1719_v25, 0.0  ;;  %v1848_v61 = vmax.f32 %v1720_v59, 0.0  ;;  %v1593_v62 = vmul.f32 %v6139_v34, %v1139_v26  ;;  %v1594_v57 = vmul.f32 %v6139_v34, %v1143_v36  ;;  %1222 = vperm.xlu1 %4550, %v5065_v63   ;;  %1478 = vperm.xlu0 %4549, %v7869_v33  }
 0x1a8   :  { %v993_v36 = vadd.f32 %v6130_v28, %v858_v37 }
 0x1a9   :  { %v1721_v60 = vadd.f32 %v1593_v62, %v948_v40  ;;  %v1722_v38 = vadd.f32 %v1594_v57, %v949_v27  ;;  %4378 = vmatprep.mubr.msk.f32.mxu0 %vm1965_vm0, %v1847_v0  ;;  %v860_v0 = vmul.f32 %v6117_v48, %v5929_v49  ;;  %v861_v62 = vmul.f32 %v6117_v48, %v5942_v29  ;;  %v7871_v49 = vld [vmem:[#allocation72_spill] sm:$0xff] }
 0x1aa   :  { %v1147_v25 = vpop.permute.xlu1 %1146  ;;  %4379 = vmatmul.mubr.msk.f32.gmra.mxu0 %vm1965_vm0, %v1848_v61  ;;  %v1315_v59 = vpop.permute.xlu0 %1314  ;;  %v994_v61 = vadd.f32 %v6130_v28, %v859_v52 }
 0x1ab   :  { %v1849_v35 = vmax.f32 %v1721_v60, 0.0  ;;  %v1850_v26 = vmax.f32 %v1722_v38, 0.0  ;;  %v1595_v27 = vmul.f32 %v6139_v34, %v1147_v25  ;;  %v1637_v40 = vmul.f32 %v6139_v34, %v1315_v59  ;;  %1226 = vperm.xlu1 %4550, %v5066_v53   ;;  %1482 = vperm.xlu0 %4549, %v7870_v32  }
 0x1ac   :  { %v995_v29 = vadd.f32 %v6130_v28, %v860_v0  ;;  %v862_v25 = vmul.f32 %v6117_v48, %v5940_v30  ;;  %v996_v59 = vadd.f32 %v6130_v28, %v861_v62 }
 0x1ad   :  { %v1723_v56 = vadd.f32 %v1595_v27, %v950_v39  ;;  %4381 = vmatprep.mubr.msk.f32.mxu0 %vm1965_vm0, %v1849_v35  ;;  %v1765_v31 = vadd.f32 %v1637_v40, %v992_v23  ;;  %v5067_v39 = vld [vmem:[%s7656_s0 + $0x158] sm:$0xff]  ;;  %v863_v35 = vmul.f32 %v6117_v48, %v5950_v4 }
 0x1ae   :  { %v1319_v57 = vpop.permute.xlu1 %1318  ;;  %4382 = vmatmul.mubr.msk.f32.gmra.mxu0 %vm1965_vm0, %v1850_v26  ;;  %v1323_v63 = vpop.permute.xlu0 %1322  ;;  %v997_v4 = vadd.f32 %v6130_v28, %v862_v25 }
 0x1af   :  { %v1851_v33 = vmax.f32 %v1723_v56, 0.0  ;;  %v1638_v60 = vmul.f32 %v6139_v34, %v1319_v57  ;;  %v1639_v38 = vmul.f32 %v6139_v34, %v1323_v63  ;;  %1230 = vperm.xlu1 %4550, %v5067_v39   ;;  %1486 = vperm.xlu0 %4549, %v7871_v49   ;;  %v1893_v37 = vmax.f32 %v1765_v31, 0.0  ;;  %v5068_v31 = vld [vmem:[%s7656_s0 + $0x160] sm:$0xff] }
 0x1b0   :  { %v998_v62 = vadd.f32 %v6130_v28, %v863_v35  ;;  %v865_v57 = vmul.f32 %v6117_v48, %v5956_v44 }
 0x1b1   :  { %v1766_v23 = vadd.f32 %v1638_v60, %v993_v36  ;;  %v1767_v52 = vadd.f32 %v1639_v38, %v994_v61  ;;  %4384 = vmatprep.mubr.msk.f32.mxu0 %vm1965_vm0, %v1851_v33  ;;  %4447 = vmatprep.mubr.msk.f32.mxu1 %vm1965_vm0, %v1893_v37  ;;  %v7872_v36 = vld [vmem:[#allocation77_spill] sm:$0xff]  ;;  %v864_v61 = vmul.f32 %v6117_v48, %v5948_v41  ;;  %v5069_v37 = vld [vmem:[%s7656_s0 + $0x168] sm:$0xff]  ;;  %v7873_v41 = vld [vmem:[#allocation76_spill] sm:$0xff] }
 0x1b2   :  { %v1327_v26 = vpop.permute.xlu1 %1326  ;;  %v1331_v27 = vpop.permute.xlu0 %1330  ;;  %v1000_v25 = vadd.f32 %v6130_v28, %v865_v57 }
 0x1b3   :  { %v1894_v40 = vmax.f32 %v1766_v23, 0.0  ;;  %v1895_v53 = vmax.f32 %v1767_v52, 0.0  ;;  %v1640_v32 = vmul.f32 %v6139_v34, %v1327_v26  ;;  %v1641_v56 = vmul.f32 %v6139_v34, %v1331_v27  ;;  %1234 = vperm.xlu1 %4550, %v5068_v31   ;;  %1490 = vperm.xlu0 %4549, %v7872_v36  }
 0x1b4   :  { %v999_v44 = vadd.f32 %v6130_v28, %v864_v61 }
 0x1b5   :  { %v1768_v30 = vadd.f32 %v1640_v32, %v995_v29  ;;  %v1769_v0 = vadd.f32 %v1641_v56, %v996_v59  ;;  %4448 = vmatmul.mubr.msk.f32.vlgmr.msra.gmra.mxu1 %vm1965_vm0, %v1894_v40  ;;  %v866_v29 = vmul.f32 %v6117_v48, %v5954_v2  ;;  %v867_v59 = vmul.f32 %v6117_v48, %v5962_v1  ;;  %v5070_v56 = vld [vmem:[%s7656_s0 + $0x170] sm:$0xff]  ;;  %v7874_v2 = vld [vmem:[#allocation81_spill] sm:$0xff] }
 0x1b6   :  { %v1335_v63 = vpop.permute.xlu1 %1334  ;;  %4450 = vmatprep.mubr.msk.f32.mxu1 %vm1965_vm0, %v1895_v53  ;;  %v1339_v33 = vpop.permute.xlu0 %1338 }
 0x1b7   :  { %v1896_v60 = vmax.f32 %v1768_v30, 0.0  ;;  %v1897_v38 = vmax.f32 %v1769_v0, 0.0  ;;  %v1642_v39 = vmul.f32 %v6139_v34, %v1335_v63  ;;  %v1643_v49 = vmul.f32 %v6139_v34, %v1339_v33  ;;  %1238 = vperm.xlu1 %4550, %v5069_v37   ;;  %1494 = vperm.xlu0 %4549, %v7873_v41  }
 0x1b8   :  { %v1001_v1 = vadd.f32 %v6130_v28, %v866_v29  ;;  %v868_v30 = vmul.f32 %v6117_v48, %v5960_v45  ;;  %v1002_v0 = vadd.f32 %v6130_v28, %v867_v59  ;;  %v7875_v45 = vld [vmem:[#allocation80_spill] sm:$0xff]  ;;  %v870_v37 = vmul.f32 %v6117_v48, %v5966_v3  ;;  %v7876_v3 = vld [vmem:[#allocation85_spill] sm:$0xff] }
 0x1b9   :  { %v1770_v23 = vadd.f32 %v1642_v39, %v997_v4  ;;  %v1771_v52 = vadd.f32 %v1643_v49, %v998_v62  ;;  %4451 = vmatmul.mubr.msk.f32.gmra.mxu1 %vm1965_vm0, %v1896_v60  ;;  %v869_v4 = vmul.f32 %v6117_v48, %v5968_v6 }
 0x1ba   :  { %v1343_v35 = vpop.permute.xlu1 %1342  ;;  %4453 = vmatprep.mubr.msk.f32.mxu1 %vm1965_vm0, %v1897_v38  ;;  %v1347_v26 = vpop.permute.xlu0 %1346  ;;  %v5071_v38 = vld [vmem:[%s7656_s0 + $0x178] sm:$0xff]  ;;  %v1003_v6 = vadd.f32 %v6130_v28, %v868_v30 }
 0x1bb   :  { %v1898_v27 = vmax.f32 %v1770_v23, 0.0  ;;  %v1899_v40 = vmax.f32 %v1771_v52, 0.0  ;;  %v1644_v53 = vmul.f32 %v6139_v34, %v1343_v35  ;;  %v1645_v32 = vmul.f32 %v6139_v34, %v1347_v26  ;;  %1242 = vperm.xlu1 %4550, %v5070_v56   ;;  %1498 = vperm.xlu0 %4549, %v7874_v2   ;;  %v5072_v26 = vld [vmem:[%s7656_s0 + $0x180] sm:$0xff] }
 0x1bc   :  { %v1004_v41 = vadd.f32 %v6130_v28, %v869_v4  ;;  %v871_v23 = vmul.f32 %v6117_v48, %v5974_v8  ;;  %v1005_v8 = vadd.f32 %v6130_v28, %v870_v37  ;;  %v873_v56 = vmul.f32 %v6117_v48, %v5980_v10  ;;  %v5073_v4 = vld [vmem:[%s7656_s0 + $0x188] sm:$0xff]  ;;  %v5074_v37 = vld [vmem:[%s7656_s0 + $0x190] sm:$0xff] }
 0x1bd   :  { %v1772_v31 = vadd.f32 %v1644_v53, %v999_v44  ;;  %v1773_v36 = vadd.f32 %v1645_v32, %v1000_v25  ;;  %4454 = vmatmul.mubr.msk.f32.gmra.mxu1 %vm1965_vm0, %v1898_v27  ;;  %v872_v53 = vmul.f32 %v6117_v48, %v5972_v5  ;;  %v7877_v5 = vld [vmem:[#allocation84_spill] sm:$0xff] }
 0x1be   :  { %v1351_v61 = vpop.permute.xlu1 %1350  ;;  %4456 = vmatprep.mubr.msk.f32.mxu1 %vm1965_vm0, %v1899_v40  ;;  %v1355_v62 = vpop.permute.xlu0 %1354  ;;  %v1006_v32 = vadd.f32 %v6130_v28, %v871_v23 }
 0x1bf   :  { %v1900_v57 = vmax.f32 %v1772_v31, 0.0  ;;  %v1901_v63 = vmax.f32 %v1773_v36, 0.0  ;;  %v1646_v33 = vmul.f32 %v6139_v34, %v1351_v61  ;;  %v1647_v60 = vmul.f32 %v6139_v34, %v1355_v62  ;;  %1246 = vperm.xlu1 %4550, %v5071_v38   ;;  %1502 = vperm.xlu0 %4549, %v7875_v45  }
 0x1c0   :  { %v1007_v10 = vadd.f32 %v6130_v28, %v872_v53 }
 0x1c1   :  { %v1774_v39 = vadd.f32 %v1646_v33, %v1001_v1  ;;  %v1775_v49 = vadd.f32 %v1647_v60, %v1002_v0  ;;  %4457 = vmatmul.mubr.msk.f32.gmra.mxu1 %vm1965_vm0, %v1900_v57  ;;  %v874_v57 = vmul.f32 %v6117_v48, %v5978_v7  ;;  %v875_v33 = vmul.f32 %v6117_v48, %v5986_v12  ;;  %v7878_v7 = vld [vmem:[#allocation89_spill] sm:$0xff] }
 0x1c2   :  { %v1359_v52 = vpop.permute.xlu1 %1358  ;;  %4459 = vmatprep.mubr.msk.f32.mxu1 %vm1965_vm0, %v1901_v63  ;;  %v1363_v44 = vpop.permute.xlu0 %1362  ;;  %v1008_v63 = vadd.f32 %v6130_v28, %v873_v56 }
 0x1c3   :  { %v1902_v29 = vmax.f32 %v1774_v39, 0.0  ;;  %v1903_v25 = vmax.f32 %v1775_v49, 0.0  ;;  %v1648_v59 = vmul.f32 %v6139_v34, %v1359_v52  ;;  %v1649_v35 = vmul.f32 %v6139_v34, %v1363_v44  ;;  %1250 = vperm.xlu1 %4550, %v5072_v26   ;;  %1506 = vperm.xlu0 %4549, %v7876_v3  }
 0x1c4   :  { %v1009_v12 = vadd.f32 %v6130_v28, %v874_v57  ;;  %v876_v52 = vmul.f32 %v6117_v48, %v5984_v9  ;;  %v1010_v44 = vadd.f32 %v6130_v28, %v875_v33  ;;  %v7879_v9 = vld [vmem:[#allocation88_spill] sm:$0xff] }
 0x1c5   :  { %v1776_v27 = vadd.f32 %v1648_v59, %v1003_v6  ;;  %v1777_v40 = vadd.f32 %v1649_v35, %v1004_v41  ;;  %4460 = vmatmul.mubr.msk.f32.gmra.mxu1 %vm1965_vm0, %v1902_v29  ;;  %v877_v29 = vmul.f32 %v6117_v48, %v5992_v14 }
 0x1c6   :  { %v1367_v2 = vpop.permute.xlu1 %1366  ;;  %4462 = vmatprep.mubr.msk.f32.mxu1 %vm1965_vm0, %v1903_v25  ;;  %v1371_v31 = vpop.permute.xlu0 %1370  ;;  %v1011_v14 = vadd.f32 %v6130_v28, %v876_v52 }
 0x1c7   :  { %v1904_v36 = vmax.f32 %v1776_v27, 0.0  ;;  %v1905_v1 = vmax.f32 %v1777_v40, 0.0  ;;  %v1650_v30 = vmul.f32 %v6139_v34, %v1367_v2  ;;  %v1651_v0 = vmul.f32 %v6139_v34, %v1371_v31  ;;  %1254 = vperm.xlu1 %4550, %v5073_v4   ;;  %1510 = vperm.xlu0 %4549, %v7877_v5   ;;  %v5075_v40 = vld [vmem:[%s7656_s0 + $0x198] sm:$0xff]  ;;  %v5076_v5 = vld [vmem:[%s7656_s0 + $0x1a0] sm:$0xff] }
 0x1c8   :  { %v1012_v56 = vadd.f32 %v6130_v28, %v877_v29  ;;  %v879_v2 = vmul.f32 %v6117_v48, %v5998_v16  ;;  %v881_v29 = vmul.f32 %v6117_v48, %v6004_v18 }
 0x1c9   :  { %v1778_v61 = vadd.f32 %v1650_v30, %v1005_v8  ;;  %v1779_v62 = vadd.f32 %v1651_v0, %v1006_v32  ;;  %4463 = vmatmul.mubr.msk.f32.gmra.mxu1 %vm1965_vm0, %v1904_v36  ;;  %v878_v32 = vmul.f32 %v6117_v48, %v5990_v11  ;;  %v5077_v11 = vld [vmem:[%s7656_s0 + $0x3a0] sm:$0xff] }
 0x1ca   :  { %v1375_v60 = vpop.permute.xlu1 %1374  ;;  %4465 = vmatprep.mubr.msk.f32.mxu1 %vm1965_vm0, %v1905_v1  ;;  %v1379_v38 = vpop.permute.xlu0 %1378  ;;  %v1014_v33 = vadd.f32 %v6130_v28, %v879_v2  ;;  %v1016_v2 = vadd.f32 %v6130_v28, %v881_v29 }
 0x1cb   :  { %v1906_v45 = vmax.f32 %v1778_v61, 0.0  ;;  %v1907_v39 = vmax.f32 %v1779_v62, 0.0  ;;  %v1652_v49 = vmul.f32 %v6139_v34, %v1375_v60  ;;  %v1653_v6 = vmul.f32 %v6139_v34, %v1379_v38  ;;  %1258 = vperm.xlu1 %4550, %v5074_v37   ;;  %1514 = vperm.xlu0 %4549, %v7878_v7   ;;  %v7880_v62 = vld [vmem:[#allocation35_spill] sm:$0xff] }
 0x1cc   :  { %v1013_v57 = vadd.f32 %v6130_v28, %v878_v32  ;;  %v5078_v37 = vld [vmem:[%s7656_s0 + $0x1a8] sm:$0xff] }
 0x1cd   :  { %v1780_v41 = vadd.f32 %v1652_v49, %v1007_v10  ;;  %v1781_v23 = vadd.f32 %v1653_v6, %v1008_v63  ;;  %4466 = vmatmul.mubr.msk.f32.gmra.mxu1 %vm1965_vm0, %v1906_v45  ;;  %v816_v10 = vmul.f32 %v6117_v48, %v7880_v62  ;;  %v880_v63 = vmul.f32 %v6117_v48, %v5996_v13  ;;  %v5079_v13 = vld [vmem:[%s7656_s0 + $0x3a8] sm:$0xff]  ;;  %v7883_v62 = vld [vmem:[#allocation40_spill] sm:$0xff] }
 0x1ce   :  { %v1383_v25 = vpop.permute.xlu1 %1382  ;;  %4468 = vmatprep.mubr.msk.f32.mxu1 %vm1965_vm0, %v1907_v39  ;;  %v1387_v59 = vpop.permute.xlu0 %1386 }
 0x1cf   :  { %v1908_v35 = vmax.f32 %v1780_v41, 0.0  ;;  %v1909_v26 = vmax.f32 %v1781_v23, 0.0  ;;  %v1654_v3 = vmul.f32 %v6139_v34, %v1383_v25  ;;  %v1655_v27 = vmul.f32 %v6139_v34, %v1387_v59  ;;  %1262 = vperm.xlu1 %4550, %v5075_v40   ;;  %1518 = vperm.xlu0 %4549, %v7879_v9   ;;  %v5080_v40 = vld [vmem:[%s7656_s0 + $0x1b0] sm:$0xff] }
 0x1d0   :  { %v951_v23 = vadd.f32 %v6130_v28, %v816_v10  ;;  %v5081_v9 = vld [vmem:[%s7656_s0 + $0x3b0] sm:$0xff]  ;;  %v819_v10 = vmul.f32 %v6117_v48, %v7883_v62 }
 0x1d1   :  { %v1782_v8 = vadd.f32 %v1654_v3, %v1009_v12  ;;  %v1783_v53 = vadd.f32 %v1655_v27, %v1010_v44  ;;  %4469 = vmatmul.mubr.msk.f32.gmra.mxu1 %vm1965_vm0, %v1908_v35  ;;  %v7881_v12 = vld [vmem:[#allocation38_spill] sm:$0xff]  ;;  %v1015_v44 = vadd.f32 %v6130_v28, %v880_v63  ;;  %v883_v63 = vmul.f32 %v6117_v48, %v6010_v20 }
 0x1d2   :  { %v1391_v31 = vpop.permute.xlu1 %1390  ;;  %4471 = vmatprep.mubr.msk.f32.mxu1 %vm1965_vm0, %v1909_v26  ;;  %v1395_v36 = vpop.permute.xlu0 %1394  ;;  %v817_v52 = vmul.f32 %v6117_v48, %v7881_v12  ;;  %v884_v12 = vmul.f32 %v6117_v48, %v6008_v17 }
 0x1d3   :  { %v1910_v1 = vmax.f32 %v1782_v8, 0.0  ;;  %v1911_v30 = vmax.f32 %v1783_v53, 0.0  ;;  %v1656_v0 = vmul.f32 %v6139_v34, %v1391_v31  ;;  %v1657_v4 = vmul.f32 %v6139_v34, %v1395_v36  ;;  %1266 = vperm.xlu1 %4550, %v5076_v5   ;;  %1522 = vperm.xlu0 %4549, %v5077_v11   ;;  %v7882_v53 = vld [vmem:[#allocation37_spill] sm:$0xff] }
 0x1d4   :  { %v952_v32 = vadd.f32 %v6130_v28, %v817_v52  ;;  %v5082_v5 = vld [vmem:[%s7656_s0 + $0x1b8] sm:$0xff]  ;;  %v1018_v52 = vadd.f32 %v6130_v28, %v883_v63 }
 0x1d5   :  { %v1784_v16 = vadd.f32 %v1656_v0, %v1011_v14  ;;  %v1785_v61 = vadd.f32 %v1657_v4, %v1012_v56  ;;  %4472 = vmatmul.mubr.msk.f32.gmra.mxu1 %vm1965_vm0, %v1910_v1  ;;  %v818_v14 = vmul.f32 %v6117_v48, %v7882_v53  ;;  %v882_v56 = vmul.f32 %v6117_v48, %v6002_v15  ;;  %v5083_v15 = vld [vmem:[%s7656_s0 + $0x3b8] sm:$0xff] }
 0x1d6   :  { %v1399_v60 = vpop.permute.xlu1 %1398  ;;  %4474 = vmatprep.mubr.msk.f32.mxu1 %vm1965_vm0, %v1911_v30  ;;  %v1403_v38 = vpop.permute.xlu0 %1402  ;;  %v1019_v53 = vadd.f32 %v6130_v28, %v884_v12 }
 0x1d7   :  { %v1912_v45 = vmax.f32 %v1784_v16, 0.0  ;;  %v1913_v39 = vmax.f32 %v1785_v61, 0.0  ;;  %v1658_v49 = vmul.f32 %v6139_v34, %v1399_v60  ;;  %v1659_v6 = vmul.f32 %v6139_v34, %v1403_v38  ;;  %1270 = vperm.xlu1 %4550, %v5078_v37   ;;  %1526 = vperm.xlu0 %4549, %v5079_v13   ;;  %v5085_v37 = vld [vmem:[%s7656_s0 + $0x3c0] sm:$0xff] }
 0x1d8   :  { %v953_v61 = vadd.f32 %v6130_v28, %v818_v14  ;;  %v885_v14 = vmul.f32 %v6117_v48, %v6016_v22 }
 0x1d9   :  { %v1786_v7 = vadd.f32 %v1658_v49, %v1013_v57  ;;  %v1787_v41 = vadd.f32 %v1659_v6, %v1014_v33  ;;  %4475 = vmatmul.mubr.msk.f32.gmra.mxu1 %vm1965_vm0, %v1912_v45  ;;  %v1017_v57 = vadd.f32 %v6130_v28, %v882_v56  ;;  %v5084_v6 = vld [vmem:[%s7656_s0 + $0x1c0] sm:$0xff] }
 0x1da   :  { %v1151_v25 = vpop.permute.xlu1 %1150  ;;  %4477 = vmatprep.mubr.msk.f32.mxu1 %vm1965_vm0, %v1913_v39  ;;  %v1407_v59 = vpop.permute.xlu0 %1406 }
 0x1db   :  { %v1914_v35 = vmax.f32 %v1786_v7, 0.0  ;;  %v1915_v26 = vmax.f32 %v1787_v41, 0.0  ;;  %v1596_v3 = vmul.f32 %v6139_v34, %v1151_v25  ;;  %v1660_v27 = vmul.f32 %v6139_v34, %v1407_v59  ;;  %1274 = vperm.xlu1 %4550, %v5080_v40   ;;  %1530 = vperm.xlu0 %4549, %v5081_v9   ;;  %v7884_v7 = vld [vmem:[#allocation39_spill] sm:$0xff] }
 0x1dc   :  { %v820_v41 = vmul.f32 %v6117_v48, %v7884_v7 }
 0x1dd   :  { %v1724_v18 = vadd.f32 %v1596_v3, %v951_v23  ;;  %v1788_v8 = vadd.f32 %v1660_v27, %v1015_v44  ;;  %4478 = vmatmul.mubr.msk.f32.gmra.mxu1 %vm1965_vm0, %v1914_v35  ;;  %v954_v23 = vadd.f32 %v6130_v28, %v819_v10  ;;  %v5086_v3 = vld [vmem:[%s7656_s0 + $0x1c8] sm:$0xff] }
 0x1de   :  { %v1155_v31 = vpop.permute.xlu1 %1154  ;;  %4480 = vmatprep.mubr.msk.f32.mxu1 %vm1965_vm0, %v1915_v26  ;;  %v1411_v36 = vpop.permute.xlu0 %1410  ;;  %v5087_v27 = vld [vmem:[%s7656_s0 + $0x3c8] sm:$0xff]  ;;  %v955_v9 = vadd.f32 %v6130_v28, %v820_v41 }
 0x1df   :  { %v1852_v1 = vmax.f32 %v1724_v18, 0.0  ;;  %v1916_v30 = vmax.f32 %v1788_v8, 0.0  ;;  %v1597_v0 = vmul.f32 %v6139_v34, %v1155_v31  ;;  %v1661_v4 = vmul.f32 %v6139_v34, %v1411_v36  ;;  %1278 = vperm.xlu1 %4550, %v5082_v5   ;;  %1534 = vperm.xlu0 %4549, %v5083_v15   ;;  %v7885_v18 = vld [vmem:[#allocation43_spill] sm:$0xff]  ;;  %v7886_v5 = vld [vmem:[#allocation42_spill] sm:$0xff] }
 0x1e0   :  { %v821_v8 = vmul.f32 %v6117_v48, %v7885_v18  ;;  %v822_v15 = vmul.f32 %v6117_v48, %v7886_v5 }
 0x1e1   :  { %v1725_v11 = vadd.f32 %v1597_v0, %v952_v32  ;;  %v1789_v16 = vadd.f32 %v1661_v4, %v1016_v2  ;;  %4385 = vmatmul.mubr.msk.f32.gmra.mxu0 %vm1965_vm0, %v1852_v1  ;;  %4481 = vmatmul.mubr.msk.f32.gmra.mxu1 %vm1965_vm0, %v1916_v30  ;;  %v5088_v30 = vld [vmem:[%s7656_s0 + $0x1d0] sm:$0xff] }
 0x1e2   :  { %v1159_v33 = vpop.permute.xlu1 %1158  ;;  %v1415_v60 = vpop.permute.xlu0 %1414  ;;  %v5089_v0 = vld [vmem:[%s7656_s0 + $0x3d0] sm:$0xff] }
 0x1e3   :  { %v1853_v38 = vmax.f32 %v1725_v11, 0.0  ;;  %v1917_v45 = vmax.f32 %v1789_v16, 0.0  ;;  %v1598_v39 = vmul.f32 %v6139_v34, %v1159_v33  ;;  %v1662_v49 = vmul.f32 %v6139_v34, %v1415_v60  ;;  %1282 = vperm.xlu1 %4550, %v5084_v6   ;;  %1538 = vperm.xlu0 %4549, %v5085_v37   ;;  %v7887_v6 = vld [vmem:[#allocation47_spill] sm:$0xff] }
 0x1e4   :  { %v956_v11 = vadd.f32 %v6130_v28, %v821_v8  ;;  %v886_v16 = vmul.f32 %v6117_v48, %v6014_v19  ;;  %v823_v37 = vmul.f32 %v6117_v48, %v7887_v6 }
 0x1e5   :  { %v1726_v13 = vadd.f32 %v1598_v39, %v953_v61  ;;  %v1790_v20 = vadd.f32 %v1662_v49, %v1017_v57  ;;  %4387 = vmatprep.mubr.msk.f32.mxu0 %vm1965_vm0, %v1853_v38  ;;  %4483 = vmatprep.mubr.msk.f32.mxu1 %vm1965_vm0, %v1917_v45  ;;  %v1020_v61 = vadd.f32 %v6130_v28, %v885_v14  ;;  %v5090_v38 = vld [vmem:[%s7656_s0 + $0x1d8] sm:$0xff] }
 0x1e6   :  { %v1163_v44 = vpop.permute.xlu1 %1162  ;;  %v1419_v29 = vpop.permute.xlu0 %1418  ;;  %v5091_v45 = vld [vmem:[%s7656_s0 + $0x3d8] sm:$0xff]  ;;  %v957_v49 = vadd.f32 %v6130_v28, %v822_v15 }
 0x1e7   :  { %v1854_v25 = vmax.f32 %v1726_v13, 0.0  ;;  %v1918_v59 = vmax.f32 %v1790_v20, 0.0  ;;  %v1599_v35 = vmul.f32 %v6139_v34, %v1163_v44  ;;  %v1663_v26 = vmul.f32 %v6139_v34, %v1419_v29  ;;  %1286 = vperm.xlu1 %4550, %v5086_v3   ;;  %1542 = vperm.xlu0 %4549, %v5087_v27   ;;  %v5092_v29 = vld [vmem:[%s7656_s0 + $0x1e0] sm:$0xff] }
 0x1e8   :  { %v1021_v13 = vadd.f32 %v6130_v28, %v886_v16  ;;  %v887_v20 = vmul.f32 %v6117_v48, %v6022_v24  ;;  %v958_v3 = vadd.f32 %v6130_v28, %v823_v37  ;;  %v888_v27 = vmul.f32 %v6117_v48, %v6020_v21 }
 0x1e9   :  { %v1727_v17 = vadd.f32 %v1599_v35, %v954_v23  ;;  %v1791_v40 = vadd.f32 %v1663_v26, %v1018_v52  ;;  %4388 = vmatmul.mubr.msk.f32.gmra.mxu0 %vm1965_vm0, %v1854_v25  ;;  %4484 = vmatmul.mubr.msk.f32.gmra.mxu1 %vm1965_vm0, %v1918_v59  ;;  %v5093_v25 = vld [vmem:[%s7656_s0 + $0x3e0] sm:$0xff] }
 0x1ea   :  { %v1167_v32 = vpop.permute.xlu1 %1166  ;;  %v1423_v56 = vpop.permute.xlu0 %1422  ;;  %v7888_v35 = vld [vmem:[#allocation46_spill] sm:$0xff] }
 0x1eb   :  { %v1855_v2 = vmax.f32 %v1727_v17, 0.0  ;;  %v1919_v31 = vmax.f32 %v1791_v40, 0.0  ;;  %v1600_v36 = vmul.f32 %v6139_v34, %v1167_v32  ;;  %v1664_v1 = vmul.f32 %v6139_v34, %v1423_v56  ;;  %1290 = vperm.xlu1 %4550, %v5088_v30   ;;  %1546 = vperm.xlu0 %4549, %v5089_v0   ;;  %v5094_v32 = vld [vmem:[%s7656_s0 + $0x1e8] sm:$0xff] }
 0x1ec   :  { %v824_v26 = vmul.f32 %v6117_v48, %v7888_v35  ;;  %v1022_v17 = vadd.f32 %v6130_v28, %v887_v20  ;;  %v5095_v56 = vld [vmem:[%s7656_s0 + $0x3e8] sm:$0xff]  ;;  %v1023_v30 = vadd.f32 %v6130_v28, %v888_v27  ;;  %v889_v0 = vmul.f32 %v6117_v48, %v6028_v42 }
 0x1ed   :  { %v1728_v4 = vadd.f32 %v1600_v36, %v955_v9  ;;  %v1792_v22 = vadd.f32 %v1664_v1, %v1019_v53  ;;  %4390 = vmatprep.mubr.msk.f32.mxu0 %vm1965_vm0, %v1855_v2  ;;  %4486 = vmatprep.mubr.msk.f32.mxu1 %vm1965_vm0, %v1919_v31  ;;  %v7889_v36 = vld [vmem:[#allocation51_spill] sm:$0xff] }
 0x1ee   :  { %v1171_v62 = vpop.permute.xlu1 %1170  ;;  %v1427_v10 = vpop.permute.xlu0 %1426  ;;  %v959_v31 = vadd.f32 %v6130_v28, %v824_v26  ;;  %v825_v1 = vmul.f32 %v6117_v48, %v7889_v36  ;;  %v5097_v28 = vld [vmem:[%s7656_s0 + $0x3f0] sm:$0xff]  ;;  %v6596_v48 = vld [vmem:[%s7658_s1] ss:$0 sm:$0xff] }
 0x1ef   :  { %v1856_v57 = vmax.f32 %v1728_v4, 0.0  ;;  %v1920_v63 = vmax.f32 %v1792_v22, 0.0  ;;  %v1601_v33 = vmul.f32 %v6139_v34, %v1171_v62  ;;  %v1665_v60 = vmul.f32 %v6139_v34, %v1427_v10  ;;  %1294 = vperm.xlu1 %4550, %v5090_v38   ;;  %1550 = vperm.xlu0 %4549, %v5091_v45  }
 0x1f1   :  { %v1729_v19 = vadd.f32 %v1601_v33, %v956_v11  ;;  %v1793_v39 = vadd.f32 %v1665_v60, %v1020_v61  ;;  %4391 = vmatmul.mubr.msk.f32.gmra.mxu0 %vm1965_vm0, %v1856_v57  ;;  %4487 = vmatmul.mubr.msk.f32.gmra.mxu1 %vm1965_vm0, %v1920_v63  ;;  %v5096_v61 = vld [vmem:[%s7656_s0 + $0x1f0] sm:$0xff]  ;;  %v6603_v57 = vld [vmem:[%s7659_s2] ss:$0 sm:$0xff]  ;;  %v890_v33 = vmul.f32 %v6596_v48, %v6026_v43  ;;  %v5102_v43 = vld [vmem:[%s7656_s0 + $0x3f8] sm:$0xff] }
 0x1f2   :  { %v1175_v7 = vpop.permute.xlu1 %1174  ;;  %v1431_v41 = vpop.permute.xlu0 %1430  ;;  %v960_v63 = vadd.f32 %v6603_v57, %v825_v1  ;;  %v1024_v60 = vadd.f32 %v6603_v57, %v889_v0  ;;  %v7893_v1 = vld [vmem:[#allocation59_spill] sm:$0xff]  ;;  %v893_v0 = vmul.f32 %v6596_v48, %v6040_v50  ;;  %v894_v50 = vmul.f32 %v6596_v48, %v6038_v51 }
 0x1f3   :  { %v1857_v23 = vmax.f32 %v1729_v19, 0.0  ;;  %v1921_v12 = vmax.f32 %v1793_v39, 0.0  ;;  %v1602_v52 = vmul.f32 %v6139_v34, %v1175_v7  ;;  %v1666_v44 = vmul.f32 %v6139_v34, %v1431_v41  ;;  %1298 = vperm.xlu1 %4550, %v5092_v29   ;;  %1554 = vperm.xlu0 %4549, %v5093_v25  }
 0x1f5   :  { %v1730_v59 = vadd.f32 %v1602_v52, %v957_v49  ;;  %v1794_v24 = vadd.f32 %v1666_v44, %v1021_v13  ;;  %4393 = vmatprep.mubr.msk.f32.mxu0 %vm1965_vm0, %v1857_v23  ;;  %4489 = vmatprep.mubr.msk.f32.mxu1 %vm1965_vm0, %v1921_v12  ;;  %v6612_v49 = vld [vmem:[%s7658_s1 + $0x1] ss:$0 sm:$0xff]  ;;  %v5101_v13 = vld [vmem:[%s7656_s0 + $0x1f8] sm:$0xff]  ;;  %v7891_v23 = vld [vmem:[#allocation55_spill] sm:$0xff]  ;;  %v1025_v52 = vadd.f32 %v6603_v57, %v890_v33 }
 0x1f6   :  { %v1179_v40 = vpop.permute.xlu1 %1178  ;;  %v1435_v9 = vpop.permute.xlu0 %1434  ;;  %v827_v12 = vmul.f32 %v6596_v48, %v7891_v23  ;;  %v891_v44 = vmul.f32 %v6596_v48, %v6034_v46  ;;  %v892_v46 = vmul.f32 %v6596_v48, %v6032_v47  ;;  %v829_v47 = vmul.f32 %v6596_v48, %v7893_v1 }
 0x1f7   :  { %v1858_v18 = vmax.f32 %v1730_v59, 0.0  ;;  %v1922_v8 = vmax.f32 %v1794_v24, 0.0  ;;  %v1603_v53 = vmul.f32 %v6139_v34, %v1179_v40  ;;  %v1667_v14 = vmul.f32 %v6139_v34, %v1435_v9  ;;  %1302 = vperm.xlu1 %4550, %v5094_v32   ;;  %1558 = vperm.xlu0 %4549, %v5095_v56  }
 0x1f8   :  { %v962_v9 = vadd.f32 %v6603_v57, %v827_v12 }
 0x1f9   :  { %v1731_v21 = vadd.f32 %v1603_v53, %v958_v3  ;;  %v1795_v2 = vadd.f32 %v1667_v14, %v1022_v17  ;;  %4394 = vmatmul.mubr.msk.f32.gmra.mxu0 %vm1965_vm0, %v1858_v18  ;;  %4490 = vmatmul.mubr.msk.f32.gmra.mxu1 %vm1965_vm0, %v1922_v8  ;;  %v7892_v17 = vld [vmem:[#allocation54_spill] sm:$0xff]  ;;  %v1026_v18 = vadd.f32 %v6603_v57, %v891_v44 }
 0x1fa   :  { %v1183_v4 = vpop.permute.xlu1 %1182  ;;  %v1439_v22 = vpop.permute.xlu0 %1438  ;;  %v828_v40 = vmul.f32 %v6596_v48, %v7892_v17 }
 0x1fb   :  { %v1859_v5 = vmax.f32 %v1731_v21, 0.0  ;;  %v1923_v15 = vmax.f32 %v1795_v2, 0.0  ;;  %v1604_v11 = vmul.f32 %v6139_v34, %v1183_v4  ;;  %v1668_v16 = vmul.f32 %v6139_v34, %v1439_v22  ;;  %1306 = vperm.xlu1 %4550, %v5096_v61   ;;  %1562 = vperm.xlu0 %4549, %v5097_v28   ;;  %v7890_v34 = vld [vmem:[#allocation50_spill] sm:$0xff] }
 0x1fc   :  { %v826_v10 = vmul.f32 %v6596_v48, %v7890_v34  ;;  %v963_v36 = vadd.f32 %v6603_v57, %v828_v40  ;;  %v964_v34 = vadd.f32 %v6603_v57, %v829_v47 }
 0x1fd   :  { %v1732_v62 = vadd.f32 %v1604_v11, %v959_v31  ;;  %v1796_v42 = vadd.f32 %v1668_v16, %v1023_v30  ;;  %4396 = vmatprep.mubr.msk.f32.mxu0 %vm1965_vm0, %v1859_v5  ;;  %4492 = vmatprep.mubr.msk.f32.mxu1 %vm1965_vm0, %v1923_v15  ;;  %v1027_v30 = vadd.f32 %v6603_v57, %v892_v46 }
 0x1fe   :  { %v1187_v38 = vpop.permute.xlu1 %1186  ;;  %v1443_v45 = vpop.permute.xlu0 %1442  ;;  %v961_v41 = vadd.f32 %v6603_v57, %v826_v10  ;;  %v1028_v10 = vadd.f32 %v6603_v57, %v893_v0 }
 0x1ff   :  { %v1860_v19 = vmax.f32 %v1732_v62, 0.0  ;;  %v1924_v39 = vmax.f32 %v1796_v42, 0.0  ;;  %v1605_v6 = vmul.f32 %v6612_v49, %v1187_v38  ;;  %v1669_v37 = vmul.f32 %v6612_v49, %v1443_v45  ;;  %1310 = vperm.xlu1 %4550, %v5101_v13   ;;  %1566 = vperm.xlu0 %4549, %v5102_v43   ;;  %v7894_v62 = vld [vmem:[#allocation58_spill] sm:$0xff]  ;;  %v7895_v13 = vld [vmem:[#allocation63_spill] sm:$0xff] }
 0x200   :  { %v830_v42 = vmul.f32 %v6596_v48, %v7894_v62  ;;  %v831_v51 = vmul.f32 %v6596_v48, %v7895_v13  ;;  %v1029_v43 = vadd.f32 %v6603_v57, %v894_v50 }
 0x201   :  { %v1733_v20 = vadd.f32 %v1605_v6, %v960_v63  ;;  %v1797_v7 = vadd.f32 %v1669_v37, %v1024_v60  ;;  %4397 = vmatmul.mubr.msk.f32.gmra.mxu0 %vm1965_vm0, %v1860_v19  ;;  %4493 = vmatmul.mubr.msk.f32.gmra.mxu1 %vm1965_vm0, %v1924_v39 }
 0x202   :  { %v1191_v29 = vpop.permute.xlu1 %1190  ;;  %v1447_v25 = vpop.permute.xlu0 %1446  ;;  %v965_v37 = vadd.f32 %v6603_v57, %v830_v42 }
 0x203   :  { %v1861_v59 = vmax.f32 %v1733_v20, 0.0  ;;  %v1925_v24 = vmax.f32 %v1797_v7, 0.0  ;;  %v1606_v35 = vmul.f32 %v6612_v49, %v1191_v29  ;;  %v1670_v26 = vmul.f32 %v6612_v49, %v1447_v25 }
 0x204   :  { %v895_v20 = vmul.f32 %v6596_v48, %v6046_v54  ;;  %v896_v54 = vmul.f32 %v6596_v48, %v6044_v55 }
 0x205   :  { %v1734_v3 = vadd.f32 %v1606_v35, %v961_v41  ;;  %v1798_v27 = vadd.f32 %v1670_v26, %v1025_v52  ;;  %4399 = vmatprep.mubr.msk.f32.mxu0 %vm1965_vm0, %v1861_v59  ;;  %4495 = vmatprep.mubr.msk.f32.mxu1 %vm1965_vm0, %v1925_v24  ;;  %v7896_v59 = vld [vmem:[#allocation62_spill] sm:$0xff]  ;;  %v966_v35 = vadd.f32 %v6603_v57, %v831_v51 }
 0x206   :  { %v1195_v8 = vpop.permute.xlu1 %1194  ;;  %v1451_v53 = vpop.permute.xlu0 %1450  ;;  %v832_v24 = vmul.f32 %v6596_v48, %v7896_v59  ;;  %v1030_v26 = vadd.f32 %v6603_v57, %v895_v20 }
 0x207   :  { %v1862_v14 = vmax.f32 %v1734_v3, 0.0  ;;  %v1926_v32 = vmax.f32 %v1798_v27, 0.0  ;;  %v1607_v56 = vmul.f32 %v6612_v49, %v1195_v8  ;;  %v1671_v21 = vmul.f32 %v6612_v49, %v1451_v53 }
 0x208   :  { %v967_v53 = vadd.f32 %v6603_v57, %v832_v24 }
 0x209   :  { %v1735_v2 = vadd.f32 %v1607_v56, %v962_v9  ;;  %v1799_v31 = vadd.f32 %v1671_v21, %v1026_v18  ;;  %4400 = vmatmul.mubr.msk.f32.gmra.mxu0 %vm1965_vm0, %v1862_v14  ;;  %4496 = vmatmul.mubr.msk.f32.gmra.mxu1 %vm1965_vm0, %v1926_v32  ;;  %v7897_v14 = vld [vmem:[#allocation67_spill] sm:$0xff]  ;;  %v1031_v32 = vadd.f32 %v6603_v57, %v896_v54 }
 0x20a   :  { %v1199_v4 = vpop.permute.xlu1 %1198  ;;  %v1455_v22 = vpop.permute.xlu0 %1454  ;;  %v833_v55 = vmul.f32 %v6596_v48, %v7897_v14  ;;  %v897_v56 = vmul.f32 %v6596_v48, %v6052_v58  ;;  %v7899_v58 = vld [vmem:[#allocation102_spill] sm:$0xff] }
 0x20b   :  { %v1863_v5 = vmax.f32 %v1735_v2, 0.0  ;;  %v1927_v15 = vmax.f32 %v1799_v31, 0.0  ;;  %v1608_v11 = vmul.f32 %v6612_v49, %v1199_v4  ;;  %v1672_v16 = vmul.f32 %v6612_v49, %v1455_v22  ;;  %v7898_v4 = vld [vmem:[#allocation66_spill] sm:$0xff] }
 0x20c   :  { %v834_v22 = vmul.f32 %v6596_v48, %v7898_v4 }
 0x20d   :  { %v1736_v61 = vadd.f32 %v1608_v11, %v963_v36  ;;  %v1800_v28 = vadd.f32 %v1672_v16, %v1027_v30  ;;  %4402 = vmatprep.mubr.msk.f32.mxu0 %vm1965_vm0, %v1863_v5  ;;  %4498 = vmatprep.mubr.msk.f32.mxu1 %vm1965_vm0, %v1927_v15  ;;  %v968_v5 = vadd.f32 %v6603_v57, %v833_v55 }
 0x20e   :  { %v1203_v63 = vpop.permute.xlu1 %1202  ;;  %v1459_v33 = vpop.permute.xlu0 %1458  ;;  %v898_v15 = vmul.f32 %v6596_v48, %v7899_v58  ;;  %v1032_v11 = vadd.f32 %v6603_v57, %v897_v56 }
 0x20f   :  { %v1864_v60 = vmax.f32 %v1736_v61, 0.0  ;;  %v1928_v38 = vmax.f32 %v1800_v28, 0.0  ;;  %v1609_v45 = vmul.f32 %v6612_v49, %v1203_v63  ;;  %v1673_v19 = vmul.f32 %v6612_v49, %v1459_v33  ;;  %v7900_v33 = vld [vmem:[#allocation71_spill] sm:$0xff] }
 0x210   :  { %v969_v63 = vadd.f32 %v6603_v57, %v834_v22 }
 0x211   :  { %v1737_v39 = vadd.f32 %v1609_v45, %v964_v34  ;;  %v1801_v6 = vadd.f32 %v1673_v19, %v1028_v10  ;;  %4403 = vmatmul.mubr.msk.f32.gmra.mxu0 %vm1965_vm0, %v1864_v60  ;;  %4499 = vmatmul.mubr.msk.f32.gmra.mxu1 %vm1965_vm0, %v1928_v38  ;;  %v835_v60 = vmul.f32 %v6596_v48, %v7900_v33  ;;  %v7901_v45 = vld [vmem:[#allocation104_spill] sm:$0xff] }
 0x212   :  { %v1207_v7 = vpop.permute.xlu1 %1206  ;;  %v1463_v41 = vpop.permute.xlu0 %1462  ;;  %v1033_v38 = vadd.f32 %v6603_v57, %v898_v15  ;;  %v899_v19 = vmul.f32 %v6596_v48, %v7901_v45 }
 0x213   :  { %v1865_v23 = vmax.f32 %v1737_v39, 0.0  ;;  %v1929_v12 = vmax.f32 %v1801_v6, 0.0  ;;  %v1610_v52 = vmul.f32 %v6612_v49, %v1207_v7  ;;  %v1674_v44 = vmul.f32 %v6612_v49, %v1463_v41  ;;  %v7902_v41 = vld [vmem:[#allocation70_spill] sm:$0xff] }
 0x215   :  { %v1738_v29 = vadd.f32 %v1610_v52, %v965_v37  ;;  %v1802_v25 = vadd.f32 %v1674_v44, %v1029_v43  ;;  %4405 = vmatprep.mubr.msk.f32.mxu0 %vm1965_vm0, %v1865_v23  ;;  %4501 = vmatprep.mubr.msk.f32.mxu1 %vm1965_vm0, %v1929_v12  ;;  %v836_v23 = vmul.f32 %v6596_v48, %v7902_v41  ;;  %v7903_v52 = vld [vmem:[#allocation103_spill] sm:$0xff] }
 0x216   :  { %v1211_v3 = vpop.permute.xlu1 %1210  ;;  %v1467_v27 = vpop.permute.xlu0 %1466  ;;  %v970_v12 = vadd.f32 %v6603_v57, %v835_v60  ;;  %v900_v44 = vmul.f32 %v6596_v48, %v7903_v52  ;;  %v7912_v41 = vld [vmem:[#allocation107_spill] sm:$0xff] }
 0x217   :  { %v1866_v17 = vmax.f32 %v1738_v29, 0.0  ;;  %v1930_v40 = vmax.f32 %v1802_v25, 0.0  ;;  %v1611_v9 = vmul.f32 %v6612_v49, %v1211_v3  ;;  %v1675_v46 = vmul.f32 %v6612_v49, %v1467_v27 }
 0x218   :  { %v1034_v29 = vadd.f32 %v6603_v57, %v899_v19 }
 0x219   :  { %v1739_v18 = vadd.f32 %v1611_v9, %v966_v35  ;;  %v1803_v8 = vadd.f32 %v1675_v46, %v1030_v26  ;;  %4406 = vmatmul.mubr.msk.f32.gmra.mxu0 %vm1965_vm0, %v1866_v17  ;;  %4502 = vmatmul.mubr.msk.f32.gmra.mxu1 %vm1965_vm0, %v1930_v40  ;;  %v971_v17 = vadd.f32 %v6603_v57, %v836_v23  ;;  %v7904_v40 = vld [vmem:[#allocation75_spill] sm:$0xff] }
 0x21a   :  { %v1215_v21 = vpop.permute.xlu1 %1214  ;;  %v1471_v2 = vpop.permute.xlu0 %1470  ;;  %v837_v9 = vmul.f32 %v6596_v48, %v7904_v40  ;;  %v1035_v46 = vadd.f32 %v6603_v57, %v900_v44  ;;  %v904_v23 = vmul.f32 %v6596_v48, %v7912_v41 }
 0x21b   :  { %v1867_v31 = vmax.f32 %v1739_v18, 0.0  ;;  %v1931_v36 = vmax.f32 %v1803_v8, 0.0  ;;  %v1612_v1 = vmul.f32 %v6612_v49, %v1215_v21  ;;  %v1676_v47 = vmul.f32 %v6612_v49, %v1471_v2  ;;  %v7905_v18 = vld [vmem:[#allocation106_spill] sm:$0xff] }
 0x21c   :  { %v901_v8 = vmul.f32 %v6596_v48, %v7905_v18 }
 0x21d   :  { %v1740_v30 = vadd.f32 %v1612_v1, %v967_v53  ;;  %v1804_v0 = vadd.f32 %v1676_v47, %v1031_v32  ;;  %4408 = vmatprep.mubr.msk.f32.mxu0 %vm1965_vm0, %v1867_v31  ;;  %4504 = vmatprep.mubr.msk.f32.mxu1 %vm1965_vm0, %v1931_v36  ;;  %v7906_v36 = vld [vmem:[#allocation74_spill] sm:$0xff]  ;;  %v972_v47 = vadd.f32 %v6603_v57, %v837_v9 }
 0x21e   :  { %v1219_v16 = vpop.permute.xlu1 %1218  ;;  %v1475_v61 = vpop.permute.xlu0 %1474  ;;  %v838_v1 = vmul.f32 %v6596_v48, %v7906_v36  ;;  %v1036_v4 = vadd.f32 %v6603_v57, %v901_v8  ;;  %v7916_v9 = vld [vmem:[#allocation90_spill] sm:$0xff] }
 0x21f   :  { %v1868_v28 = vmax.f32 %v1740_v30, 0.0  ;;  %v1932_v62 = vmax.f32 %v1804_v0, 0.0  ;;  %v1613_v42 = vmul.f32 %v6612_v49, %v1219_v16  ;;  %v1677_v34 = vmul.f32 %v6612_v49, %v1475_v61  ;;  %v7907_v30 = vld [vmem:[#allocation105_spill] sm:$0xff] }
 0x220   :  { %v902_v0 = vmul.f32 %v6596_v48, %v7907_v30 }
 0x221   :  { %v1741_v50 = vadd.f32 %v1613_v42, %v968_v5  ;;  %v1805_v10 = vadd.f32 %v1677_v34, %v1032_v11  ;;  %4409 = vmatmul.mubr.msk.f32.gmra.mxu0 %vm1965_vm0, %v1868_v28  ;;  %4505 = vmatmul.mubr.msk.f32.gmra.mxu1 %vm1965_vm0, %v1932_v62  ;;  %v973_v62 = vadd.f32 %v6603_v57, %v838_v1  ;;  %v7908_v42 = vld [vmem:[#allocation79_spill] sm:$0xff] }
 0x222   :  { %v1223_v39 = vpop.permute.xlu1 %1222  ;;  %v1479_v6 = vpop.permute.xlu0 %1478  ;;  %v839_v34 = vmul.f32 %v6596_v48, %v7908_v42  ;;  %v7921_v42 = vld [vmem:[#allocation109_spill] sm:$0xff] }
 0x223   :  { %v1869_v37 = vmax.f32 %v1741_v50, 0.0  ;;  %v1933_v13 = vmax.f32 %v1805_v10, 0.0  ;;  %v1614_v51 = vmul.f32 %v6612_v49, %v1223_v39  ;;  %v1678_v43 = vmul.f32 %v6612_v49, %v1479_v6  ;;  %v7909_v10 = vld [vmem:[#allocation108_spill] sm:$0xff]  ;;  %v7910_v6 = vld [vmem:[#allocation78_spill] sm:$0xff] }
 0x224   :  { %v1037_v50 = vadd.f32 %v6603_v57, %v902_v0 }
 0x225   :  { %v1742_v20 = vadd.f32 %v1614_v51, %v969_v63  ;;  %v1806_v7 = vadd.f32 %v1678_v43, %v1033_v38  ;;  %4411 = vmatprep.mubr.msk.f32.mxu0 %vm1965_vm0, %v1869_v37  ;;  %4507 = vmatprep.mubr.msk.f32.mxu1 %vm1965_vm0, %v1933_v13  ;;  %v903_v63 = vmul.f32 %v6596_v48, %v7909_v10 }
 0x226   :  { %v1227_v25 = vpop.permute.xlu1 %1226  ;;  %v1483_v59 = vpop.permute.xlu0 %1482  ;;  %v840_v37 = vmul.f32 %v6596_v48, %v7910_v6  ;;  %v974_v43 = vadd.f32 %v6603_v57, %v839_v34  ;;  %v906_v34 = vmul.f32 %v6596_v48, %v7921_v42  ;;  %v7932_v42 = vld [vmem:[#allocation113_spill] sm:$0xff] }
 0x227   :  { %v1870_v24 = vmax.f32 %v1742_v20, 0.0  ;;  %v1934_v35 = vmax.f32 %v1806_v7, 0.0  ;;  %v1615_v54 = vmul.f32 %v6612_v49, %v1227_v25  ;;  %v1679_v26 = vmul.f32 %v6612_v49, %v1483_v59  ;;  %v7911_v20 = vld [vmem:[#allocation82_spill] sm:$0xff] }
 0x228   :  { %v842_v7 = vmul.f32 %v6596_v48, %v7911_v20  ;;  %v7925_v20 = vld [vmem:[#allocation97_spill] sm:$0xff] }
 0x229   :  { %v1743_v3 = vadd.f32 %v1615_v54, %v970_v12  ;;  %v1807_v27 = vadd.f32 %v1679_v26, %v1034_v29  ;;  %4412 = vmatmul.mubr.msk.f32.gmra.mxu0 %vm1965_vm0, %v1870_v24  ;;  %4508 = vmatmul.mubr.msk.f32.gmra.mxu1 %vm1965_vm0, %v1934_v35  ;;  %v1038_v12 = vadd.f32 %v6603_v57, %v903_v63  ;;  %v7913_v54 = vld [vmem:[#allocation83_spill] sm:$0xff] }
 0x22a   :  { %v1231_v53 = vpop.permute.xlu1 %1230  ;;  %v1487_v14 = vpop.permute.xlu0 %1486  ;;  %v975_v35 = vadd.f32 %v6603_v57, %v840_v37  ;;  %v841_v26 = vmul.f32 %v6596_v48, %v7913_v54  ;;  %v7923_v37 = vld [vmem:[#allocation95_spill] sm:$0xff] }
 0x22b   :  { %v1871_v55 = vmax.f32 %v1743_v3, 0.0  ;;  %v1935_v32 = vmax.f32 %v1807_v27, 0.0  ;;  %v1616_v56 = vmul.f32 %v6612_v49, %v1231_v53  ;;  %v1680_v21 = vmul.f32 %v6612_v49, %v1487_v14  ;;  %v7914_v3 = vld [vmem:[#allocation86_spill] sm:$0xff]  ;;  %v7917_v14 = vld [vmem:[#allocation91_spill] sm:$0xff] }
 0x22c   :  { %v844_v27 = vmul.f32 %v6596_v48, %v7914_v3  ;;  %v977_v53 = vadd.f32 %v6603_v57, %v842_v7  ;;  %v976_v0 = vadd.f32 %v6603_v57, %v841_v26  ;;  %v851_v7 = vmul.f32 %v6596_v48, %v7925_v20 }
 0x22d   :  { %v1744_v2 = vadd.f32 %v1616_v56, %v971_v17  ;;  %v1808_v31 = vadd.f32 %v1680_v21, %v1035_v46  ;;  %4414 = vmatprep.mubr.msk.f32.mxu0 %vm1965_vm0, %v1871_v55  ;;  %4510 = vmatprep.mubr.msk.f32.mxu1 %vm1965_vm0, %v1935_v32  ;;  %v7915_v17 = vld [vmem:[#allocation87_spill] sm:$0xff]  ;;  %v846_v46 = vmul.f32 %v6596_v48, %v7916_v9  ;;  %v7918_v56 = vld [vmem:[#allocation110_spill] sm:$0xff] }
 0x22e   :  { %v1235_v22 = vpop.permute.xlu1 %1234  ;;  %v1491_v5 = vpop.permute.xlu0 %1490  ;;  %v843_v40 = vmul.f32 %v6596_v48, %v7915_v17  ;;  %v845_v55 = vmul.f32 %v6596_v48, %v7917_v14  ;;  %v1039_v32 = vadd.f32 %v6603_v57, %v904_v23  ;;  %v905_v21 = vmul.f32 %v6596_v48, %v7918_v56 }
 0x22f   :  { %v1872_v58 = vmax.f32 %v1744_v2, 0.0  ;;  %v1936_v15 = vmax.f32 %v1808_v31, 0.0  ;;  %v1617_v11 = vmul.f32 %v6612_v49, %v1235_v22  ;;  %v1681_v16 = vmul.f32 %v6612_v49, %v1491_v5  ;;  %v7919_v5 = vld [vmem:[#allocation92_spill] sm:$0xff] }
 0x230   :  { %v6788_v22 = vadd.f32 %v6603_v57, %v843_v40  ;;  %v6847_v14 = vadd.f32 %v6603_v57, %v851_v7 }
 0x231   :  { %v1745_v61 = vadd.f32 %v1617_v11, %v972_v47  ;;  %v1809_v28 = vadd.f32 %v1681_v16, %v1036_v4  ;;  %4415 = vmatmul.mubr.msk.f32.gmra.mxu0 %vm1965_vm0, %v1872_v58  ;;  %4511 = vmatmul.mubr.msk.f32.gmra.mxu1 %vm1965_vm0, %v1936_v15  ;;  %v6785_v4 = vadd.f32 %v6603_v57, %v844_v27 }
 0x232   :  { %v1239_v33 = vpop.permute.xlu1 %1238  ;;  %v1495_v60 = vpop.permute.xlu0 %1494  ;;  %v848_v58 = vmul.f32 %v6596_v48, %v7919_v5  ;;  %v6793_v15 = vadd.f32 %v6603_v57, %v846_v46  ;;  %v7928_v46 = vld [vmem:[#allocation112_spill] sm:$0xff] }
 0x233   :  { %v1873_v38 = vmax.f32 %v1745_v61, 0.0  ;;  %v1937_v45 = vmax.f32 %v1809_v28, 0.0  ;;  %v1618_v19 = vmul.f32 %v6612_v49, %v1239_v33  ;;  %v1682_v39 = vmul.f32 %v6612_v49, %v1495_v60  ;;  %v7920_v28 = vld [vmem:[#allocation93_spill] sm:$0xff] }
 0x234   :  { %v6798_v61 = vadd.f32 %v6603_v57, %v845_v55 }
 0x235   :  { %v1746_v13 = vadd.f32 %v1618_v19, %v973_v62  ;;  %v1810_v51 = vadd.f32 %v1682_v39, %v1037_v50  ;;  %4417 = vmatprep.mubr.msk.f32.mxu0 %vm1965_vm0, %v1873_v38  ;;  %4513 = vmatprep.mubr.msk.f32.mxu1 %vm1965_vm0, %v1937_v45  ;;  %v847_v62 = vmul.f32 %v6596_v48, %v7920_v28  ;;  %v7922_v39 = vld [vmem:[#allocation94_spill] sm:$0xff] }
 0x236   :  { %v1243_v52 = vpop.permute.xlu1 %1242  ;;  %v1499_v44 = vpop.permute.xlu0 %1498  ;;  %v1040_v50 = vadd.f32 %v6603_v57, %v905_v21  ;;  %v6808_v19 = vadd.f32 %v6603_v57, %v848_v58  ;;  %v850_v6 = vmul.f32 %v6596_v48, %v7922_v39 }
 0x237   :  { %v1874_v29 = vmax.f32 %v1746_v13, 0.0  ;;  %v1938_v25 = vmax.f32 %v1810_v51, 0.0  ;;  %v1619_v59 = vmul.f32 %v6612_v49, %v1243_v52  ;;  %v1683_v24 = vmul.f32 %v6612_v49, %v1499_v44  ;;  %v7924_v51 = vld [vmem:[#allocation96_spill] sm:$0xff]  ;;  %v7926_v52 = vld [vmem:[#allocation98_spill] sm:$0xff] }
 0x238   :  { %v849_v13 = vmul.f32 %v6596_v48, %v7923_v37  ;;  %v854_v44 = vmul.f32 %v6596_v48, %v7926_v52  ;;  %v6831_v17 = vadd.f32 %v6603_v57, %v850_v6  ;;  %v7934_v37 = vld [vmem:[#allocation115_spill] sm:$0xff] }
 0x239   :  { %v1747_v18 = vadd.f32 %v1619_v59, %v974_v43  ;;  %v1811_v8 = vadd.f32 %v1683_v24, %v1038_v12  ;;  %4418 = vmatmul.mubr.msk.f32.gmra.mxu0 %vm1965_vm0, %v1874_v29  ;;  %4514 = vmatmul.mubr.msk.f32.gmra.mxu1 %vm1965_vm0, %v1938_v25  ;;  %v852_v43 = vmul.f32 %v6596_v48, %v7924_v51  ;;  %v7927_v29 = vld [vmem:[#allocation99_spill] sm:$0xff] }
 0x23a   :  { %v1247_v2 = vpop.permute.xlu1 %1246  ;;  %v1503_v31 = vpop.permute.xlu0 %1502  ;;  %v6821_v12 = vadd.f32 %v6603_v57, %v847_v62  ;;  %v853_v25 = vmul.f32 %v6596_v48, %v7927_v29  ;;  %v1041_v59 = vadd.f32 %v6603_v57, %v906_v34  ;;  %v6834_v40 = vadd.f32 %v6603_v57, %v849_v13 }
 0x23b   :  { %v1875_v36 = vmax.f32 %v1747_v18, 0.0  ;;  %v1939_v1 = vmax.f32 %v1811_v8, 0.0  ;;  %v1620_v47 = vmul.f32 %v6612_v49, %v1247_v2  ;;  %v1684_v30 = vmul.f32 %v6612_v49, %v1503_v31  ;;  %v6844_v8 = vld [vmem:[%s7660_s4] ss:$0 sm:$0xff]  ;;  %v7929_v2 = vld [vmem:[#allocation100_spill] sm:$0xff] }
 0x23c   :  { %v6837_v9 = vadd.f32 %v6603_v57, %v852_v43  ;;  %v907_v18 = vmul.f32 %v6596_v48, %v7928_v46  ;;  %v6852_v56 = vadd.f32 %v6603_v57, %v854_v44  ;;  %v6855_v21 = vadd.f32 %v6603_v57, %v853_v25 }
 0x23d   :  { %v1748_v11 = vadd.f32 %v1620_v47, %v975_v35  ;;  %v1812_v16 = vadd.f32 %v1684_v30, %v1039_v32  ;;  %4420 = vmatprep.mubr.msk.f32.mxu0 %vm1965_vm0, %v1875_v36  ;;  %4516 = vmatprep.mubr.msk.f32.mxu1 %vm1965_vm0, %v1939_v1  ;;  %v856_v31 = vmul.f32 %v6596_v48, %v7929_v2  ;;  %v7930_v36 = vld [vmem:[#allocation111_spill] sm:$0xff] }
 0x23e   :  { %v1251_v10 = vpop.permute.xlu1 %1250  ;;  %v1507_v63 = vpop.permute.xlu0 %1506  ;;  %v908_v1 = vmul.f32 %v6596_v48, %v7930_v36  ;;  %v1042_v62 = vadd.f32 %v6603_v57, %v907_v18  ;;  %v910_v34 = vmul.f32 %v6596_v48, %v7932_v42  ;;  %v912_v13 = vmul.f32 %v6596_v48, %v7934_v37  ;;  %v7937_v42 = vld [vmem:[#allocation118_spill] sm:$0xff]  ;;  %v7939_v37 = vld [vmem:[#allocation119_spill] sm:$0xff] }
 0x23f   :  { %v1876_v33 = vmax.f32 %v1748_v11, 0.0  ;;  %v1940_v60 = vmax.f32 %v1812_v16, 0.0  ;;  %v1621_v38 = vmul.f32 %v6612_v49, %v1251_v10  ;;  %v1685_v45 = vmul.f32 %v6612_v49, %v1507_v63  ;;  %v7931_v16 = vld [vmem:[#allocation101_spill] sm:$0xff]  ;;  %v7933_v63 = vld [vmem:[#allocation114_spill] sm:$0xff] }
 0x240   :  { %v6865_v28 = vmul.f32 %v6596_v48, %v7931_v16  ;;  %v6878_v39 = vadd.f32 %v6603_v57, %v856_v31  ;;  %v1043_v6 = vadd.f32 %v6603_v57, %v908_v1  ;;  %v1045_v52 = vadd.f32 %v6603_v57, %v910_v34 }
 0x241   :  { %v1749_v41 = vadd.f32 %v1621_v38, %v976_v0  ;;  %v1813_v23 = vadd.f32 %v1685_v45, %v1040_v50  ;;  %4421 = vmatmul.mubr.msk.f32.gmra.mxu0 %vm1965_vm0, %v1876_v33  ;;  %4517 = vmatmul.mubr.msk.f32.gmra.mxu1 %vm1965_vm0, %v1940_v60  ;;  %v909_v33 = vmul.f32 %v6596_v48, %v7933_v63 }
 0x242   :  { %v1255_v24 = vpop.permute.xlu1 %1254  ;;  %v1511_v35 = vpop.permute.xlu0 %1510  ;;  %v913_v34 = vmul.f32 %v6596_v48, %v7937_v42 }
 0x243   :  { %v1877_v54 = vmax.f32 %v1749_v41, 0.0  ;;  %v1941_v26 = vmax.f32 %v1813_v23, 0.0  ;;  %v1622_v3 = vmul.f32 %v6612_v49, %v1255_v24  ;;  %v1686_v27 = vmul.f32 %v6612_v49, %v1511_v35 }
 0x244   :  { %v1044_v24 = vadd.f32 %v6603_v57, %v909_v33 }
 0x245   :  { %v1750_v55 = vadd.f32 %v1622_v3, %v977_v53  ;;  %v1814_v32 = vadd.f32 %v1686_v27, %v1041_v59  ;;  %4423 = vmatprep.mubr.msk.f32.mxu0 %vm1965_vm0, %v1877_v54  ;;  %4519 = vmatprep.mubr.msk.f32.mxu1 %vm1965_vm0, %v1941_v26  ;;  %v6892_v26 = vadd.f32 %v6603_v57, %v912_v13  ;;  %v7935_v3 = vld [vmem:[#allocation116_spill] sm:$0xff] }
 0x246   :  { %v1259_v47 = vpop.permute.xlu1 %1258  ;;  %v4353_v30 = vpop.f32.mrf.mxu0  ;;  %v911_v27 = vmul.f32 %v6596_v48, %v7935_v3  ;;  %v915_v13 = vmul.f32 %v6596_v48, %v7939_v37 }
 0x247   :  { %v1878_v53 = vmax.f32 %v1750_v55, 0.0  ;;  %v1942_v0 = vmax.f32 %v1814_v32, 0.0  ;;  %v1623_v5 = vmul.f32 %v6612_v49, %v1259_v47  ;;  %v2425_v58 = vadd.f32 %v4353_v30, %v6844_v8  ;;  %v1515_v11 = vpop.permute.xlu0 %1514  ;;  %v7936_v47 = vld [vmem:[#allocation117_spill] sm:$0xff] }
 0x248   :  { %v1687_v50 = vmul.f32 %v6612_v49, %v1515_v11  ;;  %v2419_v10 = vpop.f32.mrf.mxu0  ;;  %v914_v30 = vmul.f32 %v6596_v48, %v7936_v47  ;;  %v7940_v47 = vld [vmem:[#allocation3_spill] sm:$0xff] }
 0x249   :  { %v1751_v60 = vadd.f32 %v1623_v5, %v6788_v22  ;;  %v4093_v38 = vmul.f32 -1.442695, %v2425_v58  ;;  %v2420_v45 = vadd.f32 %v6844_v8, %v2419_v10  ;;  %4424 = vmatmul.mubr.msk.f32.gmra.mxu0 %vm1965_vm0, %v1878_v53  ;;  %4520 = vmatmul.mubr.msk.f32.gmra.mxu1 %vm1965_vm0, %v1942_v0 }
 0x24a   :  { %v1815_v51 = vadd.f32 %v1687_v50, %v1042_v62  ;;  %v1263_v43 = vpop.permute.xlu1 %1262  ;;  %v4356_v20 = vpop.f32.mrf.mxu0  ;;  %v1046_v62 = vadd.f32 %v6603_v57, %v911_v27  ;;  %v7938_v50 = vld [vmem:[#allocation41_spill] sm:$0xff] }
 0x24b   :  { %v1879_v7 = vmax.f32 %v1751_v60, 0.0  ;;  %4551 = vpow2.f32 %v4093_v38  ;;  %v4092_v22 = vmul.f32 -1.442695, %v2420_v45  ;;  %v1624_v41 = vmul.f32 %v6612_v49, %v1263_v43  ;;  %v1519_v23 = vpop.permute.xlu0 %1518 }
 0x24c   :  { %v1943_v44 = vmax.f32 %v1815_v51, 0.0  ;;  %v2435_v29 = vadd.f32 %v4356_v20, %v6844_v8  ;;  %v1688_v25 = vmul.f32 %v6612_v49, %v1519_v23  ;;  %v2429_v59 = vpop.f32.mrf.mxu0  ;;  %v916_v10 = vmul.f32 %v6596_v48, %v7938_v50 }
 0x24d   :  { %4553 = vpow2.f32 %v4092_v22  ;;  %v1752_v35 = vadd.f32 %v1624_v41, %v6785_v4  ;;  %v2430_v54 = vadd.f32 %v6844_v8, %v2429_v59  ;;  %4426 = vmatprep.mubr.msk.f32.mxu0 %vm1965_vm0, %v1879_v7  ;;  %v6917_v22 = vadd.f32 %v6603_v57, %v914_v30 }
 0x24e   :  { %v4095_v46 = vmul.f32 -1.442695, %v2435_v29  ;;  %v1816_v18 = vadd.f32 %v1688_v25, %v1043_v6  ;;  %4522 = vmatprep.mubr.msk.f32.mxu1 %vm1965_vm0, %v1943_v44  ;;  %v1267_v55 = vpop.permute.xlu1 %1266  ;;  %v4359_v32 = vpop.f32.mrf.mxu0  ;;  %v6923_v44 = vadd.f32 %v6603_v57, %v913_v34  ;;  %v6926_v29 = vadd.f32 %v6603_v57, %v916_v10 }
 0x24f   :  { %v1880_v2 = vmax.f32 %v1752_v35, 0.0  ;;  %v4094_v31 = vmul.f32 -1.442695, %v2430_v54  ;;  %v1625_v4 = vmul.f32 %v6612_v49, %v1267_v55  ;;  %v2445_v36 = vadd.f32 %v4359_v32, %v6844_v8  ;;  %v1523_v1 = vpop.permute.xlu0 %1522 }
 0x250   :  { %4555 = vpow2.f32 %v4095_v46  ;;  %v1944_v53 = vmax.f32 %v1816_v18, 0.0  ;;  %v1689_v0 = vmul.f32 %v6612_v49, %v1523_v1  ;;  %v2439_v5 = vpop.f32.mrf.mxu0  ;;  %v6932_v55 = vadd.f32 %v6603_v57, %v915_v13 }
 0x251   :  { %4557 = vpow2.f32 %v4094_v31  ;;  %v1753_v58 = vadd.f32 %v1625_v4, %v6798_v61  ;;  %v4097_v11 = vmul.f32 -1.442695, %v2445_v36  ;;  %v2440_v16 = vadd.f32 %v6844_v8, %v2439_v5  ;;  %4427 = vmatmul.mubr.msk.f32.gmra.mxu0 %vm1965_vm0, %v1880_v2 }
 0x252   :  { %v1817_v63 = vadd.f32 %v1689_v0, %v1044_v24  ;;  %4523 = vmatmul.mubr.msk.f32.gmra.mxu1 %vm1965_vm0, %v1944_v53  ;;  %v1271_v33 = vpop.permute.xlu1 %1270  ;;  %v4362_v60 = vpop.f32.mrf.mxu0  ;;  %v918_v30 = vmul.f32 %v6596_v48, %v7940_v47  ;;  %v7941_v53 = vld [vmem:[#allocation45_spill] sm:$0xff] }
 0x253   :  { %v1881_v38 = vmax.f32 %v1753_v58, 0.0  ;;  %4559 = vpow2.f32 %v4097_v11  ;;  %v4096_v61 = vmul.f32 -1.442695, %v2440_v16  ;;  %v1626_v45 = vmul.f32 %v6612_v49, %v1271_v33  ;;  %v1527_v6 = vpop.permute.xlu0 %1526 }
 0x254   :  { %v1945_v51 = vmax.f32 %v1817_v63, 0.0  ;;  %v2455_v43 = vadd.f32 %v4362_v60, %v6844_v8  ;;  %v1690_v20 = vmul.f32 %v6612_v49, %v1527_v6  ;;  %v2449_v7 = vpop.f32.mrf.mxu0  ;;  %v6941_v0 = vmul.f32 %v6596_v48, %v7941_v53 }
 0x255   :  { %4561 = vpow2.f32 %v4096_v61  ;;  %v1754_v41 = vadd.f32 %v1626_v45, %v6793_v15  ;;  %v2450_v23 = vadd.f32 %v6844_v8, %v2449_v7  ;;  %4429 = vmatprep.mubr.msk.f32.mxu0 %vm1965_vm0, %v1881_v38  ;;  %v6952_v6 = vadd.f32 %v6603_v57, %v918_v30 }
 0x256   :  { %v4099_v25 = vmul.f32 -1.442695, %v2455_v43  ;;  %v1818_v59 = vadd.f32 %v1690_v20, %v1045_v52  ;;  %4525 = vmatprep.mubr.msk.f32.mxu1 %vm1965_vm0, %v1945_v51  ;;  %v1275_v24 = vpop.permute.xlu1 %1274  ;;  %v4365_v35 = vpop.f32.mrf.mxu0 }
 0x257   :  { %v1882_v54 = vmax.f32 %v1754_v41, 0.0  ;;  %v4098_v3 = vmul.f32 -1.442695, %v2450_v23  ;;  %v1627_v15 = vmul.f32 %v6612_v49, %v1275_v24  ;;  %v2465_v27 = vadd.f32 %v4365_v35, %v6844_v8  ;;  %v1531_v46 = vpop.permute.xlu0 %1530 }
 0x258   :  { %v4552_v18 = vpop.eup %4551  ;;  %4563 = vpow2.f32 %v4099_v25  ;;  %v1946_v32 = vmax.f32 %v1818_v59, 0.0  ;;  %v1691_v2 = vmul.f32 %v6612_v49, %v1531_v46  ;;  %v2459_v52 = vpop.f32.mrf.mxu0 }
 0x259   :  { %v3443_v31 = vadd.f32 1.0, %v4552_v18  ;;  %4565 = vpow2.f32 %v4098_v3  ;;  %v1755_v4 = vadd.f32 %v1627_v15, %v6821_v12  ;;  %v4101_v36 = vmul.f32 -1.442695, %v2465_v27  ;;  %4430 = vmatmul.mubr.msk.f32.gmra.mxu0 %vm1965_vm0, %v1882_v54 }
 0x25a   :  { %v4554_v1 = vpop.eup %4553  ;;  %v1819_v5 = vadd.f32 %v1691_v2, %v1046_v62  ;;  %v2460_v58 = vadd.f32 %v6844_v8, %v2459_v52  ;;  %4526 = vmatmul.mubr.msk.f32.gmra.mxu1 %vm1965_vm0, %v1946_v32  ;;  %v1279_v11 = vpop.permute.xlu1 %1278 }
 0x25b   :  { %v4368_v16 = vpop.f32.mrf.mxu0  ;;  %4567 = vrcp.f32 %v3443_v31  ;;  %v3442_v12 = vadd.f32 1.0, %v4554_v1  ;;  %v1883_v42 = vmax.f32 %v1755_v4, 0.0  ;;  %v1628_v34 = vmul.f32 %v6612_v49, %v1279_v11  ;;  %v1535_v50 = vpop.permute.xlu0 %1534 }
 0x25c   :  { %4569 = vpow2.f32 %v4101_v36  ;;  %v1947_v10 = vmax.f32 %v1819_v5, 0.0  ;;  %v4100_v63 = vmul.f32 -1.442695, %v2460_v58  ;;  %v2475_v33 = vadd.f32 %v4368_v16, %v6844_v8 }
 0x25d   :  { %v2469_v48 = vpop.f32.mrf.mxu0  ;;  %v4556_v60 = vpop.eup %4555  ;;  %4571 = vrcp.f32 %v3442_v12  ;;  %v1756_v62 = vadd.f32 %v1628_v34, %v6808_v19  ;;  %v1692_v38 = vmul.f32 %v6612_v49, %v1535_v50  ;;  %4432 = vmatprep.mubr.msk.f32.mxu0 %vm1965_vm0, %v1883_v42 }
 0x25e   :  { %v2470_v61 = vadd.f32 %v6844_v8, %v2469_v48  ;;  %v4558_v45 = vpop.eup %4557  ;;  %v3445_v37 = vadd.f32 1.0, %v4556_v60  ;;  %4573 = vpow2.f32 %v4100_v63  ;;  %v4103_v13 = vmul.f32 -1.442695, %v2475_v33  ;;  %4528 = vmatprep.mubr.msk.f32.mxu1 %vm1965_vm0, %v1947_v10  ;;  %v1283_v51 = vpop.permute.xlu1 %1282 }
 0x25f   :  { %v4371_v43 = vpop.f32.mrf.mxu0  ;;  %v3444_v20 = vadd.f32 1.0, %v4558_v45  ;;  %v1884_v7 = vmax.f32 %v1756_v62, 0.0  ;;  %v1820_v19 = vadd.f32 %v1692_v38, %v6892_v26  ;;  %v1539_v23 = vpop.permute.xlu0 %1538  ;;  %v1629_v59 = vmul.f32 %v6612_v49, %v1283_v51 }
 0x260   :  { %v4102_v41 = vmul.f32 -1.442695, %v2470_v61  ;;  %v4560_v25 = vpop.eup %4559  ;;  %4575 = vrcp.f32 %v3445_v37  ;;  %v2485_v24 = vadd.f32 %v4371_v43, %v6844_v8  ;;  %v1693_v35 = vmul.f32 %v6612_v49, %v1539_v23 }
 0x261   :  { %v2479_v54 = vpop.f32.mrf.mxu0  ;;  %4577 = vrcp.f32 %v3444_v20  ;;  %v3447_v3 = vadd.f32 1.0, %v4560_v25  ;;  %v1948_v15 = vmax.f32 %v1820_v19, 0.0  ;;  %4433 = vmatmul.mubr.msk.f32.gmra.mxu0 %vm1965_vm0, %v1884_v7  ;;  %v1757_v26 = vadd.f32 %v1629_v59, %v6834_v40 }
 0x262   :  { %v2480_v27 = vadd.f32 %v6844_v8, %v2479_v54  ;;  %v4562_v46 = vpop.eup %4561  ;;  %4579 = vpow2.f32 %v4103_v13  ;;  %v4105_v18 = vmul.f32 -1.442695, %v2485_v24  ;;  %v1821_v32 = vadd.f32 %v1693_v35, %v6923_v44  ;;  %v1287_v2 = vpop.permute.xlu1 %1286 }
 0x263   :  { %v4374_v52 = vpop.f32.mrf.mxu0  ;;  %4581 = vrcp.f32 %v3447_v3  ;;  %v3446_v31 = vadd.f32 1.0, %v4562_v46  ;;  %4529 = vmatmul.mubr.msk.f32.gmra.mxu1 %vm1965_vm0, %v1948_v15  ;;  %v1630_v36 = vmul.f32 %v6612_v49, %v1287_v2  ;;  %v1543_v1 = vpop.permute.xlu0 %1542  ;;  %v1885_v47 = vmax.f32 %v1757_v26, 0.0 }
 0x264   :  { %v4104_v4 = vmul.f32 -1.442695, %v2480_v27  ;;  %4583 = vpow2.f32 %v4102_v41  ;;  %v1949_v30 = vmax.f32 %v1821_v32, 0.0  ;;  %v2495_v53 = vadd.f32 %v4374_v52, %v6844_v8 }
 0x265   :  { %v2489_v5 = vpop.f32.mrf.mxu0  ;;  %v4564_v40 = vpop.eup %4563  ;;  %4585 = vrcp.f32 %v3446_v31  ;;  %v1758_v44 = vadd.f32 %v1630_v36, %v6831_v17  ;;  %v1694_v58 = vmul.f32 %v6612_v49, %v1543_v1  ;;  %4435 = vmatprep.mubr.msk.f32.mxu0 %vm1965_vm0, %v1885_v47  ;;  %v1052_v32 = vadd.f32 %v6603_v57, %v6941_v0  ;;  %v7009_v0 = vld [vmem:[%s7658_s1 + $0x1] ss:$0 sm:$0xff] }
 0x266   :  { %v2490_v11 = vadd.f32 %v6844_v8, %v2489_v5  ;;  %v4566_v16 = vpop.eup %4565  ;;  %v3449_v12 = vadd.f32 1.0, %v4564_v40  ;;  %4587 = vpow2.f32 %v4105_v18  ;;  %v4107_v42 = vmul.f32 -1.442695, %v2495_v53  ;;  %4531 = vmatprep.mubr.msk.f32.mxu1 %vm1965_vm0, %v1949_v30  ;;  %v1291_v34 = vpop.permute.xlu1 %1290 }
 0x267   :  { %v4377_v50 = vpop.f32.mrf.mxu0  ;;  %v3448_v10 = vadd.f32 1.0, %v4566_v16  ;;  %4589 = vpow2.f32 %v4104_v4  ;;  %v1886_v63 = vmax.f32 %v1758_v44, 0.0  ;;  %v1822_v17 = vadd.f32 %v1694_v58, %v6917_v22  ;;  %v1547_v33 = vpop.permute.xlu0 %1546 }
 0x268   :  { %v4568_v48 = vpop.eup %4567  ;;  %4591 = vrcp.f32 %v3449_v12  ;;  %v4106_v60 = vmul.f32 -1.442695, %v2490_v11  ;;  %v1631_v62 = vmul.f32 %v6612_v49, %v1291_v34  ;;  %v2505_v38 = vadd.f32 %v4377_v50, %v6844_v8  ;;  %v7942_v34 = vld [vmem:[#allocation44_spill] sm:$0xff] }
 0x269   :  { %v2499_v61 = vpop.f32.mrf.mxu0  ;;  %v4570_v45 = vpop.eup %4569  ;;  %3828 = vst.msk [vmem:[%s7661_s5 + $0x8] sm:$0xff] %vm3826_vm1, %v4568_v48  ;;  %4593 = vrcp.f32 %v3448_v10  ;;  %v1950_v37 = vmax.f32 %v1822_v17, 0.0  ;;  %v1695_v13 = vmul.f32 %v6612_v49, %v1547_v33  ;;  %4436 = vmatmul.mubr.msk.f32.gmra.mxu0 %vm1965_vm0, %v1886_v63 }
 0x26a   :  { %v2500_v22 = vadd.f32 %v6844_v8, %v2499_v61  ;;  %v4572_v51 = vpop.eup %4571  ;;  %v3451_v43 = vadd.f32 1.0, %v4570_v45  ;;  %4595 = vpow2.f32 %v4107_v42  ;;  %v1759_v20 = vadd.f32 %v1631_v62, %v6847_v14  ;;  %v1295_v19 = vpop.permute.xlu1 %1294  ;;  %v5104_v42 = vld [vmem:[%s7658_s1] ss:$0 sm:$0xff] }
 0x26b   :  { %v4109_v7 = vmul.f32 -1.442695, %v2505_v38  ;;  %v4380_v41 = vpop.f32.mrf.mxu0  ;;  %v4574_v23 = vpop.eup %4573  ;;  %3827 = vst.msk [vmem:[%s7661_s5] sm:$0xff] %vm3826_vm1, %v4572_v51  ;;  %4597 = vpow2.f32 %v4106_v60  ;;  %v1823_v25 = vadd.f32 %v1695_v13, %v6932_v55  ;;  %4532 = vmatmul.mubr.msk.f32.gmra.mxu1 %vm1965_vm0, %v1950_v37  ;;  %v1632_v24 = vmul.f32 %v6612_v49, %v1295_v19 }
 0x26c   :  { %v4108_v59 = vmul.f32 -1.442695, %v2500_v22  ;;  %v1551_v35 = vpop.permute.xlu0 %1550  ;;  %4599 = vrcp.f32 %v3451_v43  ;;  %v3450_v14 = vadd.f32 1.0, %v4574_v23  ;;  %v1887_v54 = vmax.f32 %v1759_v20, 0.0  ;;  %v7943_v22 = vld [vmem:[#allocation2_spill] sm:$0xff] }
 0x26d   :  { %v2515_v3 = vadd.f32 %v4380_v41, %v6844_v8  ;;  %v2509_v15 = vpop.f32.mrf.mxu0  ;;  %v4576_v27 = vpop.eup %4575  ;;  %4601 = vpow2.f32 %v4109_v7  ;;  %v1951_v46 = vmax.f32 %v1823_v25, 0.0  ;;  %v1760_v26 = vadd.f32 %v1632_v24, %v6837_v9 }
 0x26e   :  { %v1696_v18 = vmul.f32 %v6612_v49, %v1551_v35  ;;  %v4578_v55 = vpop.eup %4577  ;;  %3830 = vst.msk [vmem:[%s7661_s5 + $0x18] sm:$0xff] %vm3826_vm1, %v4576_v27  ;;  %4603 = vrcp.f32 %v3450_v14  ;;  %v2510_v52 = vadd.f32 %v6844_v8, %v2509_v15  ;;  %4438 = vmatprep.mubr.msk.f32.mxu0 %vm1965_vm0, %v1887_v54  ;;  %v1299_v31 = vpop.permute.xlu1 %1298  ;;  %v919_v50 = vmul.f32 %v5104_v42, %v7942_v34  ;;  %v5105_v35 = vld [vmem:[%s7659_s2] ss:$0 sm:$0xff] }
 0x26f   :  { %v4111_v2 = vmul.f32 -1.442695, %v2515_v3  ;;  %v4383_v4 = vpop.f32.mrf.mxu0  ;;  %v4580_v9 = vpop.eup %4579  ;;  %3829 = vst.msk [vmem:[%s7661_s5 + $0x10] sm:$0xff] %vm3826_vm1, %v4578_v55  ;;  %4605 = vpow2.f32 %v4108_v59  ;;  %v1888_v57 = vmax.f32 %v1760_v26, 0.0  ;;  %4534 = vmatprep.mubr.msk.f32.mxu1 %vm1965_vm0, %v1951_v46  ;;  %v1633_v36 = vmul.f32 %v7009_v0, %v1299_v31 }
 0x270   :  { %v1824_v49 = vadd.f32 %v1696_v18, %v6926_v29  ;;  %v1555_v1 = vpop.permute.xlu0 %1554  ;;  %v4582_v47 = vpop.eup %4581  ;;  %v3453_v30 = vadd.f32 1.0, %v4580_v9  ;;  %v4110_v53 = vmul.f32 -1.442695, %v2510_v52  ;;  %v2525_v5 = vadd.f32 %v4383_v4, %v6844_v8 }
 0x271   :  { %4607 = vpow2.f32 %v4111_v2  ;;  %v2519_v40 = vpop.f32.mrf.mxu0  ;;  %v4584_v44 = vpop.eup %4583  ;;  %3832 = vst.msk [vmem:[%s7661_s5 + $0x28] sm:$0xff] %vm3826_vm1, %v4582_v47  ;;  %v1761_v58 = vadd.f32 %v1633_v36, %v6855_v21  ;;  %v1697_v11 = vmul.f32 %v7009_v0, %v1555_v1  ;;  %4439 = vmatmul.mubr.msk.f32.gmra.mxu0 %vm1965_vm0, %v1888_v57  ;;  %v920_v51 = vmul.f32 %v5104_v42, %v7943_v22 }
 0x272   :  { %v1952_v29 = vmax.f32 %v1824_v49, 0.0  ;;  %v2520_v16 = vadd.f32 %v6844_v8, %v2519_v40  ;;  %v4586_v12 = vpop.eup %4585  ;;  %4609 = vrcp.f32 %v3453_v30  ;;  %v3452_v10 = vadd.f32 1.0, %v4584_v44  ;;  %v1303_v17 = vpop.permute.xlu1 %1302 }
 0x273   :  { %v4113_v63 = vmul.f32 -1.442695, %v2525_v5  ;;  %v4588_v33 = vpop.eup %4587  ;;  %3831 = vst.msk [vmem:[%s7661_s5 + $0x20] sm:$0xff] %vm3826_vm1, %v4586_v12  ;;  %4611 = vpow2.f32 %v4110_v53  ;;  %v1889_v21 = vmax.f32 %v1761_v58, 0.0  ;;  %v1825_v48 = vadd.f32 %v1697_v11, %v1052_v32 }
 0x274   :  { %v4112_v60 = vmul.f32 -1.442695, %v2520_v16  ;;  %4535 = vmatmul.mubr.msk.f32.gmra.mxu1 %vm1965_vm0, %v1952_v29  ;;  %v1559_v62 = vpop.permute.xlu0 %1558  ;;  %v4590_v38 = vpop.eup %4589  ;;  %4613 = vrcp.f32 %v3452_v10  ;;  %v3455_v61 = vadd.f32 1.0, %v4588_v33  ;;  %v1634_v45 = vmul.f32 %v7009_v0, %v1303_v17 }
 0x275   :  { %v1698_v37 = vmul.f32 %v7009_v0, %v1559_v62  ;;  %v4592_v13 = vpop.eup %4591  ;;  %v3454_v43 = vadd.f32 1.0, %v4590_v38  ;;  %4615 = vpow2.f32 %v4113_v63  ;;  %v1953_v20 = vmax.f32 %v1825_v48, 0.0  ;;  %4441 = vmatprep.mubr.msk.f32.mxu0 %vm1965_vm0, %v1889_v21  ;;  %v4449_v7 = vpop.f32.mrf.mxu1 }
 0x276   :  { %v4594_v19 = vpop.eup %4593  ;;  %3834 = vst.msk [vmem:[%s7661_s5 + $0x38] sm:$0xff] %vm3826_vm1, %v4592_v13  ;;  %4617 = vrcp.f32 %v3455_v61  ;;  %v1762_v41 = vadd.f32 %v1634_v45, %v6852_v56  ;;  %v2745_v25 = vadd.f32 %v4449_v7, %v6844_v8  ;;  %v1307_v59 = vpop.permute.xlu1 %1306  ;;  %v990_v14 = vadd.f32 %v5105_v35, %v6865_v28 }
 0x277   :  { %v1826_v23 = vadd.f32 %v1698_v37, %v6952_v6  ;;  %v4596_v24 = vpop.eup %4595  ;;  %v1054_v54 = vadd.f32 %v5105_v35, %v919_v50  ;;  %3833 = vst.msk [vmem:[%s7661_s5 + $0x30] sm:$0xff] %vm3826_vm1, %v4594_v19  ;;  %4619 = vrcp.f32 %v3454_v43  ;;  %4537 = vmatprep.mubr.msk.f32.mxu1 %vm1965_vm0, %v1953_v20  ;;  %v1635_v56 = vmul.f32 %v7009_v0, %v1307_v59  ;;  %v2739_v3 = vpop.f32.mrf.mxu1 }
 0x278   :  { %v1563_v6 = vpop.permute.xlu0 %1562  ;;  %v4598_v15 = vpop.eup %4597  ;;  %v3457_v27 = vadd.f32 1.0, %v4596_v24  ;;  %4621 = vpow2.f32 %v4112_v60  ;;  %v1890_v46 = vmax.f32 %v1762_v41, 0.0  ;;  %v4157_v55 = vmul.f32 -1.442695, %v2745_v25 }
 0x279   :  { %v1954_v26 = vmax.f32 %v1826_v23, 0.0  ;;  %v4600_v18 = vpop.eup %4599  ;;  %v3456_v28 = vadd.f32 1.0, %v4598_v15  ;;  %v1763_v32 = vadd.f32 %v1635_v56, %v990_v14  ;;  %v1699_v2 = vmul.f32 %v7009_v0, %v1563_v6  ;;  %v4452_v52 = vpop.f32.mrf.mxu1 }
 0x27a   :  { %v4602_v31 = vpop.eup %4601  ;;  %v1055_v4 = vadd.f32 %v5105_v35, %v920_v51  ;;  %3836 = vst.msk [vmem:[%s7661_s5 + $0x48] sm:$0xff] %vm3826_vm1, %v4600_v18  ;;  %4623 = vrcp.f32 %v3457_v27  ;;  %v2740_v9 = vadd.f32 %v6844_v8, %v2739_v3  ;;  %4442 = vmatmul.mubr.msk.f32.gmra.mxu0 %vm1965_vm0, %v1890_v46  ;;  %v2755_v57 = vadd.f32 %v4452_v52, %v6844_v8  ;;  %v1311_v49 = vpop.permute.xlu1 %1310 }
 0x27b   :  { %4538 = vmatmul.mubr.msk.f32.gmra.mxu1 %vm1965_vm0, %v1954_v26  ;;  %v4604_v36 = vpop.eup %4603  ;;  %4625 = vrcp.f32 %v3456_v28  ;;  %v3459_v1 = vadd.f32 1.0, %v4602_v31  ;;  %v1891_v47 = vmax.f32 %v1763_v32, 0.0  ;;  %v1827_v30 = vadd.f32 %v1699_v2, %v1054_v54  ;;  %v2749_v5 = vpop.f32.mrf.mxu1 }
 0x27c   :  { %v1567_v53 = vpop.permute.xlu0 %1566  ;;  %v4606_v40 = vpop.eup %4605  ;;  %3835 = vst.msk [vmem:[%s7661_s5 + $0x40] sm:$0xff] %vm3826_vm1, %v4604_v36  ;;  %4627 = vpow2.f32 %v4157_v55  ;;  %v4156_v44 = vmul.f32 -1.442695, %v2740_v9  ;;  %v4159_v29 = vmul.f32 -1.442695, %v2755_v57  ;;  %v1636_v58 = vmul.f32 %v7009_v0, %v1311_v49 }
 0x27d   :  { %4629 = vrcp.f32 %v3459_v1  ;;  %v3458_v16 = vadd.f32 1.0, %v4606_v40  ;;  %v1955_v12 = vmax.f32 %v1827_v30, 0.0  ;;  %v1700_v42 = vmul.f32 %v7009_v0, %v1567_v53  ;;  %4444 = vmatprep.mubr.msk.f32.mxu0 %vm1965_vm0, %v1891_v47  ;;  %v4455_v34 = vpop.f32.mrf.mxu1 }
 0x27e   :  { %v4608_v11 = vpop.eup %4607  ;;  %4631 = vpow2.f32 %v4156_v44  ;;  %v1764_v10 = vadd.f32 %v1636_v58, %v6878_v39  ;;  %v2750_v63 = vadd.f32 %v6844_v8, %v2749_v5  ;;  %v2765_v21 = vadd.f32 %v4455_v34, %v6844_v8 }
 0x27f   :  { %v3461_v50 = vadd.f32 1.0, %v4608_v11  ;;  %v4610_v17 = vpop.eup %4609  ;;  %4633 = vrcp.f32 %v3458_v16  ;;  %v1828_v33 = vadd.f32 %v1700_v42, %v1055_v4  ;;  %4540 = vmatprep.mubr.msk.f32.mxu1 %vm1965_vm0, %v1955_v12  ;;  %v2759_v48 = vpop.f32.mrf.mxu1 }
 0x280   :  { %v4612_v60 = vpop.eup %4611  ;;  %3838 = vst.msk [vmem:[%s7661_s5 + $0x58] sm:$0xff] %vm3826_vm1, %v4610_v17  ;;  %v1892_v0 = vmax.f32 %v1764_v10, 0.0  ;;  %v4158_v62 = vmul.f32 -1.442695, %v2750_v63  ;;  %v2760_v39 = vadd.f32 %v6844_v8, %v2759_v48  ;;  %v4161_v37 = vmul.f32 -1.442695, %v2765_v21 }
 0x281   :  { %4635 = vrcp.f32 %v3461_v50  ;;  %v4614_v38 = vpop.eup %4613  ;;  %v3460_v61 = vadd.f32 1.0, %v4612_v60  ;;  %v1956_v45 = vmax.f32 %v1828_v33, 0.0  ;;  %v4458_v13 = vpop.f32.mrf.mxu1 }
 0x282   :  { %4637 = vpow2.f32 %v4159_v29  ;;  %v4616_v22 = vpop.eup %4615  ;;  %3837 = vst.msk [vmem:[%s7661_s5 + $0x50] sm:$0xff] %vm3826_vm1, %v4614_v38  ;;  %v4160_v51 = vmul.f32 -1.442695, %v2760_v39  ;;  %4445 = vmatmul.mubr.msk.f32.gmra.mxu0 %vm1965_vm0, %v1892_v0  ;;  %v2775_v43 = vadd.f32 %v4458_v13, %v6844_v8 }
 0x283   :  { %4639 = vpow2.f32 %v4158_v62  ;;  %v4618_v20 = vpop.eup %4617  ;;  %v3463_v7 = vadd.f32 1.0, %v4616_v22  ;;  %4541 = vmatmul.mubr.msk.f32.gmra.mxu1 %vm1965_vm0, %v1956_v45  ;;  %v2769_v19 = vpop.f32.mrf.mxu1 }
 0x284   :  { %4641 = vrcp.f32 %v3460_v61  ;;  %v4620_v41 = vpop.eup %4619  ;;  %3840 = vst.msk [vmem:[%s7661_s5 + $0x68] sm:$0xff] %vm3826_vm1, %v4618_v20  ;;  %v4163_v23 = vmul.f32 -1.442695, %v2775_v43  ;;  %v2770_v25 = vadd.f32 %v6844_v8, %v2769_v19 }
 0x285   :  { %4643 = vpow2.f32 %v4161_v37  ;;  %v4622_v59 = vpop.eup %4621  ;;  %3839 = vst.msk [vmem:[%s7661_s5 + $0x60] sm:$0xff] %vm3826_vm1, %v4620_v41  ;;  %v4461_v24 = vpop.f32.mrf.mxu1 }
 0x286   :  { %4645 = vrcp.f32 %v3463_v7  ;;  %v3462_v35 = vadd.f32 1.0, %v4622_v59  ;;  %v4162_v14 = vmul.f32 -1.442695, %v2770_v25  ;;  %v2785_v54 = vadd.f32 %v4461_v24, %v6844_v8 }
 0x287   :  { %4647 = vpow2.f32 %v4160_v51  ;;  %v4624_v56 = vpop.eup %4623  ;;  %v2779_v6 = vpop.f32.mrf.mxu1 }
 0x288   :  { %4649 = vpow2.f32 %v4163_v23  ;;  %v4626_v3 = vpop.eup %4625  ;;  %3842 = vst.msk [vmem:[%s7661_s5 + $0x78] sm:$0xff] %vm3826_vm1, %v4624_v56  ;;  %v4165_v15 = vmul.f32 -1.442695, %v2785_v54  ;;  %v2780_v27 = vadd.f32 %v6844_v8, %v2779_v6 }
 0x289   :  { %4651 = vrcp.f32 %v3462_v35  ;;  %v4628_v46 = vpop.eup %4627  ;;  %3841 = vst.msk [vmem:[%s7661_s5 + $0x70] sm:$0xff] %vm3826_vm1, %v4626_v3  ;;  %v4464_v26 = vpop.f32.mrf.mxu1 }
 0x28a   :  { %4653 = vpow2.f32 %v4162_v14  ;;  %v4630_v18 = vpop.eup %4629  ;;  %v3507_v28 = vadd.f32 1.0, %v4628_v46  ;;  %v4164_v55 = vmul.f32 -1.442695, %v2780_v27  ;;  %v2795_v32 = vadd.f32 %v4464_v26, %v6844_v8 }
 0x28b   :  { %4655 = vpow2.f32 %v4165_v15  ;;  %v4632_v2 = vpop.eup %4631  ;;  %3844 = vst.msk [vmem:[%s7661_s5 + $0x88] sm:$0xff] %vm3826_vm1, %v4630_v18  ;;  %v2789_v52 = vpop.f32.mrf.mxu1 }
 0x28c   :  { %v4634_v31 = vpop.eup %4633  ;;  %4657 = vrcp.f32 %v3507_v28  ;;  %v3506_v4 = vadd.f32 1.0, %v4632_v2  ;;  %v4167_v9 = vmul.f32 -1.442695, %v2795_v32  ;;  %v2790_v57 = vadd.f32 %v6844_v8, %v2789_v52 }
 0x28d   :  { %3843 = vst.msk [vmem:[%s7661_s5 + $0x80] sm:$0xff] %vm3826_vm1, %v4634_v31  ;;  %4659 = vpow2.f32 %v4164_v55  ;;  %v4467_v36 = vpop.f32.mrf.mxu1 }
 0x28e   :  { %v4636_v49 = vpop.eup %4635  ;;  %4661 = vrcp.f32 %v3506_v4  ;;  %v4166_v47 = vmul.f32 -1.442695, %v2790_v57  ;;  %v2805_v30 = vadd.f32 %v4467_v36, %v6844_v8 }
 0x28f   :  { %v4638_v1 = vpop.eup %4637  ;;  %3846 = vst.msk [vmem:[%s7661_s5 + $0x98] sm:$0xff] %vm3826_vm1, %v4636_v49  ;;  %4663 = vpow2.f32 %v4167_v9  ;;  %v2799_v40 = vpop.f32.mrf.mxu1 }
 0x290   :  { %v4640_v53 = vpop.eup %4639  ;;  %v3509_v5 = vadd.f32 1.0, %v4638_v1  ;;  %4665 = vpow2.f32 %v4166_v47  ;;  %v4169_v58 = vmul.f32 -1.442695, %v2805_v30  ;;  %v2800_v11 = vadd.f32 %v6844_v8, %v2799_v40  ;;  %v7161_v1 = vld [vmem:[%s7660_s4] ss:$0 sm:$0xff] }
 0x291   :  { %v4642_v44 = vpop.eup %4641  ;;  %v3508_v29 = vadd.f32 1.0, %v4640_v53  ;;  %v4470_v12 = vpop.f32.mrf.mxu1 }
 0x292   :  { %v4644_v16 = vpop.eup %4643  ;;  %3845 = vst.msk [vmem:[%s7661_s5 + $0x90] sm:$0xff] %vm3826_vm1, %v4642_v44  ;;  %4667 = vrcp.f32 %v3509_v5  ;;  %v4168_v50 = vmul.f32 -1.442695, %v2800_v11  ;;  %v2815_v10 = vadd.f32 %v4470_v12, %v6844_v8 }
 0x293   :  { %v4646_v42 = vpop.eup %4645  ;;  %4669 = vrcp.f32 %v3508_v29  ;;  %v3511_v34 = vadd.f32 1.0, %v4644_v16  ;;  %v2809_v17 = vpop.f32.mrf.mxu1 }
 0x294   :  { %v4648_v63 = vpop.eup %4647  ;;  %3848 = vst.msk [vmem:[%s7661_s5 + $0xa8] sm:$0xff] %vm3826_vm1, %v4646_v42  ;;  %4671 = vpow2.f32 %v4169_v58  ;;  %v4171_v48 = vmul.f32 -1.442695, %v2815_v10  ;;  %v2810_v60 = vadd.f32 %v6844_v8, %v2809_v17 }
 0x295   :  { %v4650_v33 = vpop.eup %4649  ;;  %4673 = vrcp.f32 %v3511_v34  ;;  %v3510_v21 = vadd.f32 1.0, %v4648_v63  ;;  %v4473_v39 = vpop.f32.mrf.mxu1 }
 0x296   :  { %v4652_v0 = vpop.eup %4651  ;;  %v3513_v62 = vadd.f32 1.0, %v4650_v33  ;;  %4675 = vpow2.f32 %v4168_v50  ;;  %v2825_v61 = vadd.f32 %v4473_v39, %v6844_v8  ;;  %v4170_v13 = vmul.f32 -1.442695, %v2810_v60 }
 0x297   :  { %v4654_v38 = vpop.eup %4653  ;;  %3847 = vst.msk [vmem:[%s7661_s5 + $0xa0] sm:$0xff] %vm3826_vm1, %v4652_v0  ;;  %4677 = vrcp.f32 %v3510_v21  ;;  %v2819_v22 = vpop.f32.mrf.mxu1 }
 0x298   :  { %v4656_v45 = vpop.eup %4655  ;;  %4679 = vrcp.f32 %v3513_v62  ;;  %v3512_v37 = vadd.f32 1.0, %v4654_v38  ;;  %v4173_v43 = vmul.f32 -1.442695, %v2825_v61  ;;  %v2820_v20 = vadd.f32 %v6844_v8, %v2819_v22 }
 0x299   :  { %v3515_v51 = vadd.f32 1.0, %v4656_v45  ;;  %4681 = vpow2.f32 %v4171_v48  ;;  %v4658_v7 = vpop.eup %4657  ;;  %v4476_v19 = vpop.f32.mrf.mxu1 }
 0x29a   :  { %4683 = vrcp.f32 %v3512_v37  ;;  %v4660_v41 = vpop.eup %4659  ;;  %3892 = vst.msk [vmem:[%s7661_s5 + $0x208] sm:$0xff] %vm3826_vm1, %v4658_v7  ;;  %v4172_v23 = vmul.f32 -1.442695, %v2820_v20  ;;  %v2835_v25 = vadd.f32 %v4476_v19, %v6844_v8 }
 0x29b   :  { %4685 = vrcp.f32 %v3515_v51  ;;  %v4662_v59 = vpop.eup %4661  ;;  %v3514_v24 = vadd.f32 1.0, %v4660_v41  ;;  %v2829_v35 = vpop.f32.mrf.mxu1 }
 0x29c   :  { %4687 = vpow2.f32 %v4170_v13  ;;  %v4664_v14 = vpop.eup %4663  ;;  %3891 = vst.msk [vmem:[%s7661_s5 + $0x200] sm:$0xff] %vm3826_vm1, %v4662_v59  ;;  %v2830_v54 = vadd.f32 %v6844_v8, %v2829_v35  ;;  %v4175_v3 = vmul.f32 -1.442695, %v2835_v25 }
 0x29d   :  { %4689 = vpow2.f32 %v4173_v43  ;;  %v4666_v56 = vpop.eup %4665  ;;  %v3517_v6 = vadd.f32 1.0, %v4664_v14  ;;  %v4479_v15 = vpop.f32.mrf.mxu1 }
 0x29e   :  { %4691 = vrcp.f32 %v3514_v24  ;;  %v3516_v46 = vadd.f32 1.0, %v4666_v56  ;;  %v4174_v26 = vmul.f32 -1.442695, %v2830_v54  ;;  %v2845_v18 = vadd.f32 %v4479_v15, %v6844_v8 }
 0x29f   :  { %v4668_v27 = vpop.eup %4667  ;;  %4693 = vpow2.f32 %v4172_v23  ;;  %v2839_v55 = vpop.f32.mrf.mxu1 }
 0x2a0   :  { %v4670_v28 = vpop.eup %4669  ;;  %3894 = vst.msk [vmem:[%s7661_s5 + $0x218] sm:$0xff] %vm3826_vm1, %v4668_v27  ;;  %4695 = vrcp.f32 %v3517_v6  ;;  %v4177_v2 = vmul.f32 -1.442695, %v2845_v18  ;;  %v2840_v52 = vadd.f32 %v6844_v8, %v2839_v55 }
 0x2a1   :  { %v4672_v32 = vpop.eup %4671  ;;  %3893 = vst.msk [vmem:[%s7661_s5 + $0x210] sm:$0xff] %vm3826_vm1, %v4670_v28  ;;  %4697 = vrcp.f32 %v3516_v46  ;;  %v4386_v9 = vpop.f32.mrf.mxu0 }
 0x2a2   :  { %v4674_v31 = vpop.eup %4673  ;;  %v3519_v4 = vadd.f32 1.0, %v4672_v32  ;;  %4699 = vpow2.f32 %v4175_v3  ;;  %v4482_v57 = vpop.f32.mrf.mxu1  ;;  %v4176_v36 = vmul.f32 -1.442695, %v2840_v52  ;;  %v2535_v8 = vadd.f32 %v7161_v1, %v4386_v9 }
 0x2a3   :  { %v4676_v49 = vpop.eup %4675  ;;  %3896 = vst.msk [vmem:[%s7661_s5 + $0x228] sm:$0xff] %vm3826_vm1, %v4674_v31  ;;  %4701 = vpow2.f32 %v4174_v26  ;;  %v2855_v47 = vadd.f32 %v7161_v1, %v4482_v57  ;;  %v2529_v5 = vpop.f32.mrf.mxu0 }
 0x2a4   :  { %v4678_v30 = vpop.eup %4677  ;;  %4703 = vrcp.f32 %v3519_v4  ;;  %v3518_v53 = vadd.f32 1.0, %v4676_v49  ;;  %v2849_v40 = vpop.f32.mrf.mxu1  ;;  %v4115_v29 = vmul.f32 -1.442695, %v2535_v8  ;;  %v2530_v58 = vadd.f32 %v7161_v1, %v2529_v5 }
 0x2a5   :  { %v4680_v44 = vpop.eup %4679  ;;  %3895 = vst.msk [vmem:[%s7661_s5 + $0x220] sm:$0xff] %vm3826_vm1, %v4678_v30  ;;  %4705 = vpow2.f32 %v4177_v2  ;;  %v4179_v16 = vmul.f32 -1.442695, %v2855_v47  ;;  %v2850_v12 = vadd.f32 %v7161_v1, %v2849_v40 }
 0x2a6   :  { %v4682_v11 = vpop.eup %4681  ;;  %3898 = vst.msk [vmem:[%s7661_s5 + $0x238] sm:$0xff] %vm3826_vm1, %v4680_v44  ;;  %4707 = vrcp.f32 %v3518_v53  ;;  %v4114_v50 = vmul.f32 -1.442695, %v2530_v58 }
 0x2a7   :  { %v4684_v42 = vpop.eup %4683  ;;  %v3521_v34 = vadd.f32 1.0, %v4682_v11  ;;  %4709 = vpow2.f32 %v4176_v36  ;;  %v4178_v21 = vmul.f32 -1.442695, %v2850_v12 }
 0x2a8   :  { %v4686_v10 = vpop.eup %4685  ;;  %3897 = vst.msk [vmem:[%s7661_s5 + $0x230] sm:$0xff] %vm3826_vm1, %v4684_v42  ;;  %4711 = vpow2.f32 %v4115_v29 }
 0x2a9   :  { %v4688_v63 = vpop.eup %4687  ;;  %3900 = vst.msk [vmem:[%s7661_s5 + $0x248] sm:$0xff] %vm3826_vm1, %v4686_v10  ;;  %4713 = vrcp.f32 %v3521_v34  ;;  %v4389_v48 = vpop.f32.mrf.mxu0 }
 0x2aa   :  { %v4690_v17 = vpop.eup %4689  ;;  %v3520_v33 = vadd.f32 1.0, %v4688_v63  ;;  %4715 = vpow2.f32 %v4179_v16  ;;  %v4485_v60 = vpop.f32.mrf.mxu1  ;;  %v2545_v39 = vadd.f32 %v7161_v1, %v4389_v48 }
 0x2ab   :  { %v4692_v0 = vpop.eup %4691  ;;  %v3523_v62 = vadd.f32 1.0, %v4690_v17  ;;  %4717 = vpow2.f32 %v4114_v50  ;;  %v2865_v38 = vadd.f32 %v7161_v1, %v4485_v60  ;;  %v2539_v45 = vpop.f32.mrf.mxu0 }
 0x2ac   :  { %v4694_v61 = vpop.eup %4693  ;;  %3899 = vst.msk [vmem:[%s7661_s5 + $0x240] sm:$0xff] %vm3826_vm1, %v4692_v0  ;;  %4719 = vrcp.f32 %v3520_v33  ;;  %v2859_v37 = vpop.f32.mrf.mxu1  ;;  %v4117_v51 = vmul.f32 -1.442695, %v2545_v39  ;;  %v2540_v7 = vadd.f32 %v7161_v1, %v2539_v45 }
 0x2ad   :  { %v4696_v13 = vpop.eup %4695  ;;  %4721 = vrcp.f32 %v3523_v62  ;;  %v3522_v22 = vadd.f32 1.0, %v4694_v61  ;;  %v4181_v43 = vmul.f32 -1.442695, %v2865_v38  ;;  %v2860_v19 = vadd.f32 %v7161_v1, %v2859_v37 }
 0x2ae   :  { %v4698_v20 = vpop.eup %4697  ;;  %3902 = vst.msk [vmem:[%s7661_s5 + $0x258] sm:$0xff] %vm3826_vm1, %v4696_v13  ;;  %4723 = vpow2.f32 %v4178_v21  ;;  %v4116_v59 = vmul.f32 -1.442695, %v2540_v7 }
 0x2af   :  { %v4700_v41 = vpop.eup %4699  ;;  %3901 = vst.msk [vmem:[%s7661_s5 + $0x250] sm:$0xff] %vm3826_vm1, %v4698_v20  ;;  %4725 = vrcp.f32 %v3522_v22  ;;  %v4180_v54 = vmul.f32 -1.442695, %v2860_v19 }
 0x2b0   :  { %v4702_v23 = vpop.eup %4701  ;;  %v3525_v25 = vadd.f32 1.0, %v4700_v41  ;;  %4727 = vpow2.f32 %v4117_v51 }
 0x2b1   :  { %v4704_v24 = vpop.eup %4703  ;;  %v3524_v35 = vadd.f32 1.0, %v4702_v23  ;;  %4729 = vpow2.f32 %v4181_v43  ;;  %v4392_v56 = vpop.f32.mrf.mxu0 }
 0x2b2   :  { %v4706_v14 = vpop.eup %4705  ;;  %3904 = vst.msk [vmem:[%s7661_s5 + $0x268] sm:$0xff] %vm3826_vm1, %v4704_v24  ;;  %4731 = vrcp.f32 %v3525_v25  ;;  %v4488_v6 = vpop.f32.mrf.mxu1  ;;  %v2555_v27 = vadd.f32 %v7161_v1, %v4392_v56 }
 0x2b3   :  { %v4708_v3 = vpop.eup %4707  ;;  %4733 = vrcp.f32 %v3524_v35  ;;  %v3527_v15 = vadd.f32 1.0, %v4706_v14  ;;  %v2875_v26 = vadd.f32 %v7161_v1, %v4488_v6  ;;  %v2549_v18 = vpop.f32.mrf.mxu0 }
 0x2b4   :  { %v4710_v46 = vpop.eup %4709  ;;  %3903 = vst.msk [vmem:[%s7661_s5 + $0x260] sm:$0xff] %vm3826_vm1, %v4708_v3  ;;  %4735 = vpow2.f32 %v4116_v59  ;;  %v2869_v28 = vpop.f32.mrf.mxu1  ;;  %v4119_v2 = vmul.f32 -1.442695, %v2555_v27  ;;  %v2550_v4 = vadd.f32 %v7161_v1, %v2549_v18 }
 0x2b5   :  { %v4712_v55 = vpop.eup %4711  ;;  %4737 = vrcp.f32 %v3527_v15  ;;  %v3526_v32 = vadd.f32 1.0, %v4710_v46  ;;  %v2870_v57 = vadd.f32 %v7161_v1, %v2869_v28  ;;  %v4183_v8 = vmul.f32 -1.442695, %v2875_v26 }
 0x2b6   :  { %v4714_v52 = vpop.eup %4713  ;;  %v3465_v31 = vadd.f32 1.0, %v4712_v55  ;;  %4739 = vpow2.f32 %v4180_v54  ;;  %v4118_v53 = vmul.f32 -1.442695, %v2550_v4 }
 0x2b7   :  { %v4716_v9 = vpop.eup %4715  ;;  %3906 = vst.msk [vmem:[%s7661_s5 + $0x278] sm:$0xff] %vm3826_vm1, %v4714_v52  ;;  %4741 = vrcp.f32 %v3526_v32  ;;  %v4182_v58 = vmul.f32 -1.442695, %v2870_v57 }
 0x2b8   :  { %v4718_v49 = vpop.eup %4717  ;;  %4743 = vrcp.f32 %v3465_v31  ;;  %v3529_v36 = vadd.f32 1.0, %v4716_v9 }
 0x2b9   :  { %v4720_v47 = vpop.eup %4719  ;;  %v3464_v30 = vadd.f32 1.0, %v4718_v49  ;;  %4745 = vpow2.f32 %v4119_v2  ;;  %v4395_v40 = vpop.f32.mrf.mxu0 }
 0x2ba   :  { %v4722_v5 = vpop.eup %4721  ;;  %3905 = vst.msk [vmem:[%s7661_s5 + $0x270] sm:$0xff] %vm3826_vm1, %v4720_v47  ;;  %4747 = vrcp.f32 %v3529_v36  ;;  %v4491_v44 = vpop.f32.mrf.mxu1  ;;  %v2565_v11 = vadd.f32 %v7161_v1, %v4395_v40 }
 0x2bb   :  { %v4724_v29 = vpop.eup %4723  ;;  %3908 = vst.msk [vmem:[%s7661_s5 + $0x288] sm:$0xff] %vm3826_vm1, %v4722_v5  ;;  %4749 = vrcp.f32 %v3464_v30  ;;  %v2885_v16 = vadd.f32 %v7161_v1, %v4491_v44  ;;  %v2559_v34 = vpop.f32.mrf.mxu0 }
 0x2bc   :  { %v4726_v12 = vpop.eup %4725  ;;  %v3528_v42 = vadd.f32 1.0, %v4724_v29  ;;  %4751 = vpow2.f32 %v4183_v8  ;;  %v2879_v50 = vpop.f32.mrf.mxu1  ;;  %v2560_v63 = vadd.f32 %v7161_v1, %v2559_v34  ;;  %v4121_v21 = vmul.f32 -1.442695, %v2565_v11 }
 0x2bd   :  { %v4728_v10 = vpop.eup %4727  ;;  %3907 = vst.msk [vmem:[%s7661_s5 + $0x280] sm:$0xff] %vm3826_vm1, %v4726_v12  ;;  %4753 = vpow2.f32 %v4118_v53  ;;  %v4185_v0 = vmul.f32 -1.442695, %v2885_v16  ;;  %v2880_v62 = vadd.f32 %v7161_v1, %v2879_v50 }
 0x2be   :  { %v4730_v17 = vpop.eup %4729  ;;  %4755 = vrcp.f32 %v3528_v42  ;;  %v3467_v33 = vadd.f32 1.0, %v4728_v10  ;;  %v4120_v61 = vmul.f32 -1.442695, %v2560_v63 }
 0x2bf   :  { %v4732_v48 = vpop.eup %4731  ;;  %v3531_v60 = vadd.f32 1.0, %v4730_v17  ;;  %4757 = vpow2.f32 %v4182_v58  ;;  %v4184_v43 = vmul.f32 -1.442695, %v2880_v62 }
 0x2c0   :  { %v4734_v39 = vpop.eup %4733  ;;  %3910 = vst.msk [vmem:[%s7661_s5 + $0x298] sm:$0xff] %vm3826_vm1, %v4732_v48  ;;  %4759 = vrcp.f32 %v3467_v33 }
 0x2c1   :  { %v4736_v38 = vpop.eup %4735  ;;  %3909 = vst.msk [vmem:[%s7661_s5 + $0x290] sm:$0xff] %vm3826_vm1, %v4734_v39  ;;  %4761 = vrcp.f32 %v3531_v60  ;;  %v4398_v13 = vpop.f32.mrf.mxu0 }
 0x2c2   :  { %v4738_v45 = vpop.eup %4737  ;;  %v3466_v37 = vadd.f32 1.0, %v4736_v38  ;;  %4763 = vpow2.f32 %v4121_v21  ;;  %v4494_v22 = vpop.f32.mrf.mxu1  ;;  %v2575_v20 = vadd.f32 %v7161_v1, %v4398_v13 }
 0x2c3   :  { %v4740_v51 = vpop.eup %4739  ;;  %3912 = vst.msk [vmem:[%s7661_s5 + $0x2a8] sm:$0xff] %vm3826_vm1, %v4738_v45  ;;  %4765 = vpow2.f32 %v4185_v0  ;;  %v2895_v7 = vadd.f32 %v7161_v1, %v4494_v22  ;;  %v2569_v23 = vpop.f32.mrf.mxu0 }
 0x2c4   :  { %v4742_v19 = vpop.eup %4741  ;;  %4767 = vrcp.f32 %v3466_v37  ;;  %v3530_v41 = vadd.f32 1.0, %v4740_v51  ;;  %v2889_v25 = vpop.f32.mrf.mxu1  ;;  %v4123_v24 = vmul.f32 -1.442695, %v2575_v20  ;;  %v2570_v35 = vadd.f32 %v7161_v1, %v2569_v23 }
 0x2c5   :  { %v4744_v59 = vpop.eup %4743  ;;  %3911 = vst.msk [vmem:[%s7661_s5 + $0x2a0] sm:$0xff] %vm3826_vm1, %v4742_v19  ;;  %4769 = vpow2.f32 %v4120_v61  ;;  %v4187_v54 = vmul.f32 -1.442695, %v2895_v7  ;;  %v2890_v56 = vadd.f32 %v7161_v1, %v2889_v25 }
 0x2c6   :  { %v4746_v14 = vpop.eup %4745  ;;  %3850 = vst.msk [vmem:[%s7661_s5 + $0xb8] sm:$0xff] %vm3826_vm1, %v4744_v59  ;;  %4771 = vrcp.f32 %v3530_v41  ;;  %v4122_v15 = vmul.f32 -1.442695, %v2570_v35 }
 0x2c7   :  { %v4748_v6 = vpop.eup %4747  ;;  %v3469_v3 = vadd.f32 1.0, %v4746_v14  ;;  %4773 = vpow2.f32 %v4184_v43  ;;  %v4186_v28 = vmul.f32 -1.442695, %v2890_v56 }
 0x2c8   :  { %v4750_v27 = vpop.eup %4749  ;;  %3914 = vst.msk [vmem:[%s7661_s5 + $0x2b8] sm:$0xff] %vm3826_vm1, %v4748_v6  ;;  %4775 = vpow2.f32 %v4123_v24 }
 0x2c9   :  { %v4752_v46 = vpop.eup %4751  ;;  %3849 = vst.msk [vmem:[%s7661_s5 + $0xb0] sm:$0xff] %vm3826_vm1, %v4750_v27  ;;  %4777 = vrcp.f32 %v3469_v3  ;;  %v4401_v55 = vpop.f32.mrf.mxu0 }
 0x2ca   :  { %v4754_v26 = vpop.eup %4753  ;;  %v3533_v18 = vadd.f32 1.0, %v4752_v46  ;;  %4779 = vpow2.f32 %v4187_v54  ;;  %v4497_v32 = vpop.f32.mrf.mxu1  ;;  %v2585_v31 = vadd.f32 %v7161_v1, %v4401_v55 }
 0x2cb   :  { %v4756_v2 = vpop.eup %4755  ;;  %v3468_v52 = vadd.f32 1.0, %v4754_v26  ;;  %4781 = vpow2.f32 %v4122_v15  ;;  %v2905_v4 = vadd.f32 %v7161_v1, %v4497_v32  ;;  %v2579_v57 = vpop.f32.mrf.mxu0 }
 0x2cc   :  { %v4758_v9 = vpop.eup %4757  ;;  %3913 = vst.msk [vmem:[%s7661_s5 + $0x2b0] sm:$0xff] %vm3826_vm1, %v4756_v2  ;;  %4783 = vrcp.f32 %v3533_v18  ;;  %v2899_v49 = vpop.f32.mrf.mxu1  ;;  %v4125_v47 = vmul.f32 -1.442695, %v2585_v31  ;;  %v2580_v5 = vadd.f32 %v7161_v1, %v2579_v57 }
 0x2cd   :  { %v4760_v36 = vpop.eup %4759  ;;  %4785 = vrcp.f32 %v3468_v52  ;;  %v3532_v8 = vadd.f32 1.0, %v4758_v9  ;;  %v4189_v30 = vmul.f32 -1.442695, %v2905_v4  ;;  %v2900_v40 = vadd.f32 %v7161_v1, %v2899_v49 }
 0x2ce   :  { %v4762_v53 = vpop.eup %4761  ;;  %3852 = vst.msk [vmem:[%s7661_s5 + $0xc8] sm:$0xff] %vm3826_vm1, %v4760_v36  ;;  %4787 = vpow2.f32 %v4186_v28  ;;  %v4124_v11 = vmul.f32 -1.442695, %v2580_v5 }
 0x2cf   :  { %v4764_v44 = vpop.eup %4763  ;;  %3916 = vst.msk [vmem:[%s7661_s5 + $0x2c8] sm:$0xff] %vm3826_vm1, %v4762_v53  ;;  %4789 = vrcp.f32 %v3532_v8  ;;  %v4188_v34 = vmul.f32 -1.442695, %v2900_v40 }
 0x2d0   :  { %v4766_v29 = vpop.eup %4765  ;;  %v3471_v58 = vadd.f32 1.0, %v4764_v44  ;;  %4791 = vpow2.f32 %v4125_v47 }
 0x2d1   :  { %v4768_v16 = vpop.eup %4767  ;;  %v3535_v12 = vadd.f32 1.0, %v4766_v29  ;;  %4793 = vpow2.f32 %v4189_v30  ;;  %v4404_v50 = vpop.f32.mrf.mxu0 }
 0x2d2   :  { %v4770_v42 = vpop.eup %4769  ;;  %3851 = vst.msk [vmem:[%s7661_s5 + $0xc0] sm:$0xff] %vm3826_vm1, %v4768_v16  ;;  %4795 = vrcp.f32 %v3471_v58  ;;  %v4500_v10 = vpop.f32.mrf.mxu1  ;;  %v2595_v33 = vadd.f32 %v7161_v1, %v4404_v50 }
 0x2d3   :  { %v4772_v63 = vpop.eup %4771  ;;  %4797 = vrcp.f32 %v3535_v12  ;;  %v3470_v17 = vadd.f32 1.0, %v4770_v42  ;;  %v2915_v48 = vadd.f32 %v7161_v1, %v4500_v10  ;;  %v2589_v60 = vpop.f32.mrf.mxu0 }
 0x2d4   :  { %v4774_v21 = vpop.eup %4773  ;;  %3915 = vst.msk [vmem:[%s7661_s5 + $0x2c0] sm:$0xff] %vm3826_vm1, %v4772_v63  ;;  %4799 = vpow2.f32 %v4124_v11  ;;  %v2909_v0 = vpop.f32.mrf.mxu1  ;;  %v4127_v38 = vmul.f32 -1.442695, %v2595_v33  ;;  %v2590_v37 = vadd.f32 %v7161_v1, %v2589_v60 }
 0x2d5   :  { %v4776_v62 = vpop.eup %4775  ;;  %4801 = vrcp.f32 %v3470_v17  ;;  %v3534_v39 = vadd.f32 1.0, %v4774_v21  ;;  %v2910_v22 = vadd.f32 %v7161_v1, %v2909_v0  ;;  %v4191_v20 = vmul.f32 -1.442695, %v2915_v48 }
 0x2d6   :  { %v4778_v61 = vpop.eup %4777  ;;  %v3473_v45 = vadd.f32 1.0, %v4776_v62  ;;  %4803 = vpow2.f32 %v4188_v34  ;;  %v4126_v41 = vmul.f32 -1.442695, %v2590_v37 }
 0x2d7   :  { %v4780_v13 = vpop.eup %4779  ;;  %3854 = vst.msk [vmem:[%s7661_s5 + $0xd8] sm:$0xff] %vm3826_vm1, %v4778_v61  ;;  %4805 = vrcp.f32 %v3534_v39  ;;  %v4190_v35 = vmul.f32 -1.442695, %v2910_v22 }
 0x2d8   :  { %v4782_v51 = vpop.eup %4781  ;;  %4807 = vrcp.f32 %v3473_v45  ;;  %v3537_v43 = vadd.f32 1.0, %v4780_v13 }
 0x2d9   :  { %v4784_v7 = vpop.eup %4783  ;;  %v3472_v19 = vadd.f32 1.0, %v4782_v51  ;;  %4809 = vpow2.f32 %v4127_v38  ;;  %v4407_v25 = vpop.f32.mrf.mxu0 }
 0x2da   :  { %v4786_v23 = vpop.eup %4785  ;;  %3918 = vst.msk [vmem:[%s7661_s5 + $0x2d8] sm:$0xff] %vm3826_vm1, %v4784_v7  ;;  %4811 = vrcp.f32 %v3537_v43  ;;  %v4503_v59 = vpop.f32.mrf.mxu1  ;;  %v2605_v14 = vadd.f32 %v7161_v1, %v4407_v25 }
 0x2db   :  { %v4788_v24 = vpop.eup %4787  ;;  %3853 = vst.msk [vmem:[%s7661_s5 + $0xd0] sm:$0xff] %vm3826_vm1, %v4786_v23  ;;  %4813 = vrcp.f32 %v3472_v19  ;;  %v2925_v54 = vadd.f32 %v7161_v1, %v4503_v59  ;;  %v2599_v3 = vpop.f32.mrf.mxu0 }
 0x2dc   :  { %v4790_v56 = vpop.eup %4789  ;;  %v3536_v6 = vadd.f32 1.0, %v4788_v24  ;;  %4815 = vpow2.f32 %v4191_v20  ;;  %v2919_v15 = vpop.f32.mrf.mxu1  ;;  %v2600_v46 = vadd.f32 %v7161_v1, %v2599_v3  ;;  %v4129_v28 = vmul.f32 -1.442695, %v2605_v14 }
 0x2dd   :  { %v4792_v27 = vpop.eup %4791  ;;  %3917 = vst.msk [vmem:[%s7661_s5 + $0x2d0] sm:$0xff] %vm3826_vm1, %v4790_v56  ;;  %4817 = vpow2.f32 %v4126_v41  ;;  %v4193_v2 = vmul.f32 -1.442695, %v2925_v54  ;;  %v2920_v52 = vadd.f32 %v7161_v1, %v2919_v15 }
 0x2de   :  { %v4794_v26 = vpop.eup %4793  ;;  %4819 = vrcp.f32 %v3536_v6  ;;  %v3475_v18 = vadd.f32 1.0, %v4792_v27  ;;  %v4128_v9 = vmul.f32 -1.442695, %v2600_v46 }
 0x2df   :  { %v4796_v55 = vpop.eup %4795  ;;  %v3539_v32 = vadd.f32 1.0, %v4794_v26  ;;  %4821 = vpow2.f32 %v4190_v35  ;;  %v4192_v30 = vmul.f32 -1.442695, %v2920_v52 }
 0x2e0   :  { %v4798_v31 = vpop.eup %4797  ;;  %3856 = vst.msk [vmem:[%s7661_s5 + $0xe8] sm:$0xff] %vm3826_vm1, %v4796_v55  ;;  %4823 = vrcp.f32 %v3475_v18 }
 0x2e1   :  { %v4800_v4 = vpop.eup %4799  ;;  %3920 = vst.msk [vmem:[%s7661_s5 + $0x2e8] sm:$0xff] %vm3826_vm1, %v4798_v31  ;;  %4825 = vrcp.f32 %v3539_v32  ;;  %v4410_v36 = vpop.f32.mrf.mxu0 }
 0x2e2   :  { %v4802_v57 = vpop.eup %4801  ;;  %v3474_v49 = vadd.f32 1.0, %v4800_v4  ;;  %4827 = vpow2.f32 %v4129_v28  ;;  %v4506_v8 = vpop.f32.mrf.mxu1  ;;  %v2615_v53 = vadd.f32 %v7161_v1, %v4410_v36 }
 0x2e3   :  { %v4804_v47 = vpop.eup %4803  ;;  %3855 = vst.msk [vmem:[%s7661_s5 + $0xe0] sm:$0xff] %vm3826_vm1, %v4802_v57  ;;  %4829 = vpow2.f32 %v4193_v2  ;;  %v2935_v5 = vadd.f32 %v7161_v1, %v4506_v8  ;;  %v2609_v29 = vpop.f32.mrf.mxu0 }
 0x2e4   :  { %v4806_v40 = vpop.eup %4805  ;;  %4831 = vrcp.f32 %v3474_v49  ;;  %v3538_v44 = vadd.f32 1.0, %v4804_v47  ;;  %v2929_v58 = vpop.f32.mrf.mxu1  ;;  %v4131_v16 = vmul.f32 -1.442695, %v2615_v53  ;;  %v2610_v12 = vadd.f32 %v7161_v1, %v2609_v29 }
 0x2e5   :  { %v4808_v11 = vpop.eup %4807  ;;  %3919 = vst.msk [vmem:[%s7661_s5 + $0x2e0] sm:$0xff] %vm3826_vm1, %v4806_v40  ;;  %4833 = vpow2.f32 %v4128_v9  ;;  %v4195_v34 = vmul.f32 -1.442695, %v2935_v5  ;;  %v2930_v50 = vadd.f32 %v7161_v1, %v2929_v58 }
 0x2e6   :  { %v4810_v42 = vpop.eup %4809  ;;  %3858 = vst.msk [vmem:[%s7661_s5 + $0xf8] sm:$0xff] %vm3826_vm1, %v4808_v11  ;;  %4835 = vrcp.f32 %v3538_v44  ;;  %v4130_v17 = vmul.f32 -1.442695, %v2610_v12 }
 0x2e7   :  { %v4812_v10 = vpop.eup %4811  ;;  %v3477_v63 = vadd.f32 1.0, %v4810_v42  ;;  %4837 = vpow2.f32 %v4192_v30  ;;  %v4194_v0 = vmul.f32 -1.442695, %v2930_v50 }
 0x2e8   :  { %v4814_v33 = vpop.eup %4813  ;;  %3922 = vst.msk [vmem:[%s7661_s5 + $0x2f8] sm:$0xff] %vm3826_vm1, %v4812_v10  ;;  %4839 = vpow2.f32 %v4131_v16 }
 0x2e9   :  { %v4816_v21 = vpop.eup %4815  ;;  %3857 = vst.msk [vmem:[%s7661_s5 + $0xf0] sm:$0xff] %vm3826_vm1, %v4814_v33  ;;  %4841 = vrcp.f32 %v3477_v63  ;;  %v4413_v62 = vpop.f32.mrf.mxu0 }
 0x2ea   :  { %v4818_v48 = vpop.eup %4817  ;;  %v3541_v60 = vadd.f32 1.0, %v4816_v21  ;;  %4843 = vpow2.f32 %v4195_v34  ;;  %v4509_v39 = vpop.f32.mrf.mxu1  ;;  %v2625_v45 = vadd.f32 %v7161_v1, %v4413_v62 }
 0x2eb   :  { %v4820_v38 = vpop.eup %4819  ;;  %v3476_v61 = vadd.f32 1.0, %v4818_v48  ;;  %4845 = vpow2.f32 %v4130_v17  ;;  %v2945_v37 = vadd.f32 %v7161_v1, %v4509_v39  ;;  %v2619_v22 = vpop.f32.mrf.mxu0 }
 0x2ec   :  { %v4822_v13 = vpop.eup %4821  ;;  %3921 = vst.msk [vmem:[%s7661_s5 + $0x2f0] sm:$0xff] %vm3826_vm1, %v4820_v38  ;;  %4847 = vrcp.f32 %v3541_v60  ;;  %v2939_v51 = vpop.f32.mrf.mxu1  ;;  %v4133_v7 = vmul.f32 -1.442695, %v2625_v45  ;;  %v2620_v23 = vadd.f32 %v7161_v1, %v2619_v22 }
 0x2ed   :  { %v4824_v43 = vpop.eup %4823  ;;  %4849 = vrcp.f32 %v3476_v61  ;;  %v3540_v20 = vadd.f32 1.0, %v4822_v13  ;;  %v4197_v19 = vmul.f32 -1.442695, %v2945_v37  ;;  %v2940_v25 = vadd.f32 %v7161_v1, %v2939_v51 }
 0x2ee   :  { %v4826_v41 = vpop.eup %4825  ;;  %3860 = vst.msk [vmem:[%s7661_s5 + $0x108] sm:$0xff] %vm3826_vm1, %v4824_v43  ;;  %4851 = vpow2.f32 %v4194_v0  ;;  %v4132_v14 = vmul.f32 -1.442695, %v2620_v23 }
 0x2ef   :  { %v4828_v59 = vpop.eup %4827  ;;  %3924 = vst.msk [vmem:[%s7661_s5 + $0x308] sm:$0xff] %vm3826_vm1, %v4826_v41  ;;  %4853 = vrcp.f32 %v3540_v20  ;;  %v4196_v3 = vmul.f32 -1.442695, %v2940_v25 }
 0x2f0   :  { %v4830_v24 = vpop.eup %4829  ;;  %v3479_v35 = vadd.f32 1.0, %v4828_v59  ;;  %4855 = vpow2.f32 %v4133_v7 }
 0x2f1   :  { %v4832_v54 = vpop.eup %4831  ;;  %v3543_v56 = vadd.f32 1.0, %v4830_v24  ;;  %4857 = vpow2.f32 %v4197_v19  ;;  %v4416_v15 = vpop.f32.mrf.mxu0 }
 0x2f2   :  { %v4834_v6 = vpop.eup %4833  ;;  %3859 = vst.msk [vmem:[%s7661_s5 + $0x100] sm:$0xff] %vm3826_vm1, %v4832_v54  ;;  %4859 = vrcp.f32 %v3479_v35  ;;  %v4512_v27 = vpop.f32.mrf.mxu1  ;;  %v2635_v18 = vadd.f32 %v7161_v1, %v4416_v15 }
 0x2f3   :  { %v4836_v46 = vpop.eup %4835  ;;  %4861 = vrcp.f32 %v3543_v56  ;;  %v3478_v26 = vadd.f32 1.0, %v4834_v6  ;;  %v2955_v55 = vadd.f32 %v7161_v1, %v4512_v27  ;;  %v2629_v32 = vpop.f32.mrf.mxu0 }
 0x2f4   :  { %v4838_v28 = vpop.eup %4837  ;;  %3923 = vst.msk [vmem:[%s7661_s5 + $0x300] sm:$0xff] %vm3826_vm1, %v4836_v46  ;;  %4863 = vpow2.f32 %v4132_v14  ;;  %v2949_v2 = vpop.f32.mrf.mxu1  ;;  %v4135_v4 = vmul.f32 -1.442695, %v2635_v18  ;;  %v2630_v49 = vadd.f32 %v7161_v1, %v2629_v32 }
 0x2f5   :  { %v4840_v52 = vpop.eup %4839  ;;  %4865 = vrcp.f32 %v3478_v26  ;;  %v3542_v31 = vadd.f32 1.0, %v4838_v28  ;;  %v2950_v8 = vadd.f32 %v7161_v1, %v2949_v2  ;;  %v4199_v53 = vmul.f32 -1.442695, %v2955_v55 }
 0x2f6   :  { %v4842_v9 = vpop.eup %4841  ;;  %v3481_v57 = vadd.f32 1.0, %v4840_v52  ;;  %4867 = vpow2.f32 %v4196_v3  ;;  %v4134_v44 = vmul.f32 -1.442695, %v2630_v49 }
 0x2f7   :  { %v4844_v36 = vpop.eup %4843  ;;  %3862 = vst.msk [vmem:[%s7661_s5 + $0x118] sm:$0xff] %vm3826_vm1, %v4842_v9  ;;  %4869 = vrcp.f32 %v3542_v31  ;;  %v4198_v12 = vmul.f32 -1.442695, %v2950_v8 }
 0x2f8   :  { %v4846_v47 = vpop.eup %4845  ;;  %4871 = vrcp.f32 %v3481_v57  ;;  %v3545_v30 = vadd.f32 1.0, %v4844_v36 }
 0x2f9   :  { %v4848_v5 = vpop.eup %4847  ;;  %v3480_v40 = vadd.f32 1.0, %v4846_v47  ;;  %4873 = vpow2.f32 %v4135_v4  ;;  %v4419_v58 = vpop.f32.mrf.mxu0 }
 0x2fa   :  { %v4850_v29 = vpop.eup %4849  ;;  %3926 = vst.msk [vmem:[%s7661_s5 + $0x318] sm:$0xff] %vm3826_vm1, %v4848_v5  ;;  %4875 = vrcp.f32 %v3545_v30  ;;  %v4515_v11 = vpop.f32.mrf.mxu1  ;;  %v2645_v42 = vadd.f32 %v7161_v1, %v4419_v58 }
 0x2fb   :  { %v4852_v16 = vpop.eup %4851  ;;  %3861 = vst.msk [vmem:[%s7661_s5 + $0x110] sm:$0xff] %vm3826_vm1, %v4850_v29  ;;  %4877 = vrcp.f32 %v3480_v40  ;;  %v2965_v34 = vadd.f32 %v7161_v1, %v4515_v11  ;;  %v2639_v63 = vpop.f32.mrf.mxu0 }
 0x2fc   :  { %v4854_v50 = vpop.eup %4853  ;;  %v3544_v10 = vadd.f32 1.0, %v4852_v16  ;;  %4879 = vpow2.f32 %v4199_v53  ;;  %v2959_v17 = vpop.f32.mrf.mxu1  ;;  %v2640_v21 = vadd.f32 %v7161_v1, %v2639_v63  ;;  %v4137_v0 = vmul.f32 -1.442695, %v2645_v42 }
 0x2fd   :  { %v4856_v33 = vpop.eup %4855  ;;  %3925 = vst.msk [vmem:[%s7661_s5 + $0x310] sm:$0xff] %vm3826_vm1, %v4854_v50  ;;  %4881 = vpow2.f32 %v4134_v44  ;;  %v4201_v38 = vmul.f32 -1.442695, %v2965_v34  ;;  %v2960_v61 = vadd.f32 %v7161_v1, %v2959_v17 }
 0x2fe   :  { %v4858_v48 = vpop.eup %4857  ;;  %4883 = vrcp.f32 %v3544_v10  ;;  %v3483_v60 = vadd.f32 1.0, %v4856_v33  ;;  %v4136_v13 = vmul.f32 -1.442695, %v2640_v21 }
 0x2ff   :  { %v4860_v62 = vpop.eup %4859  ;;  %v3547_v39 = vadd.f32 1.0, %v4858_v48  ;;  %4885 = vpow2.f32 %v4198_v12  ;;  %v4200_v19 = vmul.f32 -1.442695, %v2960_v61 }
 0x300   :  { %v4862_v45 = vpop.eup %4861  ;;  %3864 = vst.msk [vmem:[%s7661_s5 + $0x128] sm:$0xff] %vm3826_vm1, %v4860_v62  ;;  %4887 = vrcp.f32 %v3483_v60 }
 0x301   :  { %v4864_v37 = vpop.eup %4863  ;;  %3928 = vst.msk [vmem:[%s7661_s5 + $0x328] sm:$0xff] %vm3826_vm1, %v4862_v45  ;;  %4889 = vrcp.f32 %v3547_v39  ;;  %v4422_v43 = vpop.f32.mrf.mxu0 }
 0x302   :  { %v4866_v22 = vpop.eup %4865  ;;  %v3482_v51 = vadd.f32 1.0, %v4864_v37  ;;  %4891 = vpow2.f32 %v4137_v0  ;;  %v4518_v20 = vpop.f32.mrf.mxu1  ;;  %v2655_v41 = vadd.f32 %v7161_v1, %v4422_v43  ;;  %v7452_v37 = vld [vmem:[%s7660_s4] ss:$0 sm:$0xff] }
 0x303   :  { %v4868_v7 = vpop.eup %4867  ;;  %3863 = vst.msk [vmem:[%s7661_s5 + $0x120] sm:$0xff] %vm3826_vm1, %v4866_v22  ;;  %4893 = vpow2.f32 %v4201_v38  ;;  %v2975_v23 = vadd.f32 %v7161_v1, %v4518_v20  ;;  %v2649_v24 = vpop.f32.mrf.mxu0 }
 0x304   :  { %v4870_v25 = vpop.eup %4869  ;;  %4895 = vrcp.f32 %v3482_v51  ;;  %v3546_v59 = vadd.f32 1.0, %v4868_v7  ;;  %v2969_v35 = vpop.f32.mrf.mxu1  ;;  %v4139_v54 = vmul.f32 -1.442695, %v2655_v41  ;;  %v2650_v56 = vadd.f32 %v7161_v1, %v2649_v24 }
 0x305   :  { %v4872_v14 = vpop.eup %4871  ;;  %3927 = vst.msk [vmem:[%s7661_s5 + $0x320] sm:$0xff] %vm3826_vm1, %v4870_v25  ;;  %4897 = vpow2.f32 %v4136_v13  ;;  %v4203_v3 = vmul.f32 -1.442695, %v2975_v23  ;;  %v2970_v15 = vadd.f32 %v7161_v1, %v2969_v35 }
 0x306   :  { %v4874_v6 = vpop.eup %4873  ;;  %3866 = vst.msk [vmem:[%s7661_s5 + $0x138] sm:$0xff] %vm3826_vm1, %v4872_v14  ;;  %4899 = vrcp.f32 %v3546_v59  ;;  %v4138_v26 = vmul.f32 -1.442695, %v2650_v56 }
 0x307   :  { %v4876_v27 = vpop.eup %4875  ;;  %v3485_v46 = vadd.f32 1.0, %v4874_v6  ;;  %4901 = vpow2.f32 %v4200_v19  ;;  %v4202_v2 = vmul.f32 -1.442695, %v2970_v15 }
 0x308   :  { %v4878_v18 = vpop.eup %4877  ;;  %3930 = vst.msk [vmem:[%s7661_s5 + $0x338] sm:$0xff] %vm3826_vm1, %v4876_v27  ;;  %4903 = vpow2.f32 %v4139_v54 }
 0x309   :  { %v4880_v28 = vpop.eup %4879  ;;  %3865 = vst.msk [vmem:[%s7661_s5 + $0x130] sm:$0xff] %vm3826_vm1, %v4878_v18  ;;  %4905 = vrcp.f32 %v3485_v46  ;;  %v4425_v52 = vpop.f32.mrf.mxu0 }
 0x30a   :  { %v4882_v55 = vpop.eup %4881  ;;  %v3549_v32 = vadd.f32 1.0, %v4880_v28  ;;  %4907 = vpow2.f32 %v4203_v3  ;;  %v4521_v31 = vpop.f32.mrf.mxu1  ;;  %v2665_v57 = vadd.f32 %v7161_v1, %v4425_v52 }
 0x30b   :  { %v4884_v4 = vpop.eup %4883  ;;  %v3484_v9 = vadd.f32 1.0, %v4882_v55  ;;  %4909 = vpow2.f32 %v4138_v26  ;;  %v2985_v49 = vadd.f32 %v7161_v1, %v4521_v31  ;;  %v2659_v8 = vpop.f32.mrf.mxu0 }
 0x30c   :  { %v4886_v36 = vpop.eup %4885  ;;  %3929 = vst.msk [vmem:[%s7661_s5 + $0x330] sm:$0xff] %vm3826_vm1, %v4884_v4  ;;  %4911 = vrcp.f32 %v3549_v32  ;;  %v2979_v47 = vpop.f32.mrf.mxu1  ;;  %v4141_v5 = vmul.f32 -1.442695, %v2665_v57  ;;  %v2660_v29 = vadd.f32 %v7161_v1, %v2659_v8 }
 0x30d   :  { %v4888_v30 = vpop.eup %4887  ;;  %4913 = vrcp.f32 %v3484_v9  ;;  %v3548_v53 = vadd.f32 1.0, %v4886_v36  ;;  %v4205_v40 = vmul.f32 -1.442695, %v2985_v49  ;;  %v2980_v58 = vadd.f32 %v7161_v1, %v2979_v47 }
 0x30e   :  { %v4890_v44 = vpop.eup %4889  ;;  %3868 = vst.msk [vmem:[%s7661_s5 + $0x148] sm:$0xff] %vm3826_vm1, %v4888_v30  ;;  %4915 = vpow2.f32 %v4202_v2  ;;  %v4140_v42 = vmul.f32 -1.442695, %v2660_v29 }
 0x30f   :  { %v4892_v11 = vpop.eup %4891  ;;  %3932 = vst.msk [vmem:[%s7661_s5 + $0x348] sm:$0xff] %vm3826_vm1, %v4890_v44  ;;  %4917 = vrcp.f32 %v3548_v53  ;;  %v4204_v63 = vmul.f32 -1.442695, %v2980_v58 }
 0x310   :  { %v4894_v16 = vpop.eup %4893  ;;  %v3487_v12 = vadd.f32 1.0, %v4892_v11  ;;  %4919 = vpow2.f32 %v4141_v5 }
 0x311   :  { %v4896_v34 = vpop.eup %4895  ;;  %v3551_v50 = vadd.f32 1.0, %v4894_v16  ;;  %4921 = vpow2.f32 %v4205_v40  ;;  %v4428_v17 = vpop.f32.mrf.mxu0 }
 0x312   :  { %v4898_v10 = vpop.eup %4897  ;;  %3867 = vst.msk [vmem:[%s7661_s5 + $0x140] sm:$0xff] %vm3826_vm1, %v4896_v34  ;;  %4923 = vrcp.f32 %v3487_v12  ;;  %v2675_v48 = vadd.f32 %v7161_v1, %v4428_v17  ;;  %v4524_v60 = vpop.f32.mrf.mxu1 }
 0x313   :  { %v4900_v33 = vpop.eup %4899  ;;  %4925 = vrcp.f32 %v3551_v50  ;;  %v3486_v21 = vadd.f32 1.0, %v4898_v10  ;;  %v2995_v62 = vadd.f32 %v7161_v1, %v4524_v60  ;;  %v2669_v39 = vpop.f32.mrf.mxu0 }
 0x314   :  { %v4902_v0 = vpop.eup %4901  ;;  %3931 = vst.msk [vmem:[%s7661_s5 + $0x340] sm:$0xff] %vm3826_vm1, %v4900_v33  ;;  %4927 = vpow2.f32 %v4140_v42  ;;  %v4143_v45 = vmul.f32 -1.442695, %v2675_v48  ;;  %v2670_v13 = vadd.f32 %v7452_v37, %v2669_v39  ;;  %v2989_v22 = vpop.f32.mrf.mxu1 }
 0x315   :  { %v4904_v38 = vpop.eup %4903  ;;  %4929 = vrcp.f32 %v3486_v21  ;;  %v3550_v61 = vadd.f32 1.0, %v4902_v0  ;;  %v2990_v1 = vadd.f32 %v7452_v37, %v2989_v22  ;;  %v4207_v41 = vmul.f32 -1.442695, %v2995_v62 }
 0x316   :  { %v4906_v51 = vpop.eup %4905  ;;  %v3489_v43 = vadd.f32 1.0, %v4904_v38  ;;  %4931 = vpow2.f32 %v4204_v63  ;;  %v4142_v59 = vmul.f32 -1.442695, %v2670_v13 }
 0x317   :  { %v4908_v20 = vpop.eup %4907  ;;  %3870 = vst.msk [vmem:[%s7661_s5 + $0x158] sm:$0xff] %vm3826_vm1, %v4906_v51  ;;  %4933 = vrcp.f32 %v3550_v61  ;;  %v4206_v54 = vmul.f32 -1.442695, %v2990_v1 }
 0x318   :  { %v4910_v7 = vpop.eup %4909  ;;  %4935 = vrcp.f32 %v3489_v43  ;;  %v3553_v19 = vadd.f32 1.0, %v4908_v20 }
 0x319   :  { %v4912_v23 = vpop.eup %4911  ;;  %v3488_v25 = vadd.f32 1.0, %v4910_v7  ;;  %4937 = vpow2.f32 %v4143_v45  ;;  %v4431_v35 = vpop.f32.mrf.mxu0 }
 0x31a   :  { %v4914_v24 = vpop.eup %4913  ;;  %3934 = vst.msk [vmem:[%s7661_s5 + $0x358] sm:$0xff] %vm3826_vm1, %v4912_v23  ;;  %4939 = vrcp.f32 %v3553_v19  ;;  %v2685_v56 = vadd.f32 %v7452_v37, %v4431_v35  ;;  %v4527_v6 = vpop.f32.mrf.mxu1 }
 0x31b   :  { %v4916_v14 = vpop.eup %4915  ;;  %3869 = vst.msk [vmem:[%s7661_s5 + $0x150] sm:$0xff] %vm3826_vm1, %v4914_v24  ;;  %4941 = vrcp.f32 %v3488_v25  ;;  %v3005_v27 = vadd.f32 %v7452_v37, %v4527_v6  ;;  %v2679_v46 = vpop.f32.mrf.mxu0 }
 0x31c   :  { %v4918_v3 = vpop.eup %4917  ;;  %v3552_v15 = vadd.f32 1.0, %v4916_v14  ;;  %4943 = vpow2.f32 %v4207_v41  ;;  %v2680_v18 = vadd.f32 %v7452_v37, %v2679_v46  ;;  %v2999_v28 = vpop.f32.mrf.mxu1  ;;  %v4145_v2 = vmul.f32 -1.442695, %v2685_v56 }
 0x31d   :  { %v4920_v26 = vpop.eup %4919  ;;  %3933 = vst.msk [vmem:[%s7661_s5 + $0x350] sm:$0xff] %vm3826_vm1, %v4918_v3  ;;  %4945 = vpow2.f32 %v4142_v59  ;;  %v4209_v4 = vmul.f32 -1.442695, %v3005_v27  ;;  %v3000_v9 = vadd.f32 %v7452_v37, %v2999_v28 }
 0x31e   :  { %v4922_v55 = vpop.eup %4921  ;;  %4947 = vrcp.f32 %v3552_v15  ;;  %v3491_v32 = vadd.f32 1.0, %v4920_v26  ;;  %v4144_v36 = vmul.f32 -1.442695, %v2680_v18 }
 0x31f   :  { %v4924_v52 = vpop.eup %4923  ;;  %v3555_v31 = vadd.f32 1.0, %v4922_v55  ;;  %4949 = vpow2.f32 %v4206_v54  ;;  %v4208_v5 = vmul.f32 -1.442695, %v3000_v9 }
 0x320   :  { %v4926_v57 = vpop.eup %4925  ;;  %3872 = vst.msk [vmem:[%s7661_s5 + $0x168] sm:$0xff] %vm3826_vm1, %v4924_v52  ;;  %4951 = vrcp.f32 %v3491_v32 }
 0x321   :  { %v4928_v49 = vpop.eup %4927  ;;  %3936 = vst.msk [vmem:[%s7661_s5 + $0x368] sm:$0xff] %vm3826_vm1, %v4926_v57  ;;  %4953 = vrcp.f32 %v3555_v31  ;;  %v4434_v30 = vpop.f32.mrf.mxu0 }
 0x322   :  { %v4930_v8 = vpop.eup %4929  ;;  %v3490_v47 = vadd.f32 1.0, %v4928_v49  ;;  %4955 = vpow2.f32 %v4145_v2  ;;  %v2695_v40 = vadd.f32 %v7452_v37, %v4434_v30 }
 0x323   :  { %v4932_v53 = vpop.eup %4931  ;;  %3871 = vst.msk [vmem:[%s7661_s5 + $0x160] sm:$0xff] %vm3826_vm1, %v4930_v8  ;;  %4957 = vpow2.f32 %v4209_v4  ;;  %v4530_v58 = vpop.f32.mrf.mxu1 }
 0x324   :  { %v4934_v44 = vpop.eup %4933  ;;  %4959 = vrcp.f32 %v3490_v47  ;;  %v3554_v29 = vadd.f32 1.0, %v4932_v53  ;;  %v2689_v11 = vpop.f32.mrf.mxu0  ;;  %v4147_v12 = vmul.f32 -1.442695, %v2695_v40  ;;  %v3015_v42 = vadd.f32 %v7452_v37, %v4530_v58 }
 0x325   :  { %v4936_v16 = vpop.eup %4935  ;;  %3935 = vst.msk [vmem:[%s7661_s5 + $0x360] sm:$0xff] %vm3826_vm1, %v4934_v44  ;;  %4961 = vpow2.f32 %v4144_v36  ;;  %v2690_v34 = vadd.f32 %v7452_v37, %v2689_v11  ;;  %v3009_v10 = vpop.f32.mrf.mxu1 }
 0x326   :  { %v4938_v50 = vpop.eup %4937  ;;  %3874 = vst.msk [vmem:[%s7661_s5 + $0x178] sm:$0xff] %vm3826_vm1, %v4936_v16  ;;  %4963 = vrcp.f32 %v3554_v29  ;;  %v4211_v33 = vmul.f32 -1.442695, %v3015_v42  ;;  %v3010_v60 = vadd.f32 %v7452_v37, %v3009_v10 }
 0x327   :  { %v4940_v63 = vpop.eup %4939  ;;  %v3493_v17 = vadd.f32 1.0, %v4938_v50  ;;  %4965 = vpow2.f32 %v4208_v5  ;;  %v4146_v21 = vmul.f32 -1.442695, %v2690_v34 }
 0x328   :  { %v4942_v48 = vpop.eup %4941  ;;  %3938 = vst.msk [vmem:[%s7661_s5 + $0x378] sm:$0xff] %vm3826_vm1, %v4940_v63  ;;  %4967 = vpow2.f32 %v4147_v12  ;;  %v4210_v38 = vmul.f32 -1.442695, %v3010_v60 }
 0x329   :  { %v4944_v0 = vpop.eup %4943  ;;  %3873 = vst.msk [vmem:[%s7661_s5 + $0x170] sm:$0xff] %vm3826_vm1, %v4942_v48  ;;  %4969 = vrcp.f32 %v3493_v17  ;;  %v4437_v61 = vpop.f32.mrf.mxu0 }
 0x32a   :  { %v4946_v62 = vpop.eup %4945  ;;  %v3557_v39 = vadd.f32 1.0, %v4944_v0  ;;  %4971 = vpow2.f32 %v4211_v33  ;;  %v2705_v22 = vadd.f32 %v7452_v37, %v4437_v61 }
 0x32b   :  { %v4948_v45 = vpop.eup %4947  ;;  %v3492_v13 = vadd.f32 1.0, %v4946_v62  ;;  %4973 = vpow2.f32 %v4146_v21  ;;  %v4533_v43 = vpop.f32.mrf.mxu1 }
 0x32c   :  { %v4950_v51 = vpop.eup %4949  ;;  %3937 = vst.msk [vmem:[%s7661_s5 + $0x370] sm:$0xff] %vm3826_vm1, %v4948_v45  ;;  %4975 = vrcp.f32 %v3557_v39  ;;  %v2699_v20 = vpop.f32.mrf.mxu0  ;;  %v4149_v19 = vmul.f32 -1.442695, %v2705_v22  ;;  %v3025_v41 = vadd.f32 %v7452_v37, %v4533_v43 }
 0x32d   :  { %v4952_v1 = vpop.eup %4951  ;;  %4977 = vrcp.f32 %v3492_v13  ;;  %v3556_v7 = vadd.f32 1.0, %v4950_v51  ;;  %v2700_v25 = vadd.f32 %v7452_v37, %v2699_v20  ;;  %v3019_v59 = vpop.f32.mrf.mxu1 }
 0x32e   :  { %v4954_v23 = vpop.eup %4953  ;;  %3876 = vst.msk [vmem:[%s7661_s5 + $0x188] sm:$0xff] %vm3826_vm1, %v4952_v1  ;;  %4979 = vpow2.f32 %v4210_v38  ;;  %v4213_v35 = vmul.f32 -1.442695, %v3025_v41  ;;  %v3020_v14 = vadd.f32 %v7452_v37, %v3019_v59 }
 0x32f   :  { %v4956_v24 = vpop.eup %4955  ;;  %3940 = vst.msk [vmem:[%s7661_s5 + $0x388] sm:$0xff] %vm3826_vm1, %v4954_v23  ;;  %4981 = vrcp.f32 %v3556_v7  ;;  %v4148_v6 = vmul.f32 -1.442695, %v2700_v25 }
 0x330   :  { %v4958_v54 = vpop.eup %4957  ;;  %v3495_v56 = vadd.f32 1.0, %v4956_v24  ;;  %4983 = vpow2.f32 %v4149_v19  ;;  %v4212_v46 = vmul.f32 -1.442695, %v3020_v14 }
 0x331   :  { %v4960_v3 = vpop.eup %4959  ;;  %v3559_v15 = vadd.f32 1.0, %v4958_v54  ;;  %4985 = vpow2.f32 %v4213_v35  ;;  %v4440_v26 = vpop.f32.mrf.mxu0 }
 0x332   :  { %v4962_v27 = vpop.eup %4961  ;;  %3875 = vst.msk [vmem:[%s7661_s5 + $0x180] sm:$0xff] %vm3826_vm1, %v4960_v3  ;;  %4987 = vrcp.f32 %v3495_v56  ;;  %v2715_v55 = vadd.f32 %v7452_v37, %v4440_v26 }
 0x333   :  { %v4964_v18 = vpop.eup %4963  ;;  %4989 = vrcp.f32 %v3559_v15  ;;  %v3494_v28 = vadd.f32 1.0, %v4962_v27  ;;  %v2709_v52 = vpop.f32.mrf.mxu0 }
 0x334   :  { %v4966_v32 = vpop.eup %4965  ;;  %3939 = vst.msk [vmem:[%s7661_s5 + $0x380] sm:$0xff] %vm3826_vm1, %v4964_v18  ;;  %4991 = vpow2.f32 %v4148_v6  ;;  %v4536_v2 = vpop.f32.mrf.mxu1  ;;  %v4151_v9 = vmul.f32 -1.442695, %v2715_v55  ;;  %v2710_v8 = vadd.f32 %v7452_v37, %v2709_v52 }
 0x335   :  { %v4968_v31 = vpop.eup %4967  ;;  %4993 = vrcp.f32 %v3494_v28  ;;  %v3558_v4 = vadd.f32 1.0, %v4966_v32  ;;  %v3035_v57 = vadd.f32 %v7452_v37, %v4536_v2 }
 0x336   :  { %v4970_v49 = vpop.eup %4969  ;;  %v3497_v36 = vadd.f32 1.0, %v4968_v31  ;;  %4995 = vpow2.f32 %v4212_v46  ;;  %v3029_v47 = vpop.f32.mrf.mxu1  ;;  %v4150_v11 = vmul.f32 -1.442695, %v2710_v8 }
 0x337   :  { %v4972_v30 = vpop.eup %4971  ;;  %3878 = vst.msk [vmem:[%s7661_s5 + $0x198] sm:$0xff] %vm3826_vm1, %v4970_v49  ;;  %4997 = vrcp.f32 %v3558_v4  ;;  %v3030_v53 = vadd.f32 %v7452_v37, %v3029_v47  ;;  %v4215_v44 = vmul.f32 -1.442695, %v3035_v57 }
 0x338   :  { %v4974_v5 = vpop.eup %4973  ;;  %4999 = vrcp.f32 %v3497_v36  ;;  %v3561_v40 = vadd.f32 1.0, %v4972_v30 }
 0x339   :  { %v4976_v29 = vpop.eup %4975  ;;  %v3496_v58 = vadd.f32 1.0, %v4974_v5  ;;  %5001 = vpow2.f32 %v4151_v9  ;;  %v4214_v42 = vmul.f32 -1.442695, %v3030_v53 }
 0x33a   :  { %v4978_v16 = vpop.eup %4977  ;;  %3942 = vst.msk [vmem:[%s7661_s5 + $0x398] sm:$0xff] %vm3826_vm1, %v4976_v29  ;;  %5003 = vrcp.f32 %v3561_v40  ;;  %v4443_v34 = vpop.f32.mrf.mxu0 }
 0x33b   :  { %v4980_v12 = vpop.eup %4979  ;;  %3877 = vst.msk [vmem:[%s7661_s5 + $0x190] sm:$0xff] %vm3826_vm1, %v4978_v16  ;;  %5005 = vrcp.f32 %v3496_v58  ;;  %v4539_v50 = vpop.f32.mrf.mxu1  ;;  %v2725_v17 = vadd.f32 %v7452_v37, %v4443_v34 }
 0x33c   :  { %v4982_v10 = vpop.eup %4981  ;;  %v3560_v63 = vadd.f32 1.0, %v4980_v12  ;;  %5007 = vpow2.f32 %v4215_v44  ;;  %v3045_v33 = vadd.f32 %v7452_v37, %v4539_v50  ;;  %v2719_v48 = vpop.f32.mrf.mxu0 }
 0x33d   :  { %v4984_v21 = vpop.eup %4983  ;;  %3941 = vst.msk [vmem:[%s7661_s5 + $0x390] sm:$0xff] %vm3826_vm1, %v4982_v10  ;;  %5009 = vpow2.f32 %v4150_v11  ;;  %v3039_v60 = vpop.f32.mrf.mxu1  ;;  %v4153_v39 = vmul.f32 -1.442695, %v2725_v17  ;;  %v2720_v13 = vadd.f32 %v7452_v37, %v2719_v48 }
 0x33e   :  { %v4986_v0 = vpop.eup %4985  ;;  %5011 = vrcp.f32 %v3560_v63  ;;  %v3499_v62 = vadd.f32 1.0, %v4984_v21  ;;  %v4217_v38 = vmul.f32 -1.442695, %v3045_v33  ;;  %v3040_v22 = vadd.f32 %v7452_v37, %v3039_v60 }
 0x33f   :  { %v4988_v61 = vpop.eup %4987  ;;  %v3563_v45 = vadd.f32 1.0, %v4986_v0  ;;  %5013 = vpow2.f32 %v4214_v42  ;;  %v4152_v20 = vmul.f32 -1.442695, %v2720_v13 }
 0x340   :  { %v4990_v51 = vpop.eup %4989  ;;  %3880 = vst.msk [vmem:[%s7661_s5 + $0x1a8] sm:$0xff] %vm3826_vm1, %v4988_v61  ;;  %5015 = vrcp.f32 %v3499_v62  ;;  %v4216_v41 = vmul.f32 -1.442695, %v3040_v22 }
 0x341   :  { %v4992_v43 = vpop.eup %4991  ;;  %3944 = vst.msk [vmem:[%s7661_s5 + $0x3a8] sm:$0xff] %vm3826_vm1, %v4990_v51  ;;  %5017 = vrcp.f32 %v3563_v45 }
 0x342   :  { %v4994_v1 = vpop.eup %4993  ;;  %v3498_v7 = vadd.f32 1.0, %v4992_v43  ;;  %5019 = vpow2.f32 %v4153_v39  ;;  %v4446_v23 = vpop.f32.mrf.mxu0 }
 0x343   :  { %v4996_v19 = vpop.eup %4995  ;;  %3879 = vst.msk [vmem:[%s7661_s5 + $0x1a0] sm:$0xff] %vm3826_vm1, %v4994_v1  ;;  %5021 = vpow2.f32 %v4217_v38  ;;  %v2735_v24 = vadd.f32 %v7452_v37, %v4446_v23  ;;  %v4542_v35 = vpop.f32.mrf.mxu1 }
 0x344   :  { %v4998_v25 = vpop.eup %4997  ;;  %5023 = vrcp.f32 %v3498_v7  ;;  %v3562_v59 = vadd.f32 1.0, %v4996_v19  ;;  %v3055_v54 = vadd.f32 %v7452_v37, %v4542_v35  ;;  %v2729_v56 = vpop.f32.mrf.mxu0 }
 0x345   :  { %v5000_v14 = vpop.eup %4999  ;;  %3943 = vst.msk [vmem:[%s7661_s5 + $0x3a0] sm:$0xff] %vm3826_vm1, %v4998_v25  ;;  %5025 = vpow2.f32 %v4152_v20  ;;  %v4155_v3 = vmul.f32 -1.442695, %v2735_v24  ;;  %v2730_v15 = vadd.f32 %v7452_v37, %v2729_v56  ;;  %v3049_v27 = vpop.f32.mrf.mxu1 }
 0x346   :  { %v5002_v6 = vpop.eup %5001  ;;  %3882 = vst.msk [vmem:[%s7661_s5 + $0x1b8] sm:$0xff] %vm3826_vm1, %v5000_v14  ;;  %5027 = vrcp.f32 %v3562_v59  ;;  %v4219_v18 = vmul.f32 -1.442695, %v3055_v54  ;;  %v3050_v28 = vadd.f32 %v7452_v37, %v3049_v27 }
 0x347   :  { %v5004_v46 = vpop.eup %5003  ;;  %v3501_v26 = vadd.f32 1.0, %v5002_v6  ;;  %5029 = vpow2.f32 %v4216_v41  ;;  %v4154_v32 = vmul.f32 -1.442695, %v2730_v15 }
 0x348   :  { %v5006_v55 = vpop.eup %5005  ;;  %3946 = vst.msk [vmem:[%s7661_s5 + $0x3b8] sm:$0xff] %vm3826_vm1, %v5004_v46  ;;  %5031 = vpow2.f32 %v4155_v3  ;;  %v4218_v4 = vmul.f32 -1.442695, %v3050_v28 }
 0x349   :  { %v5008_v2 = vpop.eup %5007  ;;  %3881 = vst.msk [vmem:[%s7661_s5 + $0x1b0] sm:$0xff] %vm3826_vm1, %v5006_v55  ;;  %5033 = vrcp.f32 %v3501_v26 }
 0x34a   :  { %v5010_v52 = vpop.eup %5009  ;;  %v3565_v31 = vadd.f32 1.0, %v5008_v2  ;;  %5035 = vpow2.f32 %v4219_v18 }
 0x34b   :  { %v5012_v37 = vpop.eup %5011  ;;  %v3500_v9 = vadd.f32 1.0, %v5010_v52  ;;  %5037 = vpow2.f32 %v4154_v32 }
 0x34c   :  { %v5014_v57 = vpop.eup %5013  ;;  %3945 = vst.msk [vmem:[%s7661_s5 + $0x3b0] sm:$0xff] %vm3826_vm1, %v5012_v37  ;;  %5039 = vrcp.f32 %v3565_v31 }
 0x34d   :  { %v5016_v49 = vpop.eup %5015  ;;  %5041 = vrcp.f32 %v3500_v9  ;;  %v3564_v36 = vadd.f32 1.0, %v5014_v57 }
 0x34e   :  { %v5018_v8 = vpop.eup %5017  ;;  %3884 = vst.msk [vmem:[%s7661_s5 + $0x1c8] sm:$0xff] %vm3826_vm1, %v5016_v49  ;;  %5043 = vpow2.f32 %v4218_v4 }
 0x34f   :  { %v5020_v47 = vpop.eup %5019  ;;  %3948 = vst.msk [vmem:[%s7661_s5 + $0x3c8] sm:$0xff] %vm3826_vm1, %v5018_v8  ;;  %5045 = vrcp.f32 %v3564_v36 }
 0x350   :  { %v5022_v30 = vpop.eup %5021  ;;  %v3503_v53 = vadd.f32 1.0, %v5020_v47 }
 0x351   :  { %v5024_v5 = vpop.eup %5023  ;;  %v3567_v40 = vadd.f32 1.0, %v5022_v30 }
 0x352   :  { %v5026_v44 = vpop.eup %5025  ;;  %3883 = vst.msk [vmem:[%s7661_s5 + $0x1c0] sm:$0xff] %vm3826_vm1, %v5024_v5  ;;  %5047 = vrcp.f32 %v3503_v53 }
 0x353   :  { %v5028_v29 = vpop.eup %5027  ;;  %5049 = vrcp.f32 %v3567_v40  ;;  %v3502_v58 = vadd.f32 1.0, %v5026_v44 }
 0x354   :  { %v5030_v11 = vpop.eup %5029  ;;  %3947 = vst.msk [vmem:[%s7661_s5 + $0x3c0] sm:$0xff] %vm3826_vm1, %v5028_v29 }
 0x355   :  { %v5032_v16 = vpop.eup %5031  ;;  %5051 = vrcp.f32 %v3502_v58  ;;  %v3566_v12 = vadd.f32 1.0, %v5030_v11 }
 0x356   :  { %v5034_v42 = vpop.eup %5033  ;;  %v3505_v34 = vadd.f32 1.0, %v5032_v16 }
 0x357   :  { %v5036_v50 = vpop.eup %5035  ;;  %3886 = vst.msk [vmem:[%s7661_s5 + $0x1d8] sm:$0xff] %vm3826_vm1, %v5034_v42  ;;  %5053 = vrcp.f32 %v3566_v12 }
 0x358   :  { %v5038_v10 = vpop.eup %5037  ;;  %5055 = vrcp.f32 %v3505_v34  ;;  %v3569_v63 = vadd.f32 1.0, %v5036_v50 }
 0x359   :  { %v5040_v17 = vpop.eup %5039  ;;  %v3504_v33 = vadd.f32 1.0, %v5038_v10 }
 0x35a   :  { %v5042_v21 = vpop.eup %5041  ;;  %3950 = vst.msk [vmem:[%s7661_s5 + $0x3d8] sm:$0xff] %vm3826_vm1, %v5040_v17  ;;  %5057 = vrcp.f32 %v3569_v63 }
 0x35b   :  { %v5044_v48 = vpop.eup %5043  ;;  %3885 = vst.msk [vmem:[%s7661_s5 + $0x1d0] sm:$0xff] %vm3826_vm1, %v5042_v21  ;;  %5059 = vrcp.f32 %v3504_v33 }
 0x35c   :  { %v5046_v60 = vpop.eup %5045  ;;  %v3568_v0 = vadd.f32 1.0, %v5044_v48 }
 0x35d   :  { %3949 = vst.msk [vmem:[%s7661_s5 + $0x3d0] sm:$0xff] %vm3826_vm1, %v5046_v60 }
 0x35e   :  { %5061 = vrcp.f32 %v3568_v0 }
 0x35f   :  { %v5048_v62 = vpop.eup %5047 }
 0x360   :  { %v5050_v39 = vpop.eup %5049  ;;  %3888 = vst.msk [vmem:[%s7661_s5 + $0x1e8] sm:$0xff] %vm3826_vm1, %v5048_v62 }
 0x361   :  { %3952 = vst.msk [vmem:[%s7661_s5 + $0x3e8] sm:$0xff] %vm3826_vm1, %v5050_v39 }
 0x362   :  { %v5052_v38 = vpop.eup %5051 }
 0x363   :  { %3887 = vst.msk [vmem:[%s7661_s5 + $0x1e0] sm:$0xff] %vm3826_vm1, %v5052_v38 }
 0x364   :  { %v5054_v61 = vpop.eup %5053 }
 0x365   :  { %v5056_v45 = vpop.eup %5055  ;;  %3951 = vst.msk [vmem:[%s7661_s5 + $0x3e0] sm:$0xff] %vm3826_vm1, %v5054_v61 }
 0x366   :  { %3890 = vst.msk [vmem:[%s7661_s5 + $0x1f8] sm:$0xff] %vm3826_vm1, %v5056_v45 }
 0x367   :  { %v5058_v13 = vpop.eup %5057 }
 0x368   :  { %v5060_v22 = vpop.eup %5059  ;;  %3954 = vst.msk [vmem:[%s7661_s5 + $0x3f8] sm:$0xff] %vm3826_vm1, %v5058_v13 }
 0x369   :  { %3889 = vst.msk [vmem:[%s7661_s5 + $0x1f0] sm:$0xff] %vm3826_vm1, %v5060_v22 }
 0x36b   :  { %v5062_v51 = vpop.eup %5061 }
 0x36c   :  { %3953 = vst.msk [vmem:[%s7661_s5 + $0x3f0] sm:$0xff] %vm3826_vm1, %v5062_v51 }

</bundles_post_ra>
